<compile_context>
chip_gen: v5e
topology: v5e:2x2
jax: 0.10.0
libtpu: 0.0.40
codegen_flags: <defaults>
</compile_context>

<pallas_src>
import functools
import math

import jax
import jax.numpy as jnp
from jax import lax
from jax.experimental import pallas as pl
from jax.experimental.pallas import tpu as pltpu


# ----------------------------------------------------------------------------
# Fused kernel: Bt batch rows per grid program.
#   hoisted x @ W_i  ->  GRU recurrence (fused gates)  ->  fused QKV projection
#   ->  block-diagonal masked attention  ->  mean over time  ->  output proj.
# ----------------------------------------------------------------------------
def _tar_fused_kernel(x_ref, w_i_ref, w_h_ref, b_i_ref, b_h_ref,
                      w_qkv_ref, w_o_ref, b_o_ref,
                      out_ref, xi_s, x1_s,
                      *, bt, T, H, heads, sub, dv):
    cdt = w_i_ref.dtype                      # MXU operand dtype (bf16 or f32)
    n_rows = T * bt                          # time-major row count
    D = x_ref.shape[2]

    # ---- hoisted input projection for all (t, b): one (T*Bt, D) matmul -------
    # x block is time-major (T, Bt, D); merging the leading dims is layout-free
    # because Bt is a multiple of 8 (sublane tile).
    x2d = x_ref[...].reshape(n_rows, D)
    xi_s[...] = (jnp.dot(x2d.astype(cdt), w_i_ref[...],
                         preferred_element_type=jnp.float32)
                 + b_i_ref[...])                               # (T*Bt, 3H) f32

    w_h = w_h_ref[...]                                         # (H, 3H)
    b_h = b_h_ref[...]                                         # (1, 3H) f32

    # ---- GRU recurrence over time, Bt rows at a time --------------------------
    def gru_step(t, h):                                        # h: (Bt, H) f32
        row = pl.multiple_of(t * bt, bt)
        xt = xi_s[pl.ds(row, bt), :]                           # dense (Bt, 3H) load
        hh = jnp.dot(h.astype(cdt), w_h,
                     preferred_element_type=jnp.float32) + b_h
        r = jax.nn.sigmoid(xt[:, :H] + hh[:, :H])
        z = jax.nn.sigmoid(xt[:, H:2 * H] + hh[:, H:2 * H])
        n = jnp.tanh(xt[:, 2 * H:] + r * hh[:, 2 * H:])
        h_new = (1.0 - z) * n + z * h
        x1_s[pl.ds(row, bt), :] = h_new                        # dense (Bt, H) store
        return h_new

    lax.fori_loop(0, T, gru_step, jnp.zeros((bt, H), jnp.float32),
                  unroll=min(T, 8))

    # ---- multi-head temporal attention + mean over time ----------------------
    x1 = x1_s[...]                                             # (T*Bt, H) f32, time-major
    qkv = jnp.dot(x1.astype(cdt), w_qkv_ref[...],
                  preferred_element_type=jnp.float32)          # (T*Bt, heads*(2*sub+dv))
    hq = heads * sub

    # Rows i and j of the time-major layout belong to the same batch element
    # iff i % Bt == j % Bt -> block-diagonal mask (hoisted out of the head loop).
    ri = lax.broadcasted_iota(jnp.int32, (n_rows, n_rows), 0)
    ci = lax.broadcasted_iota(jnp.int32, (n_rows, n_rows), 1)
    same_b = (ri % bt) == (ci % bt)

    o_parts = []
    for hd in range(heads):                                    # static head loop
        qh = qkv[:, hd * sub:(hd + 1) * sub]                   # (T*Bt, sub)
        kh = qkv[:, hq + hd * sub: hq + (hd + 1) * sub]        # (T*Bt, sub)
        vh = qkv[:, 2 * hq + hd * dv: 2 * hq + (hd + 1) * dv]  # (T*Bt, dv)
        s = lax.dot_general(qh.astype(cdt), kh.astype(cdt),
                            (((1,), (1,)), ((), ())),
                            preferred_element_type=jnp.float32)  # (T*Bt, T*Bt)
        s = jnp.where(same_b, s, -1e30)                        # mask cross-batch keys
        p = jax.nn.softmax(s, axis=-1)                         # per-(t,b) over its T keys
        # mean over query time inside each batch group, BEFORE the @ V matmul:
        pm = jnp.mean(p.reshape(T, bt, n_rows), axis=0)        # (Bt, T*Bt)
        o_parts.append(jnp.dot(pm.astype(cdt), vh.astype(cdt),
                               preferred_element_type=jnp.float32))  # (Bt, dv)

    o_mean = jnp.concatenate(o_parts, axis=-1)                 # (Bt, heads*dv)
    y = (jnp.dot(o_mean.astype(cdt), w_o_ref[...],
                 preferred_element_type=jnp.float32)
         + b_o_ref[...])                                       # (Bt, att_out)
    out_ref[...] = y.astype(out_ref.dtype)


def _pick_batch_tile(B, max_bt=32):
    """Batch rows per grid program.

    Must divide B and be a multiple of 8 (sublane-dense blocks / layout-free
    leading-dim reshapes) unless it is B itself; prefer leaving >= 2 programs so
    v7x's two TensorCores both get work; capped so per-program VMEM stays small.
    """
    cands = [d for d in range(1, B + 1)
             if B % d == 0 and d <= max_bt and (d % 8 == 0 or d == B)]
    if not cands:
        return B
    return max(cands, key=lambda d: ((B // d) >= 2, d % 8 == 0, d))


def temporal_attentive_rnn_layer(features, params, *, mxu_dtype=jnp.bfloat16):
    B, T, D = features.shape
    H = params["w_hr"].shape[0]
    heads, att_in, sub = params["wq"].shape
    dv = params["wv"].shape[-1]
    att_out = params["wo"].shape[-1]
    assert att_in == H, "attention consumes the GRU hidden states"

    # Fused GRU gate weights / biases ([r | z | n] column blocks).
    w_i = jnp.concatenate([params["w_ir"], params["w_iz"], params["w_in"]], axis=1)
    w_h = jnp.concatenate([params["w_hr"], params["w_hz"], params["w_hn"]], axis=1)
    b_i = jnp.concatenate([params["b_r"], params["b_z"], params["b_in"]], axis=1)
    zero_b = jnp.zeros_like(params["b_hn"])
    b_h = jnp.concatenate([zero_b, zero_b, params["b_hn"]], axis=1)

    # Fused Q|K|V projection; fold 1/sqrt(sub) into W_q in f32, then cast once.
    scale = 1.0 / math.sqrt(sub)
    wq = jnp.transpose(params["wq"], (1, 0, 2)).reshape(H, heads * sub) * scale
    wk = jnp.transpose(params["wk"], (1, 0, 2)).reshape(H, heads * sub)
    wv = jnp.transpose(params["wv"], (1, 0, 2)).reshape(H, heads * dv)
    w_qkv = jnp.concatenate([wq, wk, wv], axis=1)              # (H, heads*(2*sub+dv))
    w_o = params["wo"].reshape(heads * dv, att_out)

    w_i = w_i.astype(mxu_dtype)
    w_h = w_h.astype(mxu_dtype)
    w_qkv = w_qkv.astype(mxu_dtype)
    w_o = w_o.astype(mxu_dtype)
    b_o = params["b_o"]                                        # biases stay f32

    bt = _pick_batch_tile(B)
    n_rows = T * bt

    # Time-major view (T, B, D): every per-timestep GRU access in the kernel
    # becomes a dense (Bt, .) slab and no in-kernel major-dim transpose is needed.
    features_tm = jnp.swapaxes(features, 0, 1)

    kernel = functools.partial(_tar_fused_kernel, bt=bt, T=T, H=H,
                               heads=heads, sub=sub, dv=dv)

    def rep(shape):
        return pl.BlockSpec(shape, lambda i: (0,) * len(shape))

    # VMEM budget: double-buffered x block + weights + scratches + per-head score
    # tile, with headroom; capped for v7x's 64 MiB physical VMEM.
    itm = jnp.dtype(mxu_dtype).itemsize
    est = (2 * T * bt * D * features.dtype.itemsize
           + 2 * itm * (w_i.size + w_h.size + w_qkv.size + w_o.size)
           + 4 * (b_i.size + b_h.size + b_o.size)
           + 4 * n_rows * (3 * H + H)
           + 4 * n_rows * n_rows
           + 4 * bt * att_out)
    vmem_limit = int(min(max(4 * est, 32 * 1024 * 1024), 64 * 1024 * 1024))

    out = pl.pallas_call(
        kernel,
        out_shape=jax.ShapeDtypeStruct((B, att_out), jnp.float32),
        grid=(B // bt,),
        in_specs=[
            pl.BlockSpec((T, bt, D), lambda i: (0, i, 0)),
            rep(w_i.shape), rep(w_h.shape), rep(b_i.shape), rep(b_h.shape),
            rep(w_qkv.shape), rep(w_o.shape), rep(b_o.shape),
        ],
        out_specs=pl.BlockSpec((bt, att_out), lambda i: (i, 0)),
        scratch_shapes=[pltpu.VMEM((n_rows, 3 * H), jnp.float32),  # hoisted x @ W_i
                        pltpu.VMEM((n_rows, H), jnp.float32)],     # GRU hidden states
        compiler_params=pltpu.CompilerParams(
            dimension_semantics=("parallel",),
            vmem_limit_bytes=vmem_limit),
    )(features_tm, w_i, w_h, b_i, b_h, w_qkv, w_o, b_o)
    return out                                                  # (B, att_out)


# ----------------------------------------------------------------------------
# Deterministic parameter init + pure-JAX reference for correctness check.
# ----------------------------------------------------------------------------
def init_params(key, rnn_in, rnn_out, att_in, att_out, sub, heads):
    assert att_in == rnn_out, "attention consumes the GRU hidden states"
    assert att_out % heads == 0
    dv = att_out // heads
    ks = jax.random.split(key, 15)

    def w(k, shape, fan_in):
        return jax.random.normal(k, shape, jnp.float32) / math.sqrt(fan_in)

    return {
        # GRU (torch.nn.GRU conventions, weights stored transposed for x @ W)
        "w_ir": w(ks[0], (rnn_in, rnn_out), rnn_in),
        "w_iz": w(ks[1], (rnn_in, rnn_out), rnn_in),
        "w_in": w(ks[2], (rnn_in, rnn_out), rnn_in),
        "w_hr": w(ks[3], (rnn_out, rnn_out), rnn_out),
        "w_hz": w(ks[4], (rnn_out, rnn_out), rnn_out),
        "w_hn": w(ks[5], (rnn_out, rnn_out), rnn_out),
        "b_r":  w(ks[6], (1, rnn_out), rnn_out),    # = b_ir + b_hr (combined)
        "b_z":  w(ks[7], (1, rnn_out), rnn_out),    # = b_iz + b_hz (combined)
        "b_in": w(ks[8], (1, rnn_out), rnn_out),
        "b_hn": w(ks[9], (1, rnn_out), rnn_out),
        # Multi-head temporal attention
        "wq":  w(ks[10], (heads, att_in, sub), att_in),
        "wk":  w(ks[11], (heads, att_in, sub), att_in),
        "wv":  w(ks[12], (heads, att_in, dv), att_in),
        "wo":  w(ks[13], (heads, dv, att_out), dv * heads),
        "b_o": w(ks[14], (1, att_out), att_out),
    }


def ref_forward(features, p):
    B, T, D = features.shape
    H = p["w_hr"].shape[0]

    def step(h, x_t):
        r = jax.nn.sigmoid(x_t @ p["w_ir"] + h @ p["w_hr"] + p["b_r"])
        z = jax.nn.sigmoid(x_t @ p["w_iz"] + h @ p["w_hz"] + p["b_z"])
        n = jnp.tanh(x_t @ p["w_in"] + p["b_in"] + r * (h @ p["w_hn"] + p["b_hn"]))
        h_new = (1.0 - z) * n + z * h
        return h_new, h_new

    h0 = jnp.zeros((B, H), jnp.float32)
    _, hs = jax.lax.scan(step, h0, jnp.swapaxes(features, 0, 1))
    x1 = jnp.swapaxes(hs, 0, 1)                                  # (B, T, H)

    sub = p["wq"].shape[-1]
    q = jnp.einsum("bth,ahs->bats", x1, p["wq"])
    k = jnp.einsum("bth,ahs->bats", x1, p["wk"])
    v = jnp.einsum("bth,ahv->batv", x1, p["wv"])
    s = jnp.einsum("bats,baus->batu", q, k) / math.sqrt(sub)
    a = jax.nn.softmax(s, axis=-1)
    o = jnp.einsum("batu,bauv->batv", a, v)
    y = jnp.einsum("batv,avo->bto", o, p["wo"]) + p["b_o"]       # (B, T, att_out)
    return y.mean(axis=1)                                        # (B, att_out)


if __name__ == "__main__":
    B, T = 16, 8
    rnn_input_dim, rnn_output_dim = 16, 32
    att_input_dim, att_output_dim, sub_dim, heads = 32, 32, 16, 4

    key = jax.random.PRNGKey(0)
    k_x, k_p = jax.random.split(key)
    features = jax.random.normal(k_x, (B, T, rnn_input_dim), jnp.float32)
    params = init_params(k_p, rnn_input_dim, rnn_output_dim,
                         att_input_dim, att_output_dim, sub_dim, heads)

    with jax.default_matmul_precision("highest"):
        ref = ref_forward(features, params)

    # Exact-math path (f32 MXU operands).
    out_f32 = jax.block_until_ready(
        temporal_attentive_rnn_layer(features, params, mxu_dtype=jnp.float32))
    assert out_f32.shape == (B, att_output_dim), out_f32.shape
    assert jnp.allclose(out_f32, ref, atol=2e-2, rtol=2e-2), (
        f"f32 mismatch vs pure-JAX reference:\npallas={out_f32}\nref={ref}")

    # Fast path (bf16 MXU operands, f32 accumulation) — perf-review default.
    out_bf16 = jax.block_until_ready(
        temporal_attentive_rnn_layer(features, params, mxu_dtype=jnp.bfloat16))
    assert out_bf16.shape == (B, att_output_dim), out_bf16.shape
    assert jnp.allclose(out_bf16, ref, atol=6e-2, rtol=6e-2), (
        f"bf16 mismatch vs pure-JAX reference:\npallas={out_bf16}\nref={ref}")

    print("KERNEL_OK")
</pallas_src>

<mosaic_0001>
module attributes {stable_mosaic.version = 11 : i64} {
  func.func @_tar_fused_kernel(%arg0: i32, %arg1: memref<8x8x16xf32, #tpu.memory_space<vmem>>, %arg2: memref<16x96xf32, #tpu.memory_space<vmem>>, %arg3: memref<32x96xf32, #tpu.memory_space<vmem>>, %arg4: memref<1x96xf32, #tpu.memory_space<vmem>>, %arg5: memref<1x96xf32, #tpu.memory_space<vmem>>, %arg6: memref<32x160xf32, #tpu.memory_space<vmem>>, %arg7: memref<32x32xf32, #tpu.memory_space<vmem>>, %arg8: memref<1x32xf32, #tpu.memory_space<vmem>>, %arg9: memref<8x32xf32, #tpu.memory_space<vmem>>, %arg10: memref<64x96xf32, #tpu.memory_space<vmem>>, %arg11: memref<64x32xf32, #tpu.memory_space<vmem>>) attributes {dimension_semantics = [#tpu.dimension_semantics<parallel>], iteration_bounds = array<i64: 2>, scalar_prefetch = 0 : i64, scratch_operands = 2 : i64, tpu.core_type = #tpu.core_type<tc>, window_params = [{transform_indices = @transform_0, window_bounds = array<i64: 8, 8, 16>}, {pipeline_mode = #tpu.pipeline_mode<synchronous>, transform_indices = @transform_1, window_bounds = array<i64: 16, 96>}, {pipeline_mode = #tpu.pipeline_mode<synchronous>, transform_indices = @transform_2, window_bounds = array<i64: 32, 96>}, {pipeline_mode = #tpu.pipeline_mode<synchronous>, transform_indices = @transform_3, window_bounds = array<i64: 1, 96>}, {pipeline_mode = #tpu.pipeline_mode<synchronous>, transform_indices = @transform_4, window_bounds = array<i64: 1, 96>}, {pipeline_mode = #tpu.pipeline_mode<synchronous>, transform_indices = @transform_5, window_bounds = array<i64: 32, 160>}, {pipeline_mode = #tpu.pipeline_mode<synchronous>, transform_indices = @transform_6, window_bounds = array<i64: 32, 32>}, {pipeline_mode = #tpu.pipeline_mode<synchronous>, transform_indices = @transform_7, window_bounds = array<i64: 1, 32>}, {transform_indices = @transform_8, window_bounds = array<i64: 8, 32>}]} {
    %c0 = arith.constant 0 : index
    %c0_0 = arith.constant 0 : index
    %c0_1 = arith.constant 0 : index
    %0 = vector.load %arg1[%c0, %c0_0, %c0_1] : memref<8x8x16xf32, #tpu.memory_space<vmem>>, vector<8x8x16xf32>
    %1 = vector.shape_cast %0 : vector<8x8x16xf32> to vector<64x16xf32>
    %c0_2 = arith.constant 0 : index
    %c0_3 = arith.constant 0 : index
    %2 = vector.load %arg2[%c0_2, %c0_3] : memref<16x96xf32, #tpu.memory_space<vmem>>, vector<16x96xf32>
    %cst = arith.constant dense<0.000000e+00> : vector<64x96xf32>
    %3 = tpu.matmul %1, %2, %cst {dimension_numbers = #tpu.dot_dimension_numbers<[1], [0], [0], [1], [0, 0, 1, 1], [], []>} : vector<64x16xf32>, vector<16x96xf32>, vector<64x96xf32> -> vector<64x96xf32>
    %c0_4 = arith.constant 0 : index
    %c0_5 = arith.constant 0 : index
    %4 = vector.load %arg4[%c0_4, %c0_5] : memref<1x96xf32, #tpu.memory_space<vmem>>, vector<1x96xf32>
    %5 = vector.broadcast %4 : vector<1x96xf32> to vector<64x96xf32>
    %6 = arith.addf %3, %5 : vector<64x96xf32>
    %c0_6 = arith.constant 0 : index
    %c0_7 = arith.constant 0 : index
    %7 = vector.load %arg10[%c0_6, %c0_7] : memref<64x96xf32, #tpu.memory_space<vmem>>, vector<64x96xf32>
    tpu.vector_store %arg10[%c0_6, %c0_7], %6 {strides = array<i32>} : memref<64x96xf32, #tpu.memory_space<vmem>>, vector<64x96xf32>,
    %c0_8 = arith.constant 0 : index
    %c0_9 = arith.constant 0 : index
    %8 = vector.load %arg3[%c0_8, %c0_9] : memref<32x96xf32, #tpu.memory_space<vmem>>, vector<32x96xf32>
    %c0_10 = arith.constant 0 : index
    %c0_11 = arith.constant 0 : index
    %9 = vector.load %arg5[%c0_10, %c0_11] : memref<1x96xf32, #tpu.memory_space<vmem>>, vector<1x96xf32>
    %cst_12 = arith.constant 0.000000e+00 : f32
    %10 = vector.broadcast %cst_12 : f32 to vector<8x32xf32>
    %c0_i32 = arith.constant 0 : i32
    %c8_i32 = arith.constant 8 : i32
    %11 = arith.muli %c0_i32, %c8_i32 : i32
    %12 = tpu.assume_multiple %11, 8 : i32
    %13 = arith.index_cast %12 : i32 to index
    %c0_13 = arith.constant 0 : index
    %14 = vector.load %arg10[%13, %c0_13] : memref<64x96xf32, #tpu.memory_space<vmem>>, vector<8x96xf32>
    %cst_14 = arith.constant dense<0.000000e+00> : vector<8x96xf32>
    %15 = tpu.matmul %10, %8, %cst_14 {dimension_numbers = #tpu.dot_dimension_numbers<[1], [0], [0], [1], [0, 0, 1, 1], [], []>} : vector<8x32xf32>, vector<32x96xf32>, vector<8x96xf32> -> vector<8x96xf32>
    %16 = vector.broadcast %9 : vector<1x96xf32> to vector<8x96xf32>
    %17 = arith.addf %15, %16 : vector<8x96xf32>
    %18 = vector.extract_strided_slice %14 {offsets = [0, 0], sizes = [8, 32], strides = [1, 1]} : vector<8x96xf32> to vector<8x32xf32>
    %19 = vector.extract_strided_slice %17 {offsets = [0, 0], sizes = [8, 32], strides = [1, 1]} : vector<8x96xf32> to vector<8x32xf32>
    %20 = arith.addf %18, %19 : vector<8x32xf32>
    %21 = arith.negf %20 : vector<8x32xf32>
    %22 = math.exp %21 : vector<8x32xf32>
    %cst_15 = arith.constant 1.000000e+00 : f32
    %23 = vector.broadcast %cst_15 : f32 to vector<8x32xf32>
    %24 = arith.addf %23, %22 : vector<8x32xf32>
    %25 = arith.divf %23, %24 : vector<8x32xf32>
    %26 = vector.extract_strided_slice %14 {offsets = [0, 32], sizes = [8, 32], strides = [1, 1]} : vector<8x96xf32> to vector<8x32xf32>
    %27 = vector.extract_strided_slice %17 {offsets = [0, 32], sizes = [8, 32], strides = [1, 1]} : vector<8x96xf32> to vector<8x32xf32>
    %28 = arith.addf %26, %27 : vector<8x32xf32>
    %29 = arith.negf %28 : vector<8x32xf32>
    %30 = math.exp %29 : vector<8x32xf32>
    %cst_16 = arith.constant 1.000000e+00 : f32
    %31 = vector.broadcast %cst_16 : f32 to vector<8x32xf32>
    %32 = arith.addf %31, %30 : vector<8x32xf32>
    %33 = arith.divf %31, %32 : vector<8x32xf32>
    %34 = vector.extract_strided_slice %14 {offsets = [0, 64], sizes = [8, 32], strides = [1, 1]} : vector<8x96xf32> to vector<8x32xf32>
    %35 = vector.extract_strided_slice %17 {offsets = [0, 64], sizes = [8, 32], strides = [1, 1]} : vector<8x96xf32> to vector<8x32xf32>
    %36 = arith.mulf %25, %35 : vector<8x32xf32>
    %37 = arith.addf %34, %36 : vector<8x32xf32>
    %38 = math.tanh %37 : vector<8x32xf32>
    %cst_17 = arith.constant 1.000000e+00 : f32
    %39 = vector.broadcast %cst_17 : f32 to vector<8x32xf32>
    %40 = arith.subf %39, %33 : vector<8x32xf32>
    %41 = arith.mulf %40, %38 : vector<8x32xf32>
    %42 = arith.mulf %33, %10 : vector<8x32xf32>
    %43 = arith.addf %41, %42 : vector<8x32xf32>
    %44 = arith.index_cast %12 : i32 to index
    %c0_18 = arith.constant 0 : index
    %45 = vector.load %arg11[%44, %c0_18] : memref<64x32xf32, #tpu.memory_space<vmem>>, vector<8x32xf32>
    tpu.vector_store %arg11[%44, %c0_18], %43 {strides = array<i32>} : memref<64x32xf32, #tpu.memory_space<vmem>>, vector<8x32xf32>,
    %c1_i32 = arith.constant 1 : i32
    %c8_i32_19 = arith.constant 8 : i32
    %46 = arith.muli %c1_i32, %c8_i32_19 : i32
    %47 = tpu.assume_multiple %46, 8 : i32
    %48 = arith.index_cast %47 : i32 to index
    %c0_20 = arith.constant 0 : index
    %49 = vector.load %arg10[%48, %c0_20] : memref<64x96xf32, #tpu.memory_space<vmem>>, vector<8x96xf32>
    %cst_21 = arith.constant dense<0.000000e+00> : vector<8x96xf32>
    %50 = tpu.matmul %43, %8, %cst_21 {dimension_numbers = #tpu.dot_dimension_numbers<[1], [0], [0], [1], [0, 0, 1, 1], [], []>} : vector<8x32xf32>, vector<32x96xf32>, vector<8x96xf32> -> vector<8x96xf32>
    %51 = vector.broadcast %9 : vector<1x96xf32> to vector<8x96xf32>
    %52 = arith.addf %50, %51 : vector<8x96xf32>
    %53 = vector.extract_strided_slice %49 {offsets = [0, 0], sizes = [8, 32], strides = [1, 1]} : vector<8x96xf32> to vector<8x32xf32>
    %54 = vector.extract_strided_slice %52 {offsets = [0, 0], sizes = [8, 32], strides = [1, 1]} : vector<8x96xf32> to vector<8x32xf32>
    %55 = arith.addf %53, %54 : vector<8x32xf32>
    %56 = arith.negf %55 : vector<8x32xf32>
    %57 = math.exp %56 : vector<8x32xf32>
    %cst_22 = arith.constant 1.000000e+00 : f32
    %58 = vector.broadcast %cst_22 : f32 to vector<8x32xf32>
    %59 = arith.addf %58, %57 : vector<8x32xf32>
    %60 = arith.divf %58, %59 : vector<8x32xf32>
    %61 = vector.extract_strided_slice %49 {offsets = [0, 32], sizes = [8, 32], strides = [1, 1]} : vector<8x96xf32> to vector<8x32xf32>
    %62 = vector.extract_strided_slice %52 {offsets = [0, 32], sizes = [8, 32], strides = [1, 1]} : vector<8x96xf32> to vector<8x32xf32>
    %63 = arith.addf %61, %62 : vector<8x32xf32>
    %64 = arith.negf %63 : vector<8x32xf32>
    %65 = math.exp %64 : vector<8x32xf32>
    %cst_23 = arith.constant 1.000000e+00 : f32
    %66 = vector.broadcast %cst_23 : f32 to vector<8x32xf32>
    %67 = arith.addf %66, %65 : vector<8x32xf32>
    %68 = arith.divf %66, %67 : vector<8x32xf32>
    %69 = vector.extract_strided_slice %49 {offsets = [0, 64], sizes = [8, 32], strides = [1, 1]} : vector<8x96xf32> to vector<8x32xf32>
    %70 = vector.extract_strided_slice %52 {offsets = [0, 64], sizes = [8, 32], strides = [1, 1]} : vector<8x96xf32> to vector<8x32xf32>
    %71 = arith.mulf %60, %70 : vector<8x32xf32>
    %72 = arith.addf %69, %71 : vector<8x32xf32>
    %73 = math.tanh %72 : vector<8x32xf32>
    %cst_24 = arith.constant 1.000000e+00 : f32
    %74 = vector.broadcast %cst_24 : f32 to vector<8x32xf32>
    %75 = arith.subf %74, %68 : vector<8x32xf32>
    %76 = arith.mulf %75, %73 : vector<8x32xf32>
    %77 = arith.mulf %68, %43 : vector<8x32xf32>
    %78 = arith.addf %76, %77 : vector<8x32xf32>
    %79 = arith.index_cast %47 : i32 to index
    %c0_25 = arith.constant 0 : index
    %80 = vector.load %arg11[%79, %c0_25] : memref<64x32xf32, #tpu.memory_space<vmem>>, vector<8x32xf32>
    tpu.vector_store %arg11[%79, %c0_25], %78 {strides = array<i32>} : memref<64x32xf32, #tpu.memory_space<vmem>>, vector<8x32xf32>,
    %c2_i32 = arith.constant 2 : i32
    %c8_i32_26 = arith.constant 8 : i32
    %81 = arith.muli %c2_i32, %c8_i32_26 : i32
    %82 = tpu.assume_multiple %81, 8 : i32
    %83 = arith.index_cast %82 : i32 to index
    %c0_27 = arith.constant 0 : index
    %84 = vector.load %arg10[%83, %c0_27] : memref<64x96xf32, #tpu.memory_space<vmem>>, vector<8x96xf32>
    %cst_28 = arith.constant dense<0.000000e+00> : vector<8x96xf32>
    %85 = tpu.matmul %78, %8, %cst_28 {dimension_numbers = #tpu.dot_dimension_numbers<[1], [0], [0], [1], [0, 0, 1, 1], [], []>} : vector<8x32xf32>, vector<32x96xf32>, vector<8x96xf32> -> vector<8x96xf32>
    %86 = vector.broadcast %9 : vector<1x96xf32> to vector<8x96xf32>
    %87 = arith.addf %85, %86 : vector<8x96xf32>
    %88 = vector.extract_strided_slice %84 {offsets = [0, 0], sizes = [8, 32], strides = [1, 1]} : vector<8x96xf32> to vector<8x32xf32>
    %89 = vector.extract_strided_slice %87 {offsets = [0, 0], sizes = [8, 32], strides = [1, 1]} : vector<8x96xf32> to vector<8x32xf32>
    %90 = arith.addf %88, %89 : vector<8x32xf32>
    %91 = arith.negf %90 : vector<8x32xf32>
    %92 = math.exp %91 : vector<8x32xf32>
    %cst_29 = arith.constant 1.000000e+00 : f32
    %93 = vector.broadcast %cst_29 : f32 to vector<8x32xf32>
    %94 = arith.addf %93, %92 : vector<8x32xf32>
    %95 = arith.divf %93, %94 : vector<8x32xf32>
    %96 = vector.extract_strided_slice %84 {offsets = [0, 32], sizes = [8, 32], strides = [1, 1]} : vector<8x96xf32> to vector<8x32xf32>
    %97 = vector.extract_strided_slice %87 {offsets = [0, 32], sizes = [8, 32], strides = [1, 1]} : vector<8x96xf32> to vector<8x32xf32>
    %98 = arith.addf %96, %97 : vector<8x32xf32>
    %99 = arith.negf %98 : vector<8x32xf32>
    %100 = math.exp %99 : vector<8x32xf32>
    %cst_30 = arith.constant 1.000000e+00 : f32
    %101 = vector.broadcast %cst_30 : f32 to vector<8x32xf32>
    %102 = arith.addf %101, %100 : vector<8x32xf32>
    %103 = arith.divf %101, %102 : vector<8x32xf32>
    %104 = vector.extract_strided_slice %84 {offsets = [0, 64], sizes = [8, 32], strides = [1, 1]} : vector<8x96xf32> to vector<8x32xf32>
    %105 = vector.extract_strided_slice %87 {offsets = [0, 64], sizes = [8, 32], strides = [1, 1]} : vector<8x96xf32> to vector<8x32xf32>
    %106 = arith.mulf %95, %105 : vector<8x32xf32>
    %107 = arith.addf %104, %106 : vector<8x32xf32>
    %108 = math.tanh %107 : vector<8x32xf32>
    %cst_31 = arith.constant 1.000000e+00 : f32
    %109 = vector.broadcast %cst_31 : f32 to vector<8x32xf32>
    %110 = arith.subf %109, %103 : vector<8x32xf32>
    %111 = arith.mulf %110, %108 : vector<8x32xf32>
    %112 = arith.mulf %103, %78 : vector<8x32xf32>
    %113 = arith.addf %111, %112 : vector<8x32xf32>
    %114 = arith.index_cast %82 : i32 to index
    %c0_32 = arith.constant 0 : index
    %115 = vector.load %arg11[%114, %c0_32] : memref<64x32xf32, #tpu.memory_space<vmem>>, vector<8x32xf32>
    tpu.vector_store %arg11[%114, %c0_32], %113 {strides = array<i32>} : memref<64x32xf32, #tpu.memory_space<vmem>>, vector<8x32xf32>,
    %c3_i32 = arith.constant 3 : i32
    %c8_i32_33 = arith.constant 8 : i32
    %116 = arith.muli %c3_i32, %c8_i32_33 : i32
    %117 = tpu.assume_multiple %116, 8 : i32
    %118 = arith.index_cast %117 : i32 to index
    %c0_34 = arith.constant 0 : index
    %119 = vector.load %arg10[%118, %c0_34] : memref<64x96xf32, #tpu.memory_space<vmem>>, vector<8x96xf32>
    %cst_35 = arith.constant dense<0.000000e+00> : vector<8x96xf32>
    %120 = tpu.matmul %113, %8, %cst_35 {dimension_numbers = #tpu.dot_dimension_numbers<[1], [0], [0], [1], [0, 0, 1, 1], [], []>} : vector<8x32xf32>, vector<32x96xf32>, vector<8x96xf32> -> vector<8x96xf32>
    %121 = vector.broadcast %9 : vector<1x96xf32> to vector<8x96xf32>
    %122 = arith.addf %120, %121 : vector<8x96xf32>
    %123 = vector.extract_strided_slice %119 {offsets = [0, 0], sizes = [8, 32], strides = [1, 1]} : vector<8x96xf32> to vector<8x32xf32>
    %124 = vector.extract_strided_slice %122 {offsets = [0, 0], sizes = [8, 32], strides = [1, 1]} : vector<8x96xf32> to vector<8x32xf32>
    %125 = arith.addf %123, %124 : vector<8x32xf32>
    %126 = arith.negf %125 : vector<8x32xf32>
    %127 = math.exp %126 : vector<8x32xf32>
    %cst_36 = arith.constant 1.000000e+00 : f32
    %128 = vector.broadcast %cst_36 : f32 to vector<8x32xf32>
    %129 = arith.addf %128, %127 : vector<8x32xf32>
    %130 = arith.divf %128, %129 : vector<8x32xf32>
    %131 = vector.extract_strided_slice %119 {offsets = [0, 32], sizes = [8, 32], strides = [1, 1]} : vector<8x96xf32> to vector<8x32xf32>
    %132 = vector.extract_strided_slice %122 {offsets = [0, 32], sizes = [8, 32], strides = [1, 1]} : vector<8x96xf32> to vector<8x32xf32>
    %133 = arith.addf %131, %132 : vector<8x32xf32>
    %134 = arith.negf %133 : vector<8x32xf32>
    %135 = math.exp %134 : vector<8x32xf32>
    %cst_37 = arith.constant 1.000000e+00 : f32
    %136 = vector.broadcast %cst_37 : f32 to vector<8x32xf32>
    %137 = arith.addf %136, %135 : vector<8x32xf32>
    %138 = arith.divf %136, %137 : vector<8x32xf32>
    %139 = vector.extract_strided_slice %119 {offsets = [0, 64], sizes = [8, 32], strides = [1, 1]} : vector<8x96xf32> to vector<8x32xf32>
    %140 = vector.extract_strided_slice %122 {offsets = [0, 64], sizes = [8, 32], strides = [1, 1]} : vector<8x96xf32> to vector<8x32xf32>
    %141 = arith.mulf %130, %140 : vector<8x32xf32>
    %142 = arith.addf %139, %141 : vector<8x32xf32>
    %143 = math.tanh %142 : vector<8x32xf32>
    %cst_38 = arith.constant 1.000000e+00 : f32
    %144 = vector.broadcast %cst_38 : f32 to vector<8x32xf32>
    %145 = arith.subf %144, %138 : vector<8x32xf32>
    %146 = arith.mulf %145, %143 : vector<8x32xf32>
    %147 = arith.mulf %138, %113 : vector<8x32xf32>
    %148 = arith.addf %146, %147 : vector<8x32xf32>
    %149 = arith.index_cast %117 : i32 to index
    %c0_39 = arith.constant 0 : index
    %150 = vector.load %arg11[%149, %c0_39] : memref<64x32xf32, #tpu.memory_space<vmem>>, vector<8x32xf32>
    tpu.vector_store %arg11[%149, %c0_39], %148 {strides = array<i32>} : memref<64x32xf32, #tpu.memory_space<vmem>>, vector<8x32xf32>,
    %c4_i32 = arith.constant 4 : i32
    %c8_i32_40 = arith.constant 8 : i32
    %151 = arith.muli %c4_i32, %c8_i32_40 : i32
    %152 = tpu.assume_multiple %151, 8 : i32
    %153 = arith.index_cast %152 : i32 to index
    %c0_41 = arith.constant 0 : index
    %154 = vector.load %arg10[%153, %c0_41] : memref<64x96xf32, #tpu.memory_space<vmem>>, vector<8x96xf32>
    %cst_42 = arith.constant dense<0.000000e+00> : vector<8x96xf32>
    %155 = tpu.matmul %148, %8, %cst_42 {dimension_numbers = #tpu.dot_dimension_numbers<[1], [0], [0], [1], [0, 0, 1, 1], [], []>} : vector<8x32xf32>, vector<32x96xf32>, vector<8x96xf32> -> vector<8x96xf32>
    %156 = vector.broadcast %9 : vector<1x96xf32> to vector<8x96xf32>
    %157 = arith.addf %155, %156 : vector<8x96xf32>
    %158 = vector.extract_strided_slice %154 {offsets = [0, 0], sizes = [8, 32], strides = [1, 1]} : vector<8x96xf32> to vector<8x32xf32>
    %159 = vector.extract_strided_slice %157 {offsets = [0, 0], sizes = [8, 32], strides = [1, 1]} : vector<8x96xf32> to vector<8x32xf32>
    %160 = arith.addf %158, %159 : vector<8x32xf32>
    %161 = arith.negf %160 : vector<8x32xf32>
    %162 = math.exp %161 : vector<8x32xf32>
    %cst_43 = arith.constant 1.000000e+00 : f32
    %163 = vector.broadcast %cst_43 : f32 to vector<8x32xf32>
    %164 = arith.addf %163, %162 : vector<8x32xf32>
    %165 = arith.divf %163, %164 : vector<8x32xf32>
    %166 = vector.extract_strided_slice %154 {offsets = [0, 32], sizes = [8, 32], strides = [1, 1]} : vector<8x96xf32> to vector<8x32xf32>
    %167 = vector.extract_strided_slice %157 {offsets = [0, 32], sizes = [8, 32], strides = [1, 1]} : vector<8x96xf32> to vector<8x32xf32>
    %168 = arith.addf %166, %167 : vector<8x32xf32>
    %169 = arith.negf %168 : vector<8x32xf32>
    %170 = math.exp %169 : vector<8x32xf32>
    %cst_44 = arith.constant 1.000000e+00 : f32
    %171 = vector.broadcast %cst_44 : f32 to vector<8x32xf32>
    %172 = arith.addf %171, %170 : vector<8x32xf32>
    %173 = arith.divf %171, %172 : vector<8x32xf32>
    %174 = vector.extract_strided_slice %154 {offsets = [0, 64], sizes = [8, 32], strides = [1, 1]} : vector<8x96xf32> to vector<8x32xf32>
    %175 = vector.extract_strided_slice %157 {offsets = [0, 64], sizes = [8, 32], strides = [1, 1]} : vector<8x96xf32> to vector<8x32xf32>
    %176 = arith.mulf %165, %175 : vector<8x32xf32>
    %177 = arith.addf %174, %176 : vector<8x32xf32>
    %178 = math.tanh %177 : vector<8x32xf32>
    %cst_45 = arith.constant 1.000000e+00 : f32
    %179 = vector.broadcast %cst_45 : f32 to vector<8x32xf32>
    %180 = arith.subf %179, %173 : vector<8x32xf32>
    %181 = arith.mulf %180, %178 : vector<8x32xf32>
    %182 = arith.mulf %173, %148 : vector<8x32xf32>
    %183 = arith.addf %181, %182 : vector<8x32xf32>
    %184 = arith.index_cast %152 : i32 to index
    %c0_46 = arith.constant 0 : index
    %185 = vector.load %arg11[%184, %c0_46] : memref<64x32xf32, #tpu.memory_space<vmem>>, vector<8x32xf32>
    tpu.vector_store %arg11[%184, %c0_46], %183 {strides = array<i32>} : memref<64x32xf32, #tpu.memory_space<vmem>>, vector<8x32xf32>,
    %c5_i32 = arith.constant 5 : i32
    %c8_i32_47 = arith.constant 8 : i32
    %186 = arith.muli %c5_i32, %c8_i32_47 : i32
    %187 = tpu.assume_multiple %186, 8 : i32
    %188 = arith.index_cast %187 : i32 to index
    %c0_48 = arith.constant 0 : index
    %189 = vector.load %arg10[%188, %c0_48] : memref<64x96xf32, #tpu.memory_space<vmem>>, vector<8x96xf32>
    %cst_49 = arith.constant dense<0.000000e+00> : vector<8x96xf32>
    %190 = tpu.matmul %183, %8, %cst_49 {dimension_numbers = #tpu.dot_dimension_numbers<[1], [0], [0], [1], [0, 0, 1, 1], [], []>} : vector<8x32xf32>, vector<32x96xf32>, vector<8x96xf32> -> vector<8x96xf32>
    %191 = vector.broadcast %9 : vector<1x96xf32> to vector<8x96xf32>
    %192 = arith.addf %190, %191 : vector<8x96xf32>
    %193 = vector.extract_strided_slice %189 {offsets = [0, 0], sizes = [8, 32], strides = [1, 1]} : vector<8x96xf32> to vector<8x32xf32>
    %194 = vector.extract_strided_slice %192 {offsets = [0, 0], sizes = [8, 32], strides = [1, 1]} : vector<8x96xf32> to vector<8x32xf32>
    %195 = arith.addf %193, %194 : vector<8x32xf32>
    %196 = arith.negf %195 : vector<8x32xf32>
    %197 = math.exp %196 : vector<8x32xf32>
    %cst_50 = arith.constant 1.000000e+00 : f32
    %198 = vector.broadcast %cst_50 : f32 to vector<8x32xf32>
    %199 = arith.addf %198, %197 : vector<8x32xf32>
    %200 = arith.divf %198, %199 : vector<8x32xf32>
    %201 = vector.extract_strided_slice %189 {offsets = [0, 32], sizes = [8, 32], strides = [1, 1]} : vector<8x96xf32> to vector<8x32xf32>
    %202 = vector.extract_strided_slice %192 {offsets = [0, 32], sizes = [8, 32], strides = [1, 1]} : vector<8x96xf32> to vector<8x32xf32>
    %203 = arith.addf %201, %202 : vector<8x32xf32>
    %204 = arith.negf %203 : vector<8x32xf32>
    %205 = math.exp %204 : vector<8x32xf32>
    %cst_51 = arith.constant 1.000000e+00 : f32
    %206 = vector.broadcast %cst_51 : f32 to vector<8x32xf32>
    %207 = arith.addf %206, %205 : vector<8x32xf32>
    %208 = arith.divf %206, %207 : vector<8x32xf32>
    %209 = vector.extract_strided_slice %189 {offsets = [0, 64], sizes = [8, 32], strides = [1, 1]} : vector<8x96xf32> to vector<8x32xf32>
    %210 = vector.extract_strided_slice %192 {offsets = [0, 64], sizes = [8, 32], strides = [1, 1]} : vector<8x96xf32> to vector<8x32xf32>
    %211 = arith.mulf %200, %210 : vector<8x32xf32>
    %212 = arith.addf %209, %211 : vector<8x32xf32>
    %213 = math.tanh %212 : vector<8x32xf32>
    %cst_52 = arith.constant 1.000000e+00 : f32
    %214 = vector.broadcast %cst_52 : f32 to vector<8x32xf32>
    %215 = arith.subf %214, %208 : vector<8x32xf32>
    %216 = arith.mulf %215, %213 : vector<8x32xf32>
    %217 = arith.mulf %208, %183 : vector<8x32xf32>
    %218 = arith.addf %216, %217 : vector<8x32xf32>
    %219 = arith.index_cast %187 : i32 to index
    %c0_53 = arith.constant 0 : index
    %220 = vector.load %arg11[%219, %c0_53] : memref<64x32xf32, #tpu.memory_space<vmem>>, vector<8x32xf32>
    tpu.vector_store %arg11[%219, %c0_53], %218 {strides = array<i32>} : memref<64x32xf32, #tpu.memory_space<vmem>>, vector<8x32xf32>,
    %c6_i32 = arith.constant 6 : i32
    %c8_i32_54 = arith.constant 8 : i32
    %221 = arith.muli %c6_i32, %c8_i32_54 : i32
    %222 = tpu.assume_multiple %221, 8 : i32
    %223 = arith.index_cast %222 : i32 to index
    %c0_55 = arith.constant 0 : index
    %224 = vector.load %arg10[%223, %c0_55] : memref<64x96xf32, #tpu.memory_space<vmem>>, vector<8x96xf32>
    %cst_56 = arith.constant dense<0.000000e+00> : vector<8x96xf32>
    %225 = tpu.matmul %218, %8, %cst_56 {dimension_numbers = #tpu.dot_dimension_numbers<[1], [0], [0], [1], [0, 0, 1, 1], [], []>} : vector<8x32xf32>, vector<32x96xf32>, vector<8x96xf32> -> vector<8x96xf32>
    %226 = vector.broadcast %9 : vector<1x96xf32> to vector<8x96xf32>
    %227 = arith.addf %225, %226 : vector<8x96xf32>
    %228 = vector.extract_strided_slice %224 {offsets = [0, 0], sizes = [8, 32], strides = [1, 1]} : vector<8x96xf32> to vector<8x32xf32>
    %229 = vector.extract_strided_slice %227 {offsets = [0, 0], sizes = [8, 32], strides = [1, 1]} : vector<8x96xf32> to vector<8x32xf32>
    %230 = arith.addf %228, %229 : vector<8x32xf32>
    %231 = arith.negf %230 : vector<8x32xf32>
    %232 = math.exp %231 : vector<8x32xf32>
    %cst_57 = arith.constant 1.000000e+00 : f32
    %233 = vector.broadcast %cst_57 : f32 to vector<8x32xf32>
    %234 = arith.addf %233, %232 : vector<8x32xf32>
    %235 = arith.divf %233, %234 : vector<8x32xf32>
    %236 = vector.extract_strided_slice %224 {offsets = [0, 32], sizes = [8, 32], strides = [1, 1]} : vector<8x96xf32> to vector<8x32xf32>
    %237 = vector.extract_strided_slice %227 {offsets = [0, 32], sizes = [8, 32], strides = [1, 1]} : vector<8x96xf32> to vector<8x32xf32>
    %238 = arith.addf %236, %237 : vector<8x32xf32>
    %239 = arith.negf %238 : vector<8x32xf32>
    %240 = math.exp %239 : vector<8x32xf32>
    %cst_58 = arith.constant 1.000000e+00 : f32
    %241 = vector.broadcast %cst_58 : f32 to vector<8x32xf32>
    %242 = arith.addf %241, %240 : vector<8x32xf32>
    %243 = arith.divf %241, %242 : vector<8x32xf32>
    %244 = vector.extract_strided_slice %224 {offsets = [0, 64], sizes = [8, 32], strides = [1, 1]} : vector<8x96xf32> to vector<8x32xf32>
    %245 = vector.extract_strided_slice %227 {offsets = [0, 64], sizes = [8, 32], strides = [1, 1]} : vector<8x96xf32> to vector<8x32xf32>
    %246 = arith.mulf %235, %245 : vector<8x32xf32>
    %247 = arith.addf %244, %246 : vector<8x32xf32>
    %248 = math.tanh %247 : vector<8x32xf32>
    %cst_59 = arith.constant 1.000000e+00 : f32
    %249 = vector.broadcast %cst_59 : f32 to vector<8x32xf32>
    %250 = arith.subf %249, %243 : vector<8x32xf32>
    %251 = arith.mulf %250, %248 : vector<8x32xf32>
    %252 = arith.mulf %243, %218 : vector<8x32xf32>
    %253 = arith.addf %251, %252 : vector<8x32xf32>
    %254 = arith.index_cast %222 : i32 to index
    %c0_60 = arith.constant 0 : index
    %255 = vector.load %arg11[%254, %c0_60] : memref<64x32xf32, #tpu.memory_space<vmem>>, vector<8x32xf32>
    tpu.vector_store %arg11[%254, %c0_60], %253 {strides = array<i32>} : memref<64x32xf32, #tpu.memory_space<vmem>>, vector<8x32xf32>,
    %c7_i32 = arith.constant 7 : i32
    %c8_i32_61 = arith.constant 8 : i32
    %256 = arith.muli %c7_i32, %c8_i32_61 : i32
    %257 = tpu.assume_multiple %256, 8 : i32
    %258 = arith.index_cast %257 : i32 to index
    %c0_62 = arith.constant 0 : index
    %259 = vector.load %arg10[%258, %c0_62] : memref<64x96xf32, #tpu.memory_space<vmem>>, vector<8x96xf32>
    %cst_63 = arith.constant dense<0.000000e+00> : vector<8x96xf32>
    %260 = tpu.matmul %253, %8, %cst_63 {dimension_numbers = #tpu.dot_dimension_numbers<[1], [0], [0], [1], [0, 0, 1, 1], [], []>} : vector<8x32xf32>, vector<32x96xf32>, vector<8x96xf32> -> vector<8x96xf32>
    %261 = vector.broadcast %9 : vector<1x96xf32> to vector<8x96xf32>
    %262 = arith.addf %260, %261 : vector<8x96xf32>
    %263 = vector.extract_strided_slice %259 {offsets = [0, 0], sizes = [8, 32], strides = [1, 1]} : vector<8x96xf32> to vector<8x32xf32>
    %264 = vector.extract_strided_slice %262 {offsets = [0, 0], sizes = [8, 32], strides = [1, 1]} : vector<8x96xf32> to vector<8x32xf32>
    %265 = arith.addf %263, %264 : vector<8x32xf32>
    %266 = arith.negf %265 : vector<8x32xf32>
    %267 = math.exp %266 : vector<8x32xf32>
    %cst_64 = arith.constant 1.000000e+00 : f32
    %268 = vector.broadcast %cst_64 : f32 to vector<8x32xf32>
    %269 = arith.addf %268, %267 : vector<8x32xf32>
    %270 = arith.divf %268, %269 : vector<8x32xf32>
    %271 = vector.extract_strided_slice %259 {offsets = [0, 32], sizes = [8, 32], strides = [1, 1]} : vector<8x96xf32> to vector<8x32xf32>
    %272 = vector.extract_strided_slice %262 {offsets = [0, 32], sizes = [8, 32], strides = [1, 1]} : vector<8x96xf32> to vector<8x32xf32>
    %273 = arith.addf %271, %272 : vector<8x32xf32>
    %274 = arith.negf %273 : vector<8x32xf32>
    %275 = math.exp %274 : vector<8x32xf32>
    %cst_65 = arith.constant 1.000000e+00 : f32
    %276 = vector.broadcast %cst_65 : f32 to vector<8x32xf32>
    %277 = arith.addf %276, %275 : vector<8x32xf32>
    %278 = arith.divf %276, %277 : vector<8x32xf32>
    %279 = vector.extract_strided_slice %259 {offsets = [0, 64], sizes = [8, 32], strides = [1, 1]} : vector<8x96xf32> to vector<8x32xf32>
    %280 = vector.extract_strided_slice %262 {offsets = [0, 64], sizes = [8, 32], strides = [1, 1]} : vector<8x96xf32> to vector<8x32xf32>
    %281 = arith.mulf %270, %280 : vector<8x32xf32>
    %282 = arith.addf %279, %281 : vector<8x32xf32>
    %283 = math.tanh %282 : vector<8x32xf32>
    %cst_66 = arith.constant 1.000000e+00 : f32
    %284 = vector.broadcast %cst_66 : f32 to vector<8x32xf32>
    %285 = arith.subf %284, %278 : vector<8x32xf32>
    %286 = arith.mulf %285, %283 : vector<8x32xf32>
    %287 = arith.mulf %278, %253 : vector<8x32xf32>
    %288 = arith.addf %286, %287 : vector<8x32xf32>
    %289 = arith.index_cast %257 : i32 to index
    %c0_67 = arith.constant 0 : index
    %290 = vector.load %arg11[%289, %c0_67] : memref<64x32xf32, #tpu.memory_space<vmem>>, vector<8x32xf32>
    tpu.vector_store %arg11[%289, %c0_67], %288 {strides = array<i32>} : memref<64x32xf32, #tpu.memory_space<vmem>>, vector<8x32xf32>,
    %c8_i32_68 = arith.constant 8 : i32
    %c0_69 = arith.constant 0 : index
    %c0_70 = arith.constant 0 : index
    %291 = vector.load %arg11[%c0_69, %c0_70] : memref<64x32xf32, #tpu.memory_space<vmem>>, vector<64x32xf32>
    %c0_71 = arith.constant 0 : index
    %c0_72 = arith.constant 0 : index
    %292 = vector.load %arg6[%c0_71, %c0_72] : memref<32x160xf32, #tpu.memory_space<vmem>>, vector<32x160xf32>
    %cst_73 = arith.constant dense<0.000000e+00> : vector<64x160xf32>
    %293 = tpu.matmul %291, %292, %cst_73 {dimension_numbers = #tpu.dot_dimension_numbers<[1], [0], [0], [1], [0, 0, 1, 1], [], []>} : vector<64x32xf32>, vector<32x160xf32>, vector<64x160xf32> -> vector<64x160xf32>
    %294 = tpu.iota {dimensions = array<i32: 0>} : vector<64x64xi32>
    %295 = tpu.iota {dimensions = array<i32: 1>} : vector<64x64xi32>
    %c8_i32_74 = arith.constant 8 : i32
    %c0_i32_75 = arith.constant 0 : i32
    %296 = arith.cmpi eq, %c8_i32_74, %c0_i32_75 : i32
    %c1_i32_76 = arith.constant 1 : i32
    %297 = arith.select %296, %c1_i32_76, %c8_i32_74 : i32
    %298 = vector.broadcast %297 : i32 to vector<64x64xi32>
    %299 = arith.remsi %294, %298 : vector<64x64xi32>
    %c0_i32_77 = arith.constant 0 : i32
    %300 = vector.broadcast %c0_i32_77 : i32 to vector<64x64xi32>
    %301 = arith.cmpi ne, %299, %300 : vector<64x64xi32>
    %c0_i32_78 = arith.constant 0 : i32
    %302 = vector.broadcast %c0_i32_78 : i32 to vector<64x64xi32>
    %303 = arith.cmpi slt, %299, %302 : vector<64x64xi32>
    %c0_i32_79 = arith.constant 0 : i32
    %304 = arith.cmpi slt, %297, %c0_i32_79 : i32
    %305 = vector.broadcast %304 : i1 to vector<64x64xi1>
    %306 = vector.broadcast %305 : vector<64x64xi1> to vector<64x64xi1>
    %307 = arith.xori %303, %306 : vector<64x64xi1>
    %308 = arith.andi %307, %301 : vector<64x64xi1>
    %309 = vector.broadcast %297 : i32 to vector<64x64xi32>
    %310 = arith.addi %299, %309 : vector<64x64xi32>
    %311 = arith.select %308, %310, %299 : vector<64x64xi1>, vector<64x64xi32>
    %c8_i32_80 = arith.constant 8 : i32
    %c0_i32_81 = arith.constant 0 : i32
    %312 = arith.cmpi eq, %c8_i32_80, %c0_i32_81 : i32
    %c1_i32_82 = arith.constant 1 : i32
    %313 = arith.select %312, %c1_i32_82, %c8_i32_80 : i32
    %314 = vector.broadcast %313 : i32 to vector<64x64xi32>
    %315 = arith.remsi %295, %314 : vector<64x64xi32>
    %c0_i32_83 = arith.constant 0 : i32
    %316 = vector.broadcast %c0_i32_83 : i32 to vector<64x64xi32>
    %317 = arith.cmpi ne, %315, %316 : vector<64x64xi32>
    %c0_i32_84 = arith.constant 0 : i32
    %318 = vector.broadcast %c0_i32_84 : i32 to vector<64x64xi32>
    %319 = arith.cmpi slt, %315, %318 : vector<64x64xi32>
    %c0_i32_85 = arith.constant 0 : i32
    %320 = arith.cmpi slt, %313, %c0_i32_85 : i32
    %321 = vector.broadcast %320 : i1 to vector<64x64xi1>
    %322 = vector.broadcast %321 : vector<64x64xi1> to vector<64x64xi1>
    %323 = arith.xori %319, %322 : vector<64x64xi1>
    %324 = arith.andi %323, %317 : vector<64x64xi1>
    %325 = vector.broadcast %313 : i32 to vector<64x64xi32>
    %326 = arith.addi %315, %325 : vector<64x64xi32>
    %327 = arith.select %324, %326, %315 : vector<64x64xi1>, vector<64x64xi32>
    %328 = arith.cmpi eq, %311, %327 : vector<64x64xi32>
    %329 = vector.extract_strided_slice %293 {offsets = [0, 0], sizes = [64, 16], strides = [1, 1]} : vector<64x160xf32> to vector<64x16xf32>
    %330 = vector.extract_strided_slice %293 {offsets = [0, 64], sizes = [64, 16], strides = [1, 1]} : vector<64x160xf32> to vector<64x16xf32>
    %331 = vector.extract_strided_slice %293 {offsets = [0, 128], sizes = [64, 8], strides = [1, 1]} : vector<64x160xf32> to vector<64x8xf32>
    %cst_86 = arith.constant dense<0.000000e+00> : vector<64x64xf32>
    %332 = tpu.matmul %329, %330, %cst_86 {dimension_numbers = #tpu.dot_dimension_numbers<[1], [1], [0], [0], [0, 0, 1, 0], [], []>} : vector<64x16xf32>, vector<64x16xf32>, vector<64x64xf32> -> vector<64x64xf32>
    %cst_87 = arith.constant -1.000000e+30 : f32
    %333 = vector.broadcast %cst_87 : f32 to vector<64x64xf32>
    %334 = arith.select %328, %332, %333 : vector<64x64xi1>, vector<64x64xf32>
    %cst_88 = arith.constant dense<0xFF800000> : vector<64xf32>
    %335 = vector.multi_reduction <maximumf>, %334, %cst_88 [1] : vector<64x64xf32> to vector<64xf32>
    %cst_89 = arith.constant 0xFF800000 : f32
    %336 = vector.broadcast %cst_89 : f32 to vector<64xf32>
    %337 = arith.maximumf %336, %335 : vector<64xf32>
    %338 = vector.shape_cast %337 : vector<64xf32> to vector<64x1xf32>
    %339 = vector.broadcast %338 : vector<64x1xf32> to vector<64x64xf32>
    %340 = arith.subf %334, %339 : vector<64x64xf32>
    %341 = math.exp %340 : vector<64x64xf32>
    %cst_90 = arith.constant dense<0.000000e+00> : vector<64xf32>
    %342 = vector.multi_reduction <add>, %341, %cst_90 [1] : vector<64x64xf32> to vector<64xf32>
    %343 = vector.shape_cast %342 : vector<64xf32> to vector<64x1xf32>
    %344 = vector.broadcast %343 : vector<64x1xf32> to vector<64x64xf32>
    %345 = arith.divf %341, %344 : vector<64x64xf32>
    %346 = vector.shape_cast %345 : vector<64x64xf32> to vector<8x8x64xf32>
    %cst_91 = arith.constant dense<0.000000e+00> : vector<8x64xf32>
    %347 = vector.multi_reduction <add>, %346, %cst_91 [0] : vector<8x8x64xf32> to vector<8x64xf32>
    %cst_92 = arith.constant 8.000000e+00 : f32
    %348 = vector.broadcast %cst_92 : f32 to vector<8x64xf32>
    %349 = arith.divf %347, %348 : vector<8x64xf32>
    %cst_93 = arith.constant dense<0.000000e+00> : vector<8x8xf32>
    %350 = tpu.matmul %349, %331, %cst_93 {dimension_numbers = #tpu.dot_dimension_numbers<[1], [0], [0], [1], [0, 0, 1, 1], [], []>} : vector<8x64xf32>, vector<64x8xf32>, vector<8x8xf32> -> vector<8x8xf32>
    %351 = vector.extract_strided_slice %293 {offsets = [0, 16], sizes = [64, 16], strides = [1, 1]} : vector<64x160xf32> to vector<64x16xf32>
    %352 = vector.extract_strided_slice %293 {offsets = [0, 80], sizes = [64, 16], strides = [1, 1]} : vector<64x160xf32> to vector<64x16xf32>
    %353 = vector.extract_strided_slice %293 {offsets = [0, 136], sizes = [64, 8], strides = [1, 1]} : vector<64x160xf32> to vector<64x8xf32>
    %cst_94 = arith.constant dense<0.000000e+00> : vector<64x64xf32>
    %354 = tpu.matmul %351, %352, %cst_94 {dimension_numbers = #tpu.dot_dimension_numbers<[1], [1], [0], [0], [0, 0, 1, 0], [], []>} : vector<64x16xf32>, vector<64x16xf32>, vector<64x64xf32> -> vector<64x64xf32>
    %cst_95 = arith.constant -1.000000e+30 : f32
    %355 = vector.broadcast %cst_95 : f32 to vector<64x64xf32>
    %356 = arith.select %328, %354, %355 : vector<64x64xi1>, vector<64x64xf32>
    %cst_96 = arith.constant dense<0xFF800000> : vector<64xf32>
    %357 = vector.multi_reduction <maximumf>, %356, %cst_96 [1] : vector<64x64xf32> to vector<64xf32>
    %cst_97 = arith.constant 0xFF800000 : f32
    %358 = vector.broadcast %cst_97 : f32 to vector<64xf32>
    %359 = arith.maximumf %358, %357 : vector<64xf32>
    %360 = vector.shape_cast %359 : vector<64xf32> to vector<64x1xf32>
    %361 = vector.broadcast %360 : vector<64x1xf32> to vector<64x64xf32>
    %362 = arith.subf %356, %361 : vector<64x64xf32>
    %363 = math.exp %362 : vector<64x64xf32>
    %cst_98 = arith.constant dense<0.000000e+00> : vector<64xf32>
    %364 = vector.multi_reduction <add>, %363, %cst_98 [1] : vector<64x64xf32> to vector<64xf32>
    %365 = vector.shape_cast %364 : vector<64xf32> to vector<64x1xf32>
    %366 = vector.broadcast %365 : vector<64x1xf32> to vector<64x64xf32>
    %367 = arith.divf %363, %366 : vector<64x64xf32>
    %368 = vector.shape_cast %367 : vector<64x64xf32> to vector<8x8x64xf32>
    %cst_99 = arith.constant dense<0.000000e+00> : vector<8x64xf32>
    %369 = vector.multi_reduction <add>, %368, %cst_99 [0] : vector<8x8x64xf32> to vector<8x64xf32>
    %cst_100 = arith.constant 8.000000e+00 : f32
    %370 = vector.broadcast %cst_100 : f32 to vector<8x64xf32>
    %371 = arith.divf %369, %370 : vector<8x64xf32>
    %cst_101 = arith.constant dense<0.000000e+00> : vector<8x8xf32>
    %372 = tpu.matmul %371, %353, %cst_101 {dimension_numbers = #tpu.dot_dimension_numbers<[1], [0], [0], [1], [0, 0, 1, 1], [], []>} : vector<8x64xf32>, vector<64x8xf32>, vector<8x8xf32> -> vector<8x8xf32>
    %373 = vector.extract_strided_slice %293 {offsets = [0, 32], sizes = [64, 16], strides = [1, 1]} : vector<64x160xf32> to vector<64x16xf32>
    %374 = vector.extract_strided_slice %293 {offsets = [0, 96], sizes = [64, 16], strides = [1, 1]} : vector<64x160xf32> to vector<64x16xf32>
    %375 = vector.extract_strided_slice %293 {offsets = [0, 144], sizes = [64, 8], strides = [1, 1]} : vector<64x160xf32> to vector<64x8xf32>
    %cst_102 = arith.constant dense<0.000000e+00> : vector<64x64xf32>
    %376 = tpu.matmul %373, %374, %cst_102 {dimension_numbers = #tpu.dot_dimension_numbers<[1], [1], [0], [0], [0, 0, 1, 0], [], []>} : vector<64x16xf32>, vector<64x16xf32>, vector<64x64xf32> -> vector<64x64xf32>
    %cst_103 = arith.constant -1.000000e+30 : f32
    %377 = vector.broadcast %cst_103 : f32 to vector<64x64xf32>
    %378 = arith.select %328, %376, %377 : vector<64x64xi1>, vector<64x64xf32>
    %cst_104 = arith.constant dense<0xFF800000> : vector<64xf32>
    %379 = vector.multi_reduction <maximumf>, %378, %cst_104 [1] : vector<64x64xf32> to vector<64xf32>
    %cst_105 = arith.constant 0xFF800000 : f32
    %380 = vector.broadcast %cst_105 : f32 to vector<64xf32>
    %381 = arith.maximumf %380, %379 : vector<64xf32>
    %382 = vector.shape_cast %381 : vector<64xf32> to vector<64x1xf32>
    %383 = vector.broadcast %382 : vector<64x1xf32> to vector<64x64xf32>
    %384 = arith.subf %378, %383 : vector<64x64xf32>
    %385 = math.exp %384 : vector<64x64xf32>
    %cst_106 = arith.constant dense<0.000000e+00> : vector<64xf32>
    %386 = vector.multi_reduction <add>, %385, %cst_106 [1] : vector<64x64xf32> to vector<64xf32>
    %387 = vector.shape_cast %386 : vector<64xf32> to vector<64x1xf32>
    %388 = vector.broadcast %387 : vector<64x1xf32> to vector<64x64xf32>
    %389 = arith.divf %385, %388 : vector<64x64xf32>
    %390 = vector.shape_cast %389 : vector<64x64xf32> to vector<8x8x64xf32>
    %cst_107 = arith.constant dense<0.000000e+00> : vector<8x64xf32>
    %391 = vector.multi_reduction <add>, %390, %cst_107 [0] : vector<8x8x64xf32> to vector<8x64xf32>
    %cst_108 = arith.constant 8.000000e+00 : f32
    %392 = vector.broadcast %cst_108 : f32 to vector<8x64xf32>
    %393 = arith.divf %391, %392 : vector<8x64xf32>
    %cst_109 = arith.constant dense<0.000000e+00> : vector<8x8xf32>
    %394 = tpu.matmul %393, %375, %cst_109 {dimension_numbers = #tpu.dot_dimension_numbers<[1], [0], [0], [1], [0, 0, 1, 1], [], []>} : vector<8x64xf32>, vector<64x8xf32>, vector<8x8xf32> -> vector<8x8xf32>
    %395 = vector.extract_strided_slice %293 {offsets = [0, 48], sizes = [64, 16], strides = [1, 1]} : vector<64x160xf32> to vector<64x16xf32>
    %396 = vector.extract_strided_slice %293 {offsets = [0, 112], sizes = [64, 16], strides = [1, 1]} : vector<64x160xf32> to vector<64x16xf32>
    %397 = vector.extract_strided_slice %293 {offsets = [0, 152], sizes = [64, 8], strides = [1, 1]} : vector<64x160xf32> to vector<64x8xf32>
    %cst_110 = arith.constant dense<0.000000e+00> : vector<64x64xf32>
    %398 = tpu.matmul %395, %396, %cst_110 {dimension_numbers = #tpu.dot_dimension_numbers<[1], [1], [0], [0], [0, 0, 1, 0], [], []>} : vector<64x16xf32>, vector<64x16xf32>, vector<64x64xf32> -> vector<64x64xf32>
    %cst_111 = arith.constant -1.000000e+30 : f32
    %399 = vector.broadcast %cst_111 : f32 to vector<64x64xf32>
    %400 = arith.select %328, %398, %399 : vector<64x64xi1>, vector<64x64xf32>
    %cst_112 = arith.constant dense<0xFF800000> : vector<64xf32>
    %401 = vector.multi_reduction <maximumf>, %400, %cst_112 [1] : vector<64x64xf32> to vector<64xf32>
    %cst_113 = arith.constant 0xFF800000 : f32
    %402 = vector.broadcast %cst_113 : f32 to vector<64xf32>
    %403 = arith.maximumf %402, %401 : vector<64xf32>
    %404 = vector.shape_cast %403 : vector<64xf32> to vector<64x1xf32>
    %405 = vector.broadcast %404 : vector<64x1xf32> to vector<64x64xf32>
    %406 = arith.subf %400, %405 : vector<64x64xf32>
    %407 = math.exp %406 : vector<64x64xf32>
    %cst_114 = arith.constant dense<0.000000e+00> : vector<64xf32>
    %408 = vector.multi_reduction <add>, %407, %cst_114 [1] : vector<64x64xf32> to vector<64xf32>
    %409 = vector.shape_cast %408 : vector<64xf32> to vector<64x1xf32>
    %410 = vector.broadcast %409 : vector<64x1xf32> to vector<64x64xf32>
    %411 = arith.divf %407, %410 : vector<64x64xf32>
    %412 = vector.shape_cast %411 : vector<64x64xf32> to vector<8x8x64xf32>
    %cst_115 = arith.constant dense<0.000000e+00> : vector<8x64xf32>
    %413 = vector.multi_reduction <add>, %412, %cst_115 [0] : vector<8x8x64xf32> to vector<8x64xf32>
    %cst_116 = arith.constant 8.000000e+00 : f32
    %414 = vector.broadcast %cst_116 : f32 to vector<8x64xf32>
    %415 = arith.divf %413, %414 : vector<8x64xf32>
    %cst_117 = arith.constant dense<0.000000e+00> : vector<8x8xf32>
    %416 = tpu.matmul %415, %397, %cst_117 {dimension_numbers = #tpu.dot_dimension_numbers<[1], [0], [0], [1], [0, 0, 1, 1], [], []>} : vector<8x64xf32>, vector<64x8xf32>, vector<8x8xf32> -> vector<8x8xf32>
    %417 = tpu.concatenate %350, %372, %394, %416 in 1 : vector<8x8xf32>, vector<8x8xf32>, vector<8x8xf32>, vector<8x8xf32> -> vector<8x32xf32>
    %c0_118 = arith.constant 0 : index
    %c0_119 = arith.constant 0 : index
    %418 = vector.load %arg7[%c0_118, %c0_119] : memref<32x32xf32, #tpu.memory_space<vmem>>, vector<32x32xf32>
    %cst_120 = arith.constant dense<0.000000e+00> : vector<8x32xf32>
    %419 = tpu.matmul %417, %418, %cst_120 {dimension_numbers = #tpu.dot_dimension_numbers<[1], [0], [0], [1], [0, 0, 1, 1], [], []>} : vector<8x32xf32>, vector<32x32xf32>, vector<8x32xf32> -> vector<8x32xf32>
    %c0_121 = arith.constant 0 : index
    %c0_122 = arith.constant 0 : index
    %420 = vector.load %arg8[%c0_121, %c0_122] : memref<1x32xf32, #tpu.memory_space<vmem>>, vector<1x32xf32>
    %421 = vector.broadcast %420 : vector<1x32xf32> to vector<8x32xf32>
    %422 = arith.addf %419, %421 : vector<8x32xf32>
    %c0_123 = arith.constant 0 : index
    %c0_124 = arith.constant 0 : index
    %423 = vector.load %arg9[%c0_123, %c0_124] : memref<8x32xf32, #tpu.memory_space<vmem>>, vector<8x32xf32>
    tpu.vector_store %arg9[%c0_123, %c0_124], %422 {strides = array<i32>} : memref<8x32xf32, #tpu.memory_space<vmem>>, vector<8x32xf32>,
    return
  }
  func.func @transform_0(%arg0: i32) -> (i32, i32, i32) {
    %c0_i32 = arith.constant 0 : i32
    %c0_i32_0 = arith.constant 0 : i32
    %c0_i32_1 = arith.constant 0 : i32
    return %c0_i32, %arg0, %c0_i32_0 : i32, i32, i32
  }
  func.func @transform_1(%arg0: i32) -> (i32, i32) {
    %c0_i32 = arith.constant 0 : i32
    %c0_i32_0 = arith.constant 0 : i32
    %c0_i32_1 = arith.constant 0 : i32
    return %c0_i32, %c0_i32_0 : i32, i32
  }
  func.func @transform_2(%arg0: i32) -> (i32, i32) {
    %c0_i32 = arith.constant 0 : i32
    %c0_i32_0 = arith.constant 0 : i32
    %c0_i32_1 = arith.constant 0 : i32
    return %c0_i32, %c0_i32_0 : i32, i32
  }
  func.func @transform_3(%arg0: i32) -> (i32, i32) {
    %c0_i32 = arith.constant 0 : i32
    %c0_i32_0 = arith.constant 0 : i32
    %c0_i32_1 = arith.constant 0 : i32
    return %c0_i32, %c0_i32_0 : i32, i32
  }
  func.func @transform_4(%arg0: i32) -> (i32, i32) {
    %c0_i32 = arith.constant 0 : i32
    %c0_i32_0 = arith.constant 0 : i32
    %c0_i32_1 = arith.constant 0 : i32
    return %c0_i32, %c0_i32_0 : i32, i32
  }
  func.func @transform_5(%arg0: i32) -> (i32, i32) {
    %c0_i32 = arith.constant 0 : i32
    %c0_i32_0 = arith.constant 0 : i32
    %c0_i32_1 = arith.constant 0 : i32
    return %c0_i32, %c0_i32_0 : i32, i32
  }
  func.func @transform_6(%arg0: i32) -> (i32, i32) {
    %c0_i32 = arith.constant 0 : i32
    %c0_i32_0 = arith.constant 0 : i32
    %c0_i32_1 = arith.constant 0 : i32
    return %c0_i32, %c0_i32_0 : i32, i32
  }
  func.func @transform_7(%arg0: i32) -> (i32, i32) {
    %c0_i32 = arith.constant 0 : i32
    %c0_i32_0 = arith.constant 0 : i32
    %c0_i32_1 = arith.constant 0 : i32
    return %c0_i32, %c0_i32_0 : i32, i32
  }
  func.func @transform_8(%arg0: i32) -> (i32, i32) {
    %c0_i32 = arith.constant 0 : i32
    %c0_i32_0 = arith.constant 0 : i32
    return %arg0, %c0_i32 : i32, i32
  }
}

</mosaic_0001>

<bundles_post_ra>
// kernel: tpu_custom_call.1
= control target key start
LH: loop header
LB: loop body
LE: loop exit
PB: predicated region body
PF: predicated region fallthrough
CT: control target
= control target key end

     0   :  { %s5651_s0 = inlined_call_operand.hbm [shape: f32[8,16,16], index: 0, kind: input, shape index: {}]   ;;  %s5652_s1 = inlined_call_operand.hbm [shape: f32[16,96], index: 1, kind: input, shape index: {}]   ;;  %s5653_s2 = inlined_call_operand.hbm [shape: f32[32,96], index: 2, kind: input, shape index: {}]   ;;  %s5654_s3 = inlined_call_operand.vmem [shape: f32[1,96], index: 3, kind: input, shape index: {}]   ;;  %s5655_s4 = inlined_call_operand.vmem [shape: f32[1,96], index: 4, kind: input, shape index: {}]   ;;  %s5656_s5 = inlined_call_operand.hbm [shape: f32[32,160], index: 5, kind: input, shape index: {}]   ;;  %s5657_s6 = inlined_call_operand.hbm [shape: f32[32,32], index: 6, kind: input, shape index: {}]   ;;  %s5658_s7 = inlined_call_operand.vmem [shape: f32[1,32], index: 7, kind: input, shape index: {}]   ;;  %s5659_s8 = inlined_call_operand.hbm [shape: f32[16,32], index: 8, kind: output, shape index: {}]  }
   0x1   :  { %5670 = sst [smem:[#allocation23_spill]] %s5652_s1 }
   0x2   :  { %5671 = sst [smem:[#allocation24_spill]] %s5653_s2 }
   0x3   :  { %5672 = sst [smem:[#allocation25_spill]] %s5656_s5 }
   0x4   :  { %13 = vsyncpa [#allocation5], 0 }
   0x5   :  { %15 = vsyncpa [#allocation5 + $0x1], 0 }
   0x6   :  { %16 = vsyncpa [#allocation8], 0 }
   0x7   :  { %17 = vsyncpa [#allocation11], 0 }
   0x8   :  { %18 = vsyncpa [#allocation6], 0 }
   0x9   :  { %20 = vsyncpa [#allocation6 + $0x1], 0  ;;  %s3691_s27 = smov 0   ;;  %s3693_s28 = smov 0  }
   0xa   :  { %s3695_s29 = smov 0   ;;  %s3697_s30 = smov 0  }
   0xb LB: > { %s3712_s9 = sadd.s32 4294967295, %s3623_s30   ;;  %s2918_s10 = sadd.s32 4294967294, %s3623_s30   ;;  %s3623_s30 = sphi %s3697_s30, %s5818_s30   ;;  %s3619_s29 = sphi %s3695_s29, %s5817_s29   ;;  %s3615_s28 = sphi %s3693_s28, %s5816_s28   ;;  %s3611_s27 = sphi %s3691_s27, %s5815_s27  }
   0xc   : > { %p46_p0 = scmp.ne.s32.totalorder %s3615_s28, %s3611_s27  ;;  %p47_p1 = scmp.eq.s32.totalorder %s3712_s9, 0 }
   0xd   : > { %p217_p2 = scmp.eq.s32.totalorder %s3712_s9, 1  ;;  %p223_p3 = scmp.eq.s32.totalorder %s2918_s10, 1 }
   0xe   : > { %p3721_p4 = por %p47_p1, %p46_p0  ;;  %p2919_p5 = scmp.ge.s32.totalorder %s3623_s30, 1 }
   0xf   : > { %p3726_p6 = por %p223_p3, %p46_p0  ;;  %p230_p7 = scmp.lt.s32.totalorder %s3623_s30, 3 }
  0x10   : > { %s5675_s1 = sld [smem:[#allocation23_spill]]  ;;  %s3625_s17 = smov [#allocation7]  }
  0x11   : > { %p3734_p8 = pnand %p2919_p5, %p230_p7  ;;  %s243_s18 = sshll.u32 %s3625_s17, 4  ;;  %s244_s18 = int_to_ptr.vmem [resolvable:$true] %s243_s18 }
  0x12   : > { %s5678_s5 = sld [smem:[#allocation25_spill]]  ;;  %s5660_s23 = smov 128  }
  0x13   : > { %p3074_p9 = pneg %p3734_p8  ;;  %s5663_s24 = smov 8  }
  0x14   : > { %s3628_s25 = smov [#allocation10]   ;;  %s5662_s10 = smov 256  }
  0x15   : > { %p3742_p10 = pnand %p3074_p9, %p47_p1  ;;  %s277_s26 = sshll.u32 %s3628_s25, 4  ;;  %s278_s26 = int_to_ptr.vmem [resolvable:$true] %s277_s26 }
  0x16   : > { %s241_s15 = sshll.u32 %s5675_s1, 4  ;;  %s3630_s13 = smov 16   ;;  %s242_s15 = int_to_ptr.hbm [resolvable:$true] %s241_s15 }
  0x17   : > { %3077 = dma.hbm_to_vmem [thread:$0]  (!%p3742_p10), %s242_s15, 256, %s244_s18, [#allocation8], %s5660_s23, %s5660_s23, %s5663_s24  }
  0x18   : > { %s275_s22 = sshll.u32 %s5678_s5, 4  ;;  %s5679_s2 = sld [smem:[#allocation24_spill]]  ;;  %s276_s22 = int_to_ptr.hbm [resolvable:$true] %s275_s22 }
  0x19   : > { %3083 = dma.hbm_to_vmem [thread:$0]  (!%p3742_p10), %s276_s22, 1024, %s278_s26, [#allocation11], %s5662_s10, %s5662_s10, %s3630_s13  }
  0x1a   : > { %s3631_s15 = smov [#allocation9]   ;;  %s289_s23 = sshll.u32 %s5657_s6, 4  ;;  %s290_s23 = int_to_ptr.hbm [resolvable:$true] %s289_s23 }
  0x1b   : > { %s257_s18 = sshll.u32 %s3631_s15, 4  ;;  %s5680_s22 = smov 128   ;;  %s258_s18 = int_to_ptr.vmem [resolvable:$true] %s257_s18 }
  0x1c   : > { %s3632_s26 = smov [#allocation12]   ;;  %s3776_s14 = sadd.s32 1, %s3623_s30  }
  0x1d   : > { %s291_s13 = sshll.u32 %s3632_s26, 4  ;;  %s33_s17 = sadd.s32 1, %s3619_s29  ;;  %s292_s13 = int_to_ptr.vmem [resolvable:$true] %s291_s13 }
  0x1e   : > { %s255_s20 = sshll.u32 %s5679_s2, 4  ;;  %s30_s15 = ssub.s32 %s3623_s30, %s3776_s14  ;;  %s256_s20 = int_to_ptr.hbm [resolvable:$true] %s255_s20 }
  0x1f   : > { %3080 = dma.hbm_to_vmem [thread:$0]  (!%p3742_p10), %s256_s20, 512, %s258_s18, [#allocation8], %s5680_s22, %s5680_s22, %s5663_s24  }
  0x20   : > { %3086 = dma.hbm_to_vmem [thread:$0]  (!%p3742_p10), %s290_s23, 512, %s292_s13, [#allocation11], %s5680_s22, %s5680_s22, %s5663_s24  }
  0x21   : > { %p40_p12 = scmp.ne.s32.totalorder %s3619_s29, %s3615_s28  ;;  %p31_p13 = scmp.eq.s32.totalorder %s30_s15, 0 }
  0x22   : > { %p41_p0 = scmp.eq.s32.totalorder %s3623_s30, 0  ;;  %p3099_p5 = scmp.lt.s32.totalorder %s3623_s30, 2 }
  0x23   : > { %p3786_p3 = por %p217_p2, %p40_p12  ;;  %s308_s19 = sand.u32 1, %s3619_s29  }
  0x24   : > { %s3792_s18 = scalar_select %p31_p13, %s3619_s29, %s33_s17  }
  0x25   : > { %p42_p7 = por %p41_p0, %p40_p12  ;;  %s2925_s21 = sshll.u32 %s308_s19, 6 }
  0x26   : > { %s2926_s23 = sshll.u32 %s3623_s30, 3  ;;  %s312_s10 = scalar_lea.vmem [#allocation4], %s2925_s21 }
  0x27   : > { %s316_s13 = scalar_lea.hbm %s5651_s0, %s2926_s23  ;;  %s319_s24 = sshll.u32 %s312_s10, 4  ;;  %s320_s24 = int_to_ptr.vmem [resolvable:$true] %s319_s24 }
  0x28   : > { %s317_s15 = sshll.u32 %s316_s13, 4  ;;  %p3799_p2 = pnand %p3099_p5, %p42_p7  ;;  %s318_s15 = int_to_ptr.hbm [resolvable:$true] %s317_s15 }
  0x29   : > { %s309_s17 = scalar_lea.sflag [#allocation5], %s308_s19  ;;  %s3519_s2 = sshra.s32 %s318_s15, 4  ;;  %s3520_s2 = int_to_ptr.hbm [resolvable:$true] %s3519_s2 }
  0x2a   : > { %s3521_s5 = scalar_lea.hbm %s3520_s2, 64  ;;  %p3523_p10 = pneg %p3799_p2 }
  0x2b   : > { %p3522_p9 = scmp.ne.s32.totalorder %s3520_s2, %s3521_s5  ;;  %s3526_s10 = scalar_lea.hbm %s5651_s0, 128 }
  0x2c   : > { %p3527_p0 = scmp.lt.s32.totalorder %s3520_s2, %s5651_s0  ;;  %p3528_p5 = scmp.lt.s32.totalorder %s3526_s10, %s3521_s5 }
  0x2d   : > { %p3524_p12 = pnand %p3523_p10, %p3522_p9 }
  0x2e   : > { %p3529_p7 = por %p3528_p5, %p3527_p0 }
  0x2f   : > { %p3525_p13 = pneg %p3524_p12 }
  0x31   : > { %p3530_p11 = pnand %p3529_p7, %p3525_p13 }
  0x33   : > { %3533 = shalt.err (!%p3530_p11)
}
  0x34   : > { %s5683_s19 = smov 8   ;;  %s5684_s13 = smov 256  }
  0x35   : > { %3090 = dma.hbm_to_vmem [thread:$0]  (!%p3799_p2), %s318_s15, 1024, %s320_s24, %s309_s17, %s5684_s13, %s5680_s22, %s5683_s19  }
  0x36   : > { %331 = sbr.rel (%p3734_p8) target bundleno = 5886 (0x16fe), region = 52 }
  0x3b   : > { %s3819_s23 = sand.u32 1, %s3615_s28  }
  0x3c   : > { %s2928_s2 = sshll.u32 %s3819_s23, 6  ;;  %s334_s5 = scalar_lea.sflag [#allocation5], %s3819_s23 }
  0x3d   : > { %s3823_s21 = scalar_lea.vmem [#allocation4], %s2928_s2 }
  0x3e   : > { %3594 = dma.done.wait (%p3721_p4), %s334_s5, 1024  }
  0x3f   : > { %3596 = vsyncadd (%p3721_p4), %s334_s5, 4294966272 }
  0x40   : > { %3598 = dma.done.wait (%p47_p1), [#allocation8], 768  }
  0x41   : > { %3600 = vsyncadd (%p47_p1), [#allocation8], 4294966528 }
  0x42   : > { %3602 = dma.done.wait (%p47_p1), [#allocation11], 1536  }
  0x43   : > { %3604 = vsyncadd (%p47_p1), [#allocation11], 4294965760  ;;  %v400_v0 = vld [vmem:[#allocation7 + $0x8] sm:$0xff]  ;;  %v399_v2 = vld [vmem:[#allocation7] sm:$0xff]  ;;  %vm405_vm0 = vcmask 130048   ;;  %v3633_v7 = vmov 0.0  }
  0x44   : > { %v3837_v1 = vld [vmem:[#allocation9 + $0x18] sm:$0xff]  ;;  %444 = vmatpush.msra.mxu0 %v400_v0  ;;  %v3840_v3 = vld [vmem:[#allocation9 + $0x10] sm:$0xff]  ;;  %v3843_v5 = vld [vmem:[#allocation9 + $0x8] sm:$0xff]  ;;  %vm471_vm1 = vcmask 785408   ;;  %s3634_s22 = smov 64   ;;  %s3635_s15 = smov 96  }
  0x45   : > { %505 = vmatpush.msra.mxu1 %v3837_v1  ;;  %v391_v4 = vld [vmem:[%s3823_s21] sm:$0xff]  ;;  %573 = vmatpush.msra.mxu2 %v3837_v1  ;;  %v3849_v6 = vld [vmem:[#allocation9] sm:$0xff]  ;;  %v392_v34 = vld [vmem:[%s3823_s21 + $0x8] sm:$0xff]  ;;  %vm489_vm6 = vcmask 261120   ;;  %s3636_s17 = smov 48   ;;  %s3637_s10 = smov 32  }
  0x46   : > { %642 = vmatpush.msra.mxu3 %v3837_v1  ;;  %445 = vmatpush.msra.mxu0 %v399_v2  ;;  %v3878_v8 = vld [vmem:[%s5654_s3] ss:$0 sm:$0xff]  ;;  %s3638_s25 = smov 16   ;;  %s3639_s26 = smov 112  }
  0x47   : > { %506 = vmatpush.msra.mxu1 %v3840_v3  ;;  %2934 = vmatmul.msk.f32.vlgmr.msra.gmra.mxu0 %vm405_vm0, %v391_v4  ;;  %v3884_v11 = vld [vmem:[%s5655_s4] ss:$0 sm:$0xff]  ;;  %s3640_s19 = smov 80   ;;  %s3641_s13 = smov 120  }
  0x48   : > { %574 = vmatpush.msra.mxu2 %v3840_v3  ;;  %643 = vmatpush.msra.mxu3 %v3840_v3  ;;  %s3642_s2 = smov 104   ;;  %s3644_s5 = smov 8  }
  0x49   : > { %507 = vmatpush.msra.mxu1 %v3843_v5  ;;  %s2933_s1 = sshll.u32 %s3819_s23, 3  ;;  %s3043_s11 = sshll.u32 %s3712_s9, 3 }
  0x4a   : > { %575 = vmatpush.msra.mxu2 %v3843_v5  ;;  %644 = vmatpush.msra.mxu3 %v3843_v5 }
  0x4b   : > { %508 = vmatpush.msra.mxu1 %v3849_v6 }
  0x4c   : > { %509 = vmatmul.f32.vlgmr.msra.gmra.mxu1 %v3633_v7  ;;  %576 = vmatpush.msra.mxu2 %v3849_v6 }
  0x4d   : > { %645 = vmatpush.msra.mxu3 %v3849_v6  ;;  %711 = vmatpush.msrb.mxu1 %v3837_v1 }
  0x4e   : > { %780 = vmatpush.msrb.mxu2 %v3837_v1 }
  0x4f   : > { %849 = vmatpush.msrb.mxu3 %v3837_v1  ;;  %712 = vmatpush.msrb.mxu1 %v3840_v3 }
  0x50   : > { %781 = vmatpush.msrb.mxu2 %v3840_v3  ;;  %2935 = vmatmul.msk.f32.gmra.mxu0 %vm405_vm0, %v392_v34  ;;  %v394_v34 = vld [vmem:[%s3823_s21 + $0x18] sm:$0xff] }
  0x51   : > { %850 = vmatpush.msrb.mxu3 %v3840_v3  ;;  %713 = vmatpush.msrb.mxu1 %v3843_v5 }
  0x52   : > { %782 = vmatpush.msrb.mxu2 %v3843_v5 }
  0x53   : > { %851 = vmatpush.msrb.mxu3 %v3843_v5  ;;  %714 = vmatpush.msrb.mxu1 %v3849_v6 }
  0x54   : > { %783 = vmatpush.msrb.mxu2 %v3849_v6 }
  0x55   : > { %852 = vmatpush.msrb.mxu3 %v3849_v6  ;;  %918 = vmatpush.msra.mxu1 %v3837_v1 }
  0x57   : > { %919 = vmatpush.msra.mxu1 %v3840_v3 }
  0x59   : > { %920 = vmatpush.msra.mxu1 %v3843_v5 }
  0x5b   : > { %921 = vmatpush.msra.mxu1 %v3849_v6 }
  0xc4   : > { %v447_v9 = vpop.f32.mrf.mxu0 }
  0xc5   : > { %v448_v10 = vadd.f32 %v3878_v8, %v447_v9 }
  0xc7   : > { %472 = vst.msk [vmem:[#allocation2] sm:$0xff] %vm471_vm1, %v448_v10 }
  0xc9   : > { %v510_v12 = vpop.f32.mrf.mxu1 }
  0xca   : > { %v511_v13 = vadd.f32 %v3884_v11, %v510_v12 }
  0xcc   : > { %534 = vrot.lane.b32.xlu0 %v511_v13, %s3634_s22 }
  0xcd   : > { %v450_v40 = vpop.f32.mrf.mxu0 }
  0xce   : > { %v485_v14 = vld [vmem:[#allocation2] sm:$0xff]  ;;  %v451_v41 = vadd.f32 %v3878_v8, %v450_v40 }
  0xcf   : > { %v513_v15 = vadd.f32 %v511_v13, %v485_v14 }
  0xd0   : > { %473 = vst.msk [vmem:[#allocation2 + $0x8] sm:$0xff] %vm471_vm1, %v451_v41 }
  0xd1   : > { %v2942_v16 = vmul.f32 -1.442695, %v513_v15 }
  0xd3   : > { %3221 = vpow2.f32 %v2942_v16 }
  0xd7   : > { %v558_v45 = vld [vmem:[#allocation2 + $0x8] sm:$0xff] }
  0xd9   : > { %v3222_v17 = vpop.eup %3221 }
  0xda   : > { %v517_v18 = vadd.f32 1.0, %v3222_v17 }
  0xdc   : > { %3223 = vrcp.f32 %v517_v18  ;;  %v529_v24 = vand.u32 2147483648, %v517_v18  ;;  %vm523_vm3 = vweird.f32 %v517_v18  ;;  %v527_v25 = vand.u32 2147483647, %v517_v18 }
  0xde   : > { %v530_v27 = vor.u32 1.1754944e-38, %v529_v24  ;;  %vm528_vm5 = vcmp.eq.f32.partialorder %v527_v25, 8.507059e+37 }
  0xe2   : > { %v3224_v19 = vpop.eup %3223 }
  0xe3   : > { %v519_v20 = vmul.f32 %v3224_v19, %v517_v18  ;;  %vm524_vm2 = vweird.f32 %v3224_v19 }
  0xe4   : > { %vm525_vm4 = vmor %vm523_vm3, %vm524_vm2 }
  0xe5   : > { %v520_v21 = vsub.f32 1.0, %v519_v20 }
  0xe7   : > { %v521_v22 = vmul.f32 %v3224_v19, %v520_v21 }
  0xe9   : > { %v522_v23 = vadd.f32 %v3224_v19, %v521_v22 }
  0xeb   : > { %v526_v26 = vsel %vm525_vm4, %v3224_v19, %v522_v23 }
  0xec   : > { %v531_v29 = vsel %vm528_vm5, %v530_v27, %v526_v26 }
  0xed   : > { %v544_v35 = vsub.f32 1.0, %v531_v29  ;;  %v550_v37 = vmul.f32 0.0, %v531_v29 }
 0x13e   : > { %v535_v28 = vpop.permute.xlu0 %534 }
 0x13f   : > { %v537_v30 = vmul.f32 %v535_v28, %v531_v29 }
 0x141   : > { %539 = vrot.lane.b32.xlu0 %v537_v30, %s3634_s22 }
 0x1b3   : > { %v540_v31 = vpop.permute.xlu0 %539 }
 0x1b4   : > { %v542_v32 = vadd.f32 %v540_v31, %v485_v14 }
 0x1b6   : > { %3225 = vtanh.f32 %v542_v32 }
 0x1bc   : > { %v3226_v33 = vpop.eup %3225 }
 0x1bd   : > { %546 = vrot.lane.b32.xlu1 %v3226_v33, %s3635_s15 }
 0x22f   : > { %v547_v36 = vpop.permute.xlu1 %546 }
 0x230   : > { %v549_v38 = vmul.f32 %v547_v36, %v544_v35 }
 0x232   : > { %v551_v39 = vadd.f32 %v550_v37, %v549_v38 }
 0x234   : > { %553 = vrot.lane.b32.xlu1 %v551_v39, %s3635_s15 }
 0x2a6   : > { %v554_v42 = vpop.permute.xlu1 %553 }
 0x2a7   : > { %556 = vst.msk [vmem:[#allocation3] sm:$0xff] %vm489_vm6, %v554_v42  ;;  %2943 = vmatmul.msk.f32.vlgmr.msra.gmra.mxu2 %vm489_vm6, %v554_v42 }
 0x2a8   : > { %987 = vmatpush.msra.mxu2 %v3837_v1  ;;  %v393_v1 = vld [vmem:[%s3823_s21 + $0x10] sm:$0xff] }
 0x2a9   : > { %2936 = vmatmul.msk.f32.gmra.mxu0 %vm405_vm0, %v393_v1  ;;  %v395_v1 = vld [vmem:[%s3823_s21 + $0x20] sm:$0xff] }
 0x2aa   : > { %988 = vmatpush.msra.mxu2 %v3840_v3 }
 0x2ac   : > { %989 = vmatpush.msra.mxu2 %v3843_v5 }
 0x2ae   : > { %990 = vmatpush.msra.mxu2 %v3849_v6 }
 0x2b1   : > { %2937 = vmatmul.msk.f32.gmra.mxu0 %vm405_vm0, %v394_v34  ;;  %v396_v34 = vld [vmem:[%s3823_s21 + $0x28] sm:$0xff] }
 0x2b9   : > { %2938 = vmatmul.msk.f32.gmra.mxu0 %vm405_vm0, %v395_v1 }
 0x2c1   : > { %2939 = vmatmul.msk.f32.gmra.mxu0 %vm405_vm0, %v396_v34 }
 0x326   : > { %v453_v7 = vpop.f32.mrf.mxu0 }
 0x327   : > { %v454_v9 = vadd.f32 %v3878_v8, %v453_v7 }
 0x329   : > { %474 = vst.msk [vmem:[#allocation2 + $0x10] sm:$0xff] %vm471_vm1, %v454_v9 }
 0x32a   : > { %v578_v43 = vpop.f32.mrf.mxu2 }
 0x32b   : > { %v579_v44 = vadd.f32 %v3884_v11, %v578_v43 }
 0x32d   : > { %602 = vrot.lane.b32.xlu2 %v579_v44, %s3634_s22  ;;  %v581_v46 = vadd.f32 %v579_v44, %v558_v45 }
 0x32e   : > { %v456_v41 = vpop.f32.mrf.mxu0 }
 0x32f   : > { %v2944_v47 = vmul.f32 -1.442695, %v581_v46  ;;  %v457_v42 = vadd.f32 %v3878_v8, %v456_v41  ;;  %v1052_v41 = vld [vmem:[#allocation10 + $0x20] sm:$0xff] }
 0x330   : > { %v627_v14 = vld [vmem:[#allocation2 + $0x10] sm:$0xff] }
 0x331   : > { %3227 = vpow2.f32 %v2944_v47  ;;  %475 = vst.msk [vmem:[#allocation2 + $0x18] sm:$0xff] %vm471_vm1, %v457_v42  ;;  %v1050_v42 = vld [vmem:[#allocation10 + $0x10] sm:$0xff] }
 0x336   : > { %v459_v7 = vpop.f32.mrf.mxu0 }
 0x337   : > { %v3228_v48 = vpop.eup %3227  ;;  %v460_v9 = vadd.f32 %v3878_v8, %v459_v7 }
 0x338   : > { %v585_v49 = vadd.f32 1.0, %v3228_v48 }
 0x339   : > { %476 = vst.msk [vmem:[#allocation2 + $0x20] sm:$0xff] %vm471_vm1, %v460_v9 }
 0x33a   : > { %3229 = vrcp.f32 %v585_v49  ;;  %v597_v55 = vand.u32 2147483648, %v585_v49  ;;  %vm591_vm8 = vweird.f32 %v585_v49  ;;  %v595_v56 = vand.u32 2147483647, %v585_v49 }
 0x33c   : > { %v598_v58 = vor.u32 1.1754944e-38, %v597_v55  ;;  %vm596_vm10 = vcmp.eq.f32.partialorder %v595_v56, 8.507059e+37 }
 0x340   : > { %v3230_v50 = vpop.eup %3229 }
 0x341   : > { %v587_v51 = vmul.f32 %v3230_v50, %v585_v49  ;;  %vm592_vm7 = vweird.f32 %v3230_v50 }
 0x342   : > { %vm593_vm9 = vmor %vm591_vm8, %vm592_vm7 }
 0x343   : > { %v588_v52 = vsub.f32 1.0, %v587_v51 }
 0x345   : > { %v589_v53 = vmul.f32 %v3230_v50, %v588_v52 }
 0x347   : > { %v590_v54 = vadd.f32 %v3230_v50, %v589_v53 }
 0x349   : > { %v594_v57 = vsel %vm593_vm9, %v3230_v50, %v590_v54 }
 0x34a   : > { %v599_v60 = vsel %vm596_vm10, %v598_v58, %v594_v57 }
 0x34b   : > { %v612_v2 = vsub.f32 1.0, %v599_v60  ;;  %v618_v4 = vmul.f32 %v599_v60, %v551_v39 }
 0x387   : > { %v603_v59 = vpop.permute.xlu2 %602 }
 0x388   : > { %v605_v61 = vmul.f32 %v603_v59, %v599_v60 }
 0x38a   : > { %607 = vrot.lane.b32.xlu2 %v605_v61, %s3634_s22 }
 0x3e4   : > { %v608_v62 = vpop.permute.xlu2 %607 }
 0x3e5   : > { %v610_v63 = vadd.f32 %v608_v62, %v558_v45  ;;  %v696_v45 = vld [vmem:[#allocation2 + $0x18] sm:$0xff] }
 0x3e7   : > { %3231 = vtanh.f32 %v610_v63 }
 0x3ed   : > { %v3232_v0 = vpop.eup %3231 }
 0x3ee   : > { %614 = vrot.lane.b32.xlu0 %v3232_v0, %s3635_s15 }
 0x460   : > { %v615_v3 = vpop.permute.xlu0 %614 }
 0x461   : > { %v617_v5 = vmul.f32 %v615_v3, %v612_v2 }
 0x463   : > { %v619_v6 = vadd.f32 %v618_v4, %v617_v5 }
 0x465   : > { %621 = vrot.lane.b32.xlu1 %v619_v6, %s3635_s15 }
 0x4d7   : > { %v622_v10 = vpop.permute.xlu1 %621 }
 0x4d8   : > { %625 = vst.msk [vmem:[#allocation3 + $0x8] sm:$0xff] %vm489_vm6, %v622_v10  ;;  %2945 = vmatmul.msk.f32.vlgmr.msra.gmra.mxu3 %vm489_vm6, %v622_v10 }
 0x55b   : > { %v647_v12 = vpop.f32.mrf.mxu3 }
 0x55c   : > { %v648_v13 = vadd.f32 %v3884_v11, %v647_v12 }
 0x55e   : > { %671 = vrot.lane.b32.xlu2 %v648_v13, %s3634_s22  ;;  %v650_v15 = vadd.f32 %v648_v13, %v627_v14 }
 0x560   : > { %v2946_v16 = vmul.f32 -1.442695, %v650_v15 }
 0x562   : > { %3233 = vpow2.f32 %v2946_v16 }
 0x568   : > { %v3234_v17 = vpop.eup %3233 }
 0x569   : > { %v654_v18 = vadd.f32 1.0, %v3234_v17 }
 0x56b   : > { %3235 = vrcp.f32 %v654_v18  ;;  %v666_v24 = vand.u32 2147483648, %v654_v18  ;;  %vm660_vm12 = vweird.f32 %v654_v18  ;;  %v664_v25 = vand.u32 2147483647, %v654_v18 }
 0x56d   : > { %v667_v27 = vor.u32 1.1754944e-38, %v666_v24  ;;  %vm665_vm14 = vcmp.eq.f32.partialorder %v664_v25, 8.507059e+37 }
 0x571   : > { %v3236_v19 = vpop.eup %3235 }
 0x572   : > { %v656_v20 = vmul.f32 %v3236_v19, %v654_v18  ;;  %vm661_vm11 = vweird.f32 %v3236_v19 }
 0x573   : > { %vm662_vm13 = vmor %vm660_vm12, %vm661_vm11 }
 0x574   : > { %v657_v21 = vsub.f32 1.0, %v656_v20 }
 0x576   : > { %v658_v22 = vmul.f32 %v3236_v19, %v657_v21 }
 0x578   : > { %v659_v23 = vadd.f32 %v3236_v19, %v658_v22 }
 0x57a   : > { %v663_v26 = vsel %vm662_vm13, %v3236_v19, %v659_v23 }
 0x57b   : > { %v668_v29 = vsel %vm665_vm14, %v667_v27, %v663_v26 }
 0x57c   : > { %v681_v35 = vsub.f32 1.0, %v668_v29  ;;  %v687_v37 = vmul.f32 %v668_v29, %v619_v6 }
 0x5b8   : > { %v672_v28 = vpop.permute.xlu2 %671 }
 0x5b9   : > { %v674_v30 = vmul.f32 %v672_v28, %v668_v29 }
 0x5bb   : > { %676 = vrot.lane.b32.xlu0 %v674_v30, %s3634_s22 }
 0x62d   : > { %v677_v31 = vpop.permute.xlu0 %676 }
 0x62e   : > { %v679_v32 = vadd.f32 %v677_v31, %v627_v14  ;;  %v765_v14 = vld [vmem:[#allocation2 + $0x20] sm:$0xff] }
 0x630   : > { %3237 = vtanh.f32 %v679_v32 }
 0x636   : > { %v3238_v33 = vpop.eup %3237 }
 0x637   : > { %683 = vrot.lane.b32.xlu1 %v3238_v33, %s3635_s15 }
 0x6a9   : > { %v684_v36 = vpop.permute.xlu1 %683 }
 0x6aa   : > { %v686_v38 = vmul.f32 %v684_v36, %v681_v35 }
 0x6ac   : > { %v688_v39 = vadd.f32 %v687_v37, %v686_v38 }
 0x6ae   : > { %690 = vrot.lane.b32.xlu2 %v688_v39, %s3635_s15 }
 0x708   : > { %v691_v40 = vpop.permute.xlu2 %690 }
 0x709   : > { %694 = vst.msk [vmem:[#allocation3 + $0x10] sm:$0xff] %vm489_vm6, %v691_v40  ;;  %2947 = vmatmul.msk.f32.vlgmr.msrb.gmra.mxu1 %vm489_vm6, %v691_v40  ;;  %v1054_v40 = vld [vmem:[#allocation10 + $0x30] sm:$0xff] }
 0x70a   : > { %1092 = vmatpush.msra.mxu3 %v1054_v40 }
 0x70c   : > { %1093 = vmatpush.msra.mxu3 %v1052_v41 }
 0x70e   : > { %1094 = vmatpush.msra.mxu3 %v1050_v42 }
 0x786   : > { %v716_v43 = vpop.f32.mrf.mxu1 }
 0x787   : > { %v717_v44 = vadd.f32 %v3884_v11, %v716_v43  ;;  %v1048_v43 = vld [vmem:[#allocation10] sm:$0xff] }
 0x788   : > { %1095 = vmatpush.msra.mxu3 %v1048_v43 }
 0x789   : > { %740 = vrot.lane.b32.xlu0 %v717_v44, %s3634_s22  ;;  %v719_v46 = vadd.f32 %v717_v44, %v696_v45 }
 0x78b   : > { %v2948_v47 = vmul.f32 -1.442695, %v719_v46  ;;  %v462_v46 = vpop.f32.mrf.mxu0 }
 0x78d   : > { %3239 = vpow2.f32 %v2948_v47  ;;  %v463_v47 = vadd.f32 %v3878_v8, %v462_v46 }
 0x78f   : > { %477 = vst.msk [vmem:[#allocation2 + $0x28] sm:$0xff] %vm471_vm1, %v463_v47 }
 0x793   : > { %v3240_v48 = vpop.eup %3239 }
 0x794   : > { %v723_v49 = vadd.f32 1.0, %v3240_v48  ;;  %v1041_v48 = vld [vmem:[#allocation3 + $0x8] sm:$0xff] }
 0x796   : > { %3241 = vrcp.f32 %v723_v49  ;;  %v735_v55 = vand.u32 2147483648, %v723_v49  ;;  %vm729_vm2 = vweird.f32 %v723_v49  ;;  %v733_v56 = vand.u32 2147483647, %v723_v49 }
 0x798   : > { %v736_v58 = vor.u32 1.1754944e-38, %v735_v55  ;;  %vm734_vm4 = vcmp.eq.f32.partialorder %v733_v56, 8.507059e+37 }
 0x79c   : > { %v3242_v50 = vpop.eup %3241 }
 0x79d   : > { %v725_v51 = vmul.f32 %v3242_v50, %v723_v49  ;;  %vm730_vm15 = vweird.f32 %v3242_v50  ;;  %v3951_v49 = vld [vmem:[#allocation3 + $0x10] sm:$0xff] }
 0x79e   : > { %vm731_vm3 = vmor %vm729_vm2, %vm730_vm15 }
 0x79f   : > { %v726_v52 = vsub.f32 1.0, %v725_v51 }
 0x7a1   : > { %v727_v53 = vmul.f32 %v3242_v50, %v726_v52 }
 0x7a3   : > { %v728_v54 = vadd.f32 %v3242_v50, %v727_v53 }
 0x7a5   : > { %v732_v57 = vsel %vm731_vm3, %v3242_v50, %v728_v54  ;;  %v834_v54 = vld [vmem:[#allocation2 + $0x28] sm:$0xff] }
 0x7a6   : > { %v737_v60 = vsel %vm734_vm4, %v736_v58, %v732_v57 }
 0x7a7   : > { %v750_v2 = vsub.f32 1.0, %v737_v60  ;;  %v756_v4 = vmul.f32 %v737_v60, %v688_v39 }
 0x7fb   : > { %v741_v59 = vpop.permute.xlu0 %740 }
 0x7fc   : > { %v743_v61 = vmul.f32 %v741_v59, %v737_v60 }
 0x7fe   : > { %745 = vrot.lane.b32.xlu1 %v743_v61, %s3634_s22 }
 0x870   : > { %v746_v62 = vpop.permute.xlu1 %745 }
 0x871   : > { %v748_v63 = vadd.f32 %v746_v62, %v696_v45  ;;  %v3944_v45 = vld [vmem:[#allocation3] sm:$0xff] }
 0x873   : > { %3243 = vtanh.f32 %v748_v63 }
 0x879   : > { %v3244_v0 = vpop.eup %3243 }
 0x87a   : > { %752 = vrot.lane.b32.xlu2 %v3244_v0, %s3635_s15 }
 0x8d4   : > { %v753_v3 = vpop.permute.xlu2 %752 }
 0x8d5   : > { %v755_v5 = vmul.f32 %v753_v3, %v750_v2 }
 0x8d7   : > { %v757_v6 = vadd.f32 %v756_v4, %v755_v5 }
 0x8d9   : > { %759 = vrot.lane.b32.xlu0 %v757_v6, %s3635_s15 }
 0x94b   : > { %v760_v10 = vpop.permute.xlu0 %759 }
 0x94c   : > { %763 = vst.msk [vmem:[#allocation3 + $0x18] sm:$0xff] %vm489_vm6, %v760_v10  ;;  %2949 = vmatmul.msk.f32.vlgmr.msrb.gmra.mxu2 %vm489_vm6, %v760_v10 }
 0x953   : > { %v3955_v50 = vld [vmem:[#allocation3 + $0x18] sm:$0xff] }
 0x9cf   : > { %v785_v12 = vpop.f32.mrf.mxu2 }
 0x9d0   : > { %v786_v13 = vadd.f32 %v3884_v11, %v785_v12  ;;  %v397_v12 = vld [vmem:[%s3823_s21 + $0x30] sm:$0xff] }
 0x9d1   : > { %2940 = vmatmul.msk.f32.gmra.mxu0 %vm405_vm0, %v397_v12 }
 0x9d2   : > { %809 = vrot.lane.b32.xlu1 %v786_v13, %s3634_s22  ;;  %v788_v15 = vadd.f32 %v786_v13, %v765_v14 }
 0x9d4   : > { %v2950_v16 = vmul.f32 -1.442695, %v788_v15 }
 0x9d6   : > { %3245 = vpow2.f32 %v2950_v16 }
 0x9dc   : > { %v3246_v17 = vpop.eup %3245 }
 0x9dd   : > { %v792_v18 = vadd.f32 1.0, %v3246_v17 }
 0x9df   : > { %3247 = vrcp.f32 %v792_v18  ;;  %v804_v24 = vand.u32 2147483648, %v792_v18  ;;  %vm798_vm7 = vweird.f32 %v792_v18  ;;  %v802_v25 = vand.u32 2147483647, %v792_v18 }
 0x9e1   : > { %v805_v27 = vor.u32 1.1754944e-38, %v804_v24  ;;  %vm803_vm9 = vcmp.eq.f32.partialorder %v802_v25, 8.507059e+37 }
 0x9e5   : > { %v3248_v19 = vpop.eup %3247 }
 0x9e6   : > { %v794_v20 = vmul.f32 %v3248_v19, %v792_v18  ;;  %vm799_vm5 = vweird.f32 %v3248_v19  ;;  %v1055_v18 = vld [vmem:[#allocation10 + $0x38] sm:$0xff] }
 0x9e7   : > { %vm800_vm8 = vmor %vm798_vm7, %vm799_vm5  ;;  %1133 = vmatpush.msrb.mxu1 %v1055_v18 }
 0x9e8   : > { %v795_v21 = vsub.f32 1.0, %v794_v20  ;;  %v1051_v20 = vld [vmem:[#allocation10 + $0x18] sm:$0xff] }
 0x9ea   : > { %v796_v22 = vmul.f32 %v3248_v19, %v795_v21  ;;  %v1049_v21 = vld [vmem:[#allocation10 + $0x8] sm:$0xff] }
 0x9ec   : > { %v797_v23 = vadd.f32 %v3248_v19, %v796_v22 }
 0x9ee   : > { %v801_v26 = vsel %vm800_vm8, %v3248_v19, %v797_v23  ;;  %v1053_v19 = vld [vmem:[#allocation10 + $0x28] sm:$0xff] }
 0x9ef   : > { %v806_v29 = vsel %vm803_vm9, %v805_v27, %v801_v26  ;;  %1134 = vmatpush.msrb.mxu1 %v1053_v19 }
 0x9f0   : > { %v819_v35 = vsub.f32 1.0, %v806_v29  ;;  %v825_v37 = vmul.f32 %v806_v29, %v757_v6 }
 0x9f1   : > { %1135 = vmatpush.msrb.mxu1 %v1051_v20 }
 0x9f3   : > { %1136 = vmatpush.msrb.mxu1 %v1049_v21 }
 0xa44   : > { %v810_v28 = vpop.permute.xlu1 %809 }
 0xa45   : > { %v812_v30 = vmul.f32 %v810_v28, %v806_v29 }
 0xa47   : > { %814 = vrot.lane.b32.xlu2 %v812_v30, %s3634_s22 }
 0xa4e   : > { %v465_v24 = vpop.f32.mrf.mxu0 }
 0xa4f   : > { %v466_v25 = vadd.f32 %v3878_v8, %v465_v24 }
 0xa51   : > { %478 = vst.msk [vmem:[#allocation2 + $0x30] sm:$0xff] %vm471_vm1, %v466_v25 }
 0xa58   : > { %v903_v28 = vld [vmem:[#allocation2 + $0x30] sm:$0xff] }
 0xaa1   : > { %v815_v31 = vpop.permute.xlu2 %814 }
 0xaa2   : > { %v817_v32 = vadd.f32 %v815_v31, %v765_v14 }
 0xaa4   : > { %3249 = vtanh.f32 %v817_v32 }
 0xaaa   : > { %v3250_v33 = vpop.eup %3249 }
 0xaab   : > { %821 = vrot.lane.b32.xlu0 %v3250_v33, %s3635_s15 }
 0xb1d   : > { %v822_v36 = vpop.permute.xlu0 %821 }
 0xb1e   : > { %v824_v38 = vmul.f32 %v822_v36, %v819_v35 }
 0xb20   : > { %v826_v39 = vadd.f32 %v825_v37, %v824_v38 }
 0xb22   : > { %828 = vrot.lane.b32.xlu1 %v826_v39, %s3635_s15 }
 0xb94   : > { %v829_v44 = vpop.permute.xlu1 %828 }
 0xb95   : > { %832 = vst.msk [vmem:[#allocation3 + $0x20] sm:$0xff] %vm489_vm6, %v829_v44  ;;  %2951 = vmatmul.msk.f32.vlgmr.msrb.gmra.mxu3 %vm489_vm6, %v829_v44 }
 0xb9c   : > { %v1044_v51 = vld [vmem:[#allocation3 + $0x20] sm:$0xff] }
 0xb9d   : > { %2957 = vmatmul.msk.f32.vlgmr.msra.gmra.mxu3 %vm489_vm6, %v3944_v45 }
 0xba5   : > { %2958 = vmatmul.msk.f32.gmra.mxu3 %vm489_vm6, %v1041_v48 }
 0xbad   : > { %2959 = vmatmul.msk.f32.gmra.mxu3 %vm489_vm6, %v3951_v49 }
 0xbb5   : > { %2960 = vmatmul.msk.f32.gmra.mxu3 %vm489_vm6, %v3955_v50 }
 0xbbd   : > { %2961 = vmatmul.msk.f32.gmra.mxu3 %vm489_vm6, %v1044_v51 }
 0xc18   : > { %v854_v52 = vpop.f32.mrf.mxu3 }
 0xc19   : > { %v855_v53 = vadd.f32 %v3884_v11, %v854_v52 }
 0xc1b   : > { %878 = vrot.lane.b32.xlu2 %v855_v53, %s3634_s22  ;;  %v857_v55 = vadd.f32 %v855_v53, %v834_v54 }
 0xc1d   : > { %v2952_v56 = vmul.f32 -1.442695, %v857_v55 }
 0xc1f   : > { %3251 = vpow2.f32 %v2952_v56 }
 0xc25   : > { %v3252_v57 = vpop.eup %3251 }
 0xc26   : > { %v861_v58 = vadd.f32 1.0, %v3252_v57 }
 0xc28   : > { %3253 = vrcp.f32 %v861_v58  ;;  %v873_v0 = vand.u32 2147483648, %v861_v58  ;;  %vm867_vm11 = vweird.f32 %v861_v58  ;;  %v871_v1 = vand.u32 2147483647, %v861_v58 }
 0xc2a   : > { %v874_v3 = vor.u32 1.1754944e-38, %v873_v0  ;;  %vm872_vm13 = vcmp.eq.f32.partialorder %v871_v1, 8.507059e+37  ;;  %v3999_v0 = vpop.f32.mrf.mxu3 }
 0xc2e   : > { %v3254_v59 = vpop.eup %3253 }
 0xc2f   : > { %v863_v60 = vmul.f32 %v3254_v59, %v861_v58  ;;  %vm868_vm10 = vweird.f32 %v3254_v59 }
 0xc30   : > { %vm869_vm12 = vmor %vm867_vm11, %vm868_vm10  ;;  %vm1394_vm11 = vcmask 523264  }
 0xc31   : > { %v864_v61 = vsub.f32 1.0, %v863_v60 }
 0xc33   : > { %v865_v62 = vmul.f32 %v3254_v59, %v864_v61 }
 0xc35   : > { %v866_v63 = vadd.f32 %v3254_v59, %v865_v62 }
 0xc37   : > { %v870_v2 = vsel %vm869_vm12, %v3254_v59, %v866_v63 }
 0xc38   : > { %v875_v5 = vsel %vm872_vm13, %v874_v3, %v870_v2  ;;  %v4001_v2 = vpop.f32.mrf.mxu3 }
 0xc39   : > { %v888_v13 = vsub.f32 1.0, %v875_v5  ;;  %v894_v15 = vmul.f32 %v875_v5, %v826_v39 }
 0xc75   : > { %v879_v4 = vpop.permute.xlu2 %878 }
 0xc76   : > { %v881_v6 = vmul.f32 %v879_v4, %v875_v5 }
 0xc78   : > { %883 = vrot.lane.b32.xlu0 %v881_v6, %s3634_s22  ;;  %v4003_v6 = vpop.f32.mrf.mxu3 }
 0xcea   : > { %v884_v7 = vpop.permute.xlu0 %883 }
 0xceb   : > { %v886_v9 = vadd.f32 %v884_v7, %v834_v54 }
 0xced   : > { %3255 = vtanh.f32 %v886_v9 }
 0xcf3   : > { %v3256_v10 = vpop.eup %3255 }
 0xcf4   : > { %890 = vrot.lane.b32.xlu1 %v3256_v10, %s3635_s15 }
 0xd66   : > { %v891_v14 = vpop.permute.xlu1 %890 }
 0xd67   : > { %v893_v16 = vmul.f32 %v891_v14, %v888_v13  ;;  %v4005_v13 = vpop.f32.mrf.mxu3 }
 0xd69   : > { %v895_v17 = vadd.f32 %v894_v15, %v893_v16 }
 0xd6b   : > { %897 = vrot.lane.b32.xlu2 %v895_v17, %s3635_s15 }
 0xdc5   : > { %v898_v22 = vpop.permute.xlu2 %897 }
 0xdc6   : > { %901 = vst.msk [vmem:[#allocation3 + $0x28] sm:$0xff] %vm489_vm6, %v898_v22  ;;  %2953 = vmatmul.msk.f32.vlgmr.msra.gmra.mxu1 %vm489_vm6, %v898_v22 }
 0xdcd   : > { %v1045_v23 = vld [vmem:[#allocation3 + $0x28] sm:$0xff] }
 0xdce   : > { %2962 = vmatmul.msk.f32.gmra.mxu3 %vm489_vm6, %v1045_v23  ;;  %2965 = vmatmul.msk.f32.vlgmr.msrb.gmra.mxu1 %vm489_vm6, %v3944_v45 }
 0xdd6   : > { %2966 = vmatmul.msk.f32.gmra.mxu1 %vm489_vm6, %v1041_v48  ;;  %v398_v48 = vld [vmem:[%s3823_s21 + $0x38] sm:$0xff]  ;;  %s3645_s21 = smov 24  }
 0xdd7   : > { %2941 = vmatmul.msk.f32.gmra.mxu0 %vm405_vm0, %v398_v48 }
 0xdde   : > { %2967 = vmatmul.msk.f32.gmra.mxu1 %vm489_vm6, %v3951_v49 }
 0xde6   : > { %2968 = vmatmul.msk.f32.gmra.mxu1 %vm489_vm6, %v3955_v50 }
 0xdee   : > { %2969 = vmatmul.msk.f32.gmra.mxu1 %vm489_vm6, %v1044_v51 }
 0xdf6   : > { %2970 = vmatmul.msk.f32.gmra.mxu1 %vm489_vm6, %v1045_v23 }
 0xe43   : > { %v923_v26 = vpop.f32.mrf.mxu1 }
 0xe44   : > { %v924_v27 = vadd.f32 %v3884_v11, %v923_v26 }
 0xe46   : > { %947 = vrot.lane.b32.xlu0 %v924_v27, %s3634_s22  ;;  %v926_v29 = vadd.f32 %v924_v27, %v903_v28 }
 0xe48   : > { %v2954_v30 = vmul.f32 -1.442695, %v926_v29 }
 0xe4a   : > { %3257 = vpow2.f32 %v2954_v30 }
 0xe50   : > { %v3258_v31 = vpop.eup %3257 }
 0xe51   : > { %v930_v32 = vadd.f32 1.0, %v3258_v31  ;;  %v4072_v31 = vpop.f32.mrf.mxu1 }
 0xe53   : > { %3259 = vrcp.f32 %v930_v32  ;;  %v942_v38 = vand.u32 2147483648, %v930_v32  ;;  %vm936_vm15 = vweird.f32 %v930_v32  ;;  %v940_v39 = vand.u32 2147483647, %v930_v32 }
 0xe54   : > { %v468_v54 = vpop.f32.mrf.mxu0 }
 0xe55   : > { %v943_v41 = vor.u32 1.1754944e-38, %v942_v38  ;;  %vm941_vm3 = vcmp.eq.f32.partialorder %v940_v39, 8.507059e+37  ;;  %v469_v55 = vadd.f32 %v3878_v8, %v468_v54 }
 0xe57   : > { %479 = vst.msk [vmem:[#allocation2 + $0x38] sm:$0xff] %vm471_vm1, %v469_v55 }
 0xe59   : > { %v3260_v33 = vpop.eup %3259 }
 0xe5a   : > { %v932_v34 = vmul.f32 %v3260_v33, %v930_v32  ;;  %vm937_vm14 = vweird.f32 %v3260_v33  ;;  %v4082_v32 = vpop.f32.mrf.mxu1 }
 0xe5b   : > { %vm938_vm2 = vmor %vm936_vm15, %vm937_vm14  ;;  %v4162_v55 = vpack.i.bf16 %v4072_v31, %v4082_v32 }
 0xe5c   : > { %v933_v35 = vsub.f32 1.0, %v932_v34 }
 0xe5e   : > { %v934_v36 = vmul.f32 %v3260_v33, %v933_v35  ;;  %v972_v60 = vld [vmem:[#allocation2 + $0x38] sm:$0xff] }
 0xe60   : > { %v935_v37 = vadd.f32 %v3260_v33, %v934_v36 }
 0xe62   : > { %v939_v40 = vsel %vm938_vm2, %v3260_v33, %v935_v37  ;;  %v4090_v34 = vpop.f32.mrf.mxu1 }
 0xe63   : > { %v944_v43 = vsel %vm941_vm3, %v943_v41, %v939_v40 }
 0xe64   : > { %v957_v49 = vsub.f32 1.0, %v944_v43  ;;  %v963_v51 = vmul.f32 %v944_v43, %v895_v17  ;;  %v4008_v17 = vpop.f32.mrf.mxu3 }
 0xe6a   : > { %v4100_v36 = vpop.f32.mrf.mxu1 }
 0xe6c   : > { %v4012_v18 = vpop.f32.mrf.mxu3 }
 0xe72   : > { %v4114_v39 = vpop.f32.mrf.mxu1 }
 0xeb8   : > { %v948_v42 = vpop.permute.xlu0 %947 }
 0xeb9   : > { %v950_v44 = vmul.f32 %v948_v42, %v944_v43  ;;  %v4128_v43 = vpop.f32.mrf.mxu1 }
 0xeba   : > { %v4140_v48 = vpack.i.bf16 %v4114_v39, %v4128_v43 }
 0xebb   : > { %952 = vrot.lane.b32.xlu1 %v950_v44, %s3634_s22 }
 0xf2d   : > { %v953_v45 = vpop.permute.xlu1 %952 }
 0xf2e   : > { %v955_v46 = vadd.f32 %v953_v45, %v903_v28 }
 0xf30   : > { %3261 = vtanh.f32 %v955_v46 }
 0xf36   : > { %v3262_v47 = vpop.eup %3261 }
 0xf37   : > { %959 = vrot.lane.b32.xlu2 %v3262_v47, %s3635_s15 }
 0xf91   : > { %v960_v50 = vpop.permute.xlu2 %959 }
 0xf92   : > { %v962_v52 = vmul.f32 %v960_v50, %v957_v49 }
 0xf94   : > { %v3987_v53 = vadd.f32 %v963_v51, %v962_v52 }
 0xf96   : > { %966 = vrot.lane.b32.xlu0 %v3987_v53, %s3635_s15 }
0x1008   : > { %v967_v56 = vpop.permute.xlu0 %966 }
0x1009   : > { %970 = vst.msk [vmem:[#allocation3 + $0x30] sm:$0xff] %vm489_vm6, %v967_v56  ;;  %2955 = vmatmul.msk.f32.vlgmr.msra.gmra.mxu2 %vm489_vm6, %v967_v56 }
0x1010   : > { %v1046_v57 = vld [vmem:[#allocation3 + $0x30] sm:$0xff] }
0x1011   : > { %2963 = vmatmul.msk.f32.gmra.mxu3 %vm489_vm6, %v1046_v57  ;;  %2971 = vmatmul.msk.f32.gmra.mxu1 %vm489_vm6, %v1046_v57 }
0x108c   : > { %v992_v58 = vpop.f32.mrf.mxu2 }
0x108d   : > { %v993_v59 = vadd.f32 %v3884_v11, %v992_v58 }
0x108e   : > { %v1156_v45 = vpop.f32.mrf.mxu1 }
0x108f   : > { %1016 = vrot.lane.b32.xlu1 %v993_v59, %s3634_s22  ;;  %v995_v61 = vadd.f32 %v993_v59, %v972_v60  ;;  %v4178_v59 = vpack.i.bf16 %v4090_v34, %v4100_v36 }
0x1091   : > { %v2956_v8 = vmul.f32 -1.442695, %v995_v61 }
0x1093   : > { %3263 = vpow2.f32 %v2956_v8 }
0x1094   : > { %v4016_v19 = vpop.f32.mrf.mxu3 }
0x1099   : > { %v3264_v62 = vpop.eup %3263 }
0x109a   : > { %v999_v63 = vadd.f32 1.0, %v3264_v62 }
0x109c   : > { %3265 = vrcp.f32 %v999_v63  ;;  %v1011_v7 = vand.u32 2147483648, %v999_v63  ;;  %vm1005_vm4 = vweird.f32 %v999_v63  ;;  %v1009_v9 = vand.u32 2147483647, %v999_v63 }
0x109e   : > { %v1012_v12 = vor.u32 1.1754944e-38, %v1011_v7  ;;  %vm1010_vm7 = vcmp.eq.f32.partialorder %v1009_v9, 8.507059e+37 }
0x10a2   : > { %v3266_v1 = vpop.eup %3265 }
0x10a3   : > { %v1001_v3 = vmul.f32 %v3266_v1, %v999_v63  ;;  %vm1006_vm1 = vweird.f32 %v3266_v1 }
0x10a4   : > { %vm1007_vm5 = vmor %vm1005_vm4, %vm1006_vm1 }
0x10a5   : > { %v1002_v4 = vsub.f32 1.0, %v1001_v3 }
0x10a7   : > { %v1003_v5 = vmul.f32 %v3266_v1, %v1002_v4 }
0x10a9   : > { %v1004_v11 = vadd.f32 %v3266_v1, %v1003_v5 }
0x10ab   : > { %v1008_v10 = vsel %vm1007_vm5, %v3266_v1, %v1004_v11 }
0x10ac   : > { %v1013_v15 = vsel %vm1010_vm7, %v1012_v12, %v1008_v10 }
0x10ad   : > { %v1026_v23 = vsub.f32 1.0, %v1013_v15  ;;  %v1032_v25 = vmul.f32 %v1013_v15, %v3987_v53 }
0x1101   : > { %v1017_v14 = vpop.permute.xlu1 %1016 }
0x1102   : > { %v1019_v16 = vmul.f32 %v1017_v14, %v1013_v15 }
0x1104   : > { %1021 = vrot.lane.b32.xlu2 %v1019_v16, %s3634_s22 }
0x110c   : > { %1305 = vrot.lane.b32.xlu2 %v4008_v17, %s3634_s22 }
0x1114   : > { %1299 = vrot.lane.b32.xlu2 %v4001_v2, %s3634_s22 }
0x111c   : > { %1661 = vrot.lane.b32.xlu2 %v4016_v19, %s3636_s17 }
0x1124   : > { %2037 = vrot.lane.b32.xlu2 %v4016_v19, %s3637_s10 }
0x115e   : > { %v1022_v20 = vpop.permute.xlu2 %1021 }
0x115f   : > { %v1024_v21 = vadd.f32 %v1022_v20, %v972_v60 }
0x1161   : > { %3267 = vtanh.f32 %v1024_v21 }
0x1166   : > { %v1306_v37 = vpop.permute.xlu2 %1305 }
0x1167   : > { %v3268_v22 = vpop.eup %3267 }
0x1168   : > { %1028 = vrot.lane.b32.xlu0 %v3268_v22, %s3635_s15 }
0x116e   : > { %v4118_v40 = vpop.permute.xlu2 %1299 }
0x1170   : > { %1309 = vrot.lane.b32.xlu0 %v4016_v19, %s3634_s22 }
0x1176   : > { %v1662_v44 = vpop.permute.xlu2 %1661 }
0x1178   : > { %1303 = vrot.lane.b32.xlu0 %v4005_v13, %s3634_s22 }
0x117e   : > { %v4148_v49 = vpop.permute.xlu2 %2037 }
0x1180   : > { %1659 = vrot.lane.b32.xlu0 %v4012_v18, %s3636_s17 }
0x1188   : > { %1655 = vrot.lane.b32.xlu0 %v4005_v13, %s3636_s17 }
0x1190   : > { %1653 = vrot.lane.b32.xlu0 %v4003_v6, %s3636_s17 }
0x11da   : > { %v1029_v24 = vpop.permute.xlu0 %1028 }
0x11db   : > { %v1031_v26 = vmul.f32 %v1029_v24, %v1026_v23 }
0x11dd   : > { %v1033_v27 = vadd.f32 %v1032_v25, %v1031_v26 }
0x11df   : > { %1035 = vrot.lane.b32.xlu1 %v1033_v27, %s3635_s15 }
0x11e2   : > { %v1310_v41 = vpop.permute.xlu0 %1309 }
0x11e7   : > { %1307 = vrot.lane.b32.xlu1 %v4012_v18, %s3634_s22 }
0x11ea   : > { %v1304_v46 = vpop.permute.xlu0 %1303 }
0x11ef   : > { %1301 = vrot.lane.b32.xlu1 %v4003_v6, %s3634_s22 }
0x11f2   : > { %v1660_v51 = vpop.permute.xlu0 %1659 }
0x11f7   : > { %1297 = vrot.lane.b32.xlu1 %v3999_v0, %s3634_s22 }
0x11fa   : > { %v1656_v56 = vpop.permute.xlu0 %1655 }
0x11ff   : > { %1657 = vrot.lane.b32.xlu1 %v4008_v17, %s3636_s17 }
0x1202   : > { %v1654_v60 = vpop.permute.xlu0 %1653 }
0x1207   : > { %2405 = vrot.lane.b32.xlu1 %v4016_v19, %s3638_s25 }
0x120f   : > { %2403 = vrot.lane.b32.xlu1 %v4012_v18, %s3638_s25 }
0x1217   : > { %2401 = vrot.lane.b32.xlu1 %v4008_v17, %s3638_s25 }
0x121f   : > { %2399 = vrot.lane.b32.xlu1 %v4005_v13, %s3638_s25 }
0x1251   : > { %v1036_v28 = vpop.permute.xlu1 %1035 }
0x1252   : > { %1039 = vst.msk [vmem:[#allocation3 + $0x38] sm:$0xff] %vm489_vm6, %v1036_v28 }
0x1259   : > { %v1047_v29 = vld [vmem:[#allocation3 + $0x38] sm:$0xff]  ;;  %v1308_v33 = vpop.permute.xlu1 %1307 }
0x125a   : > { %2964 = vmatmul.msk.f32.gmra.mxu3 %vm489_vm6, %v1047_v29  ;;  %2972 = vmatmul.msk.f32.gmra.mxu1 %vm489_vm6, %v1047_v29 }
0x1261   : > { %v4098_v35 = vpop.permute.xlu1 %1301 }
0x1269   : > { %v4108_v38 = vpop.permute.xlu1 %1297 }
0x1271   : > { %v4126_v42 = vpop.permute.xlu1 %1657 }
0x1279   : > { %v4136_v47 = vpop.permute.xlu1 %2405 }
0x1281   : > { %v2404_v52 = vpop.permute.xlu1 %2403 }
0x1289   : > { %v2402_v57 = vpop.permute.xlu1 %2401 }
0x1291   : > { %v2400_v61 = vpop.permute.xlu1 %2399 }
0x12d7   : > { %v1159_v50 = vpop.f32.mrf.mxu1 }
0x12d8   : > { %v4150_v53 = vpack.i.bf16 %v1156_v45, %v1159_v50 }
0x12dd   : > { %v4054_v30 = vpop.f32.mrf.mxu3 }
0x12de   : > { %2407 = vrot.lane.b32.xlu1 %v4054_v30, %s3638_s25  ;;  %1663 = vrot.lane.b32.xlu0 %v4054_v30, %s3636_s17 }
0x12df   : > { %1311 = vrot.lane.b32.xlu2 %v4054_v30, %s3634_s22  ;;  %s2805_s22 = scalar_lea.hbm %s5659_s8, %s3043_s11 }
0x12e6   : > { %2027 = vrot.lane.b32.xlu1 %v4001_v2, %s3637_s10  ;;  %1651 = vrot.lane.b32.xlu0 %v4001_v2, %s3636_s17 }
0x12e7   : > { %2035 = vrot.lane.b32.xlu2 %v4012_v18, %s3637_s10 }
0x12ee   : > { %2025 = vrot.lane.b32.xlu1 %v3999_v0, %s3637_s10  ;;  %1649 = vrot.lane.b32.xlu0 %v3999_v0, %s3636_s17 }
0x12ef   : > { %2033 = vrot.lane.b32.xlu2 %v4008_v17, %s3637_s10 }
0x12f6   : > { %1637 = vrot.lane.b32.xlu1 %v4003_v6, %s3639_s26  ;;  %1633 = vrot.lane.b32.xlu0 %v3999_v0, %s3639_s26 }
0x12f7   : > { %2031 = vrot.lane.b32.xlu2 %v4005_v13, %s3637_s10 }
0x12fe   : > { %1639 = vrot.lane.b32.xlu1 %v4005_v13, %s3639_s26  ;;  %2397 = vrot.lane.b32.xlu0 %v4003_v6, %s3638_s25 }
0x12ff   : > { %2029 = vrot.lane.b32.xlu2 %v4003_v6, %s3637_s10 }
0x1306   : > { %1641 = vrot.lane.b32.xlu1 %v4008_v17, %s3639_s26  ;;  %2395 = vrot.lane.b32.xlu0 %v4001_v2, %s3638_s25 }
0x1307   : > { %2039 = vrot.lane.b32.xlu2 %v4054_v30, %s3637_s10  ;;  %s390_s10 = scalar_lea.vmem [#allocation13], %s2933_s1 }
0x130e   : > { %1643 = vrot.lane.b32.xlu1 %v4012_v18, %s3639_s26  ;;  %2009 = vrot.lane.b32.xlu0 %v3999_v0, %s3635_s15 }
0x130f   : > { %1635 = vrot.lane.b32.xlu2 %v4001_v2, %s3639_s26 }
0x1316   : > { %1645 = vrot.lane.b32.xlu1 %v4016_v19, %s3639_s26  ;;  %2011 = vrot.lane.b32.xlu0 %v4001_v2, %s3635_s15 }
0x1317   : > { %2393 = vrot.lane.b32.xlu2 %v3999_v0, %s3638_s25 }
0x131e   : > { %2389 = vrot.lane.b32.xlu1 %v4016_v19, %s3640_s19  ;;  %2013 = vrot.lane.b32.xlu0 %v4003_v6, %s3635_s15 }
0x131f   : > { %2377 = vrot.lane.b32.xlu2 %v3999_v0, %s3640_s19 }
0x1326   : > { %1647 = vrot.lane.b32.xlu1 %v4054_v30, %s3639_s26  ;;  %2015 = vrot.lane.b32.xlu0 %v4005_v13, %s3635_s15 }
0x1327   : > { %2379 = vrot.lane.b32.xlu2 %v4001_v2, %s3640_s19 }
0x132e   : > { %3164 = vrot.lane.b32.xlu1 %v4140_v48, %s3641_s13  ;;  %2017 = vrot.lane.b32.xlu0 %v4008_v17, %s3635_s15 }
0x132f   : > { %2381 = vrot.lane.b32.xlu2 %v4003_v6, %s3640_s19 }
0x1336   : > { %3174 = vrot.lane.b32.xlu1 %v4150_v53, %s3639_s26  ;;  %2019 = vrot.lane.b32.xlu0 %v4012_v18, %s3635_s15 }
0x1337   : > { %2383 = vrot.lane.b32.xlu2 %v4005_v13, %s3640_s19 }
0x1339   : > { %v1312_v54 = vpop.permute.xlu2 %1311 }
0x133a   : > { %2973 = vmatpush.xpose.msk.msrb.mxu0 %vm405_vm0, %v1312_v54  ;;  %3046 = vmatpush.xpose.msk.msrb.mxu2 %vm405_vm0, %v1312_v54 }
0x133e   : > { %2974 = vmatpush.xpose.msk.msrb.mxu0 %vm405_vm0, %v1310_v41  ;;  %3047 = vmatpush.xpose.msk.msrb.mxu2 %vm405_vm0, %v1310_v41 }
0x133f   : > { %3179 = vrot.lane.b32.xlu1 %v4162_v55, %s3641_s13  ;;  %2021 = vrot.lane.b32.xlu0 %v4016_v19, %s3635_s15 }
0x1340   : > { %2385 = vrot.lane.b32.xlu2 %v4008_v17, %s3640_s19 }
0x1341   : > { %v4172_v58 = vpop.permute.xlu2 %2035 }
0x1342   : > { %2975 = vmatpush.xpose.msk.msrb.mxu0 %vm405_vm0, %v1308_v33  ;;  %3048 = vmatpush.xpose.msk.msrb.mxu2 %vm405_vm0, %v1308_v33 }
0x1346   : > { %2976 = vmatpush.xpose.msk.msrb.mxu0 %vm405_vm0, %v1306_v37  ;;  %3049 = vmatpush.xpose.msk.msrb.mxu2 %vm405_vm0, %v1306_v37 }
0x1347   : > { %3189 = vrot.lane.b32.xlu1 %v4178_v59, %s3639_s26  ;;  %2391 = vrot.lane.b32.xlu0 %v4054_v30, %s3640_s19 }
0x1348   : > { %2387 = vrot.lane.b32.xlu2 %v4012_v18, %s3640_s19  ;;  %s2795_s19 = scalar_lea.sflag [#allocation6], %s3819_s23 }
0x1349   : > { %v2034_v8 = vpop.permute.xlu2 %2033 }
0x134a   : > { %2977 = vmatpush.xpose.msk.msrb.mxu0 %vm405_vm0, %v1304_v46  ;;  %3050 = vmatpush.xpose.msk.msrb.mxu2 %vm405_vm0, %v1304_v46 }
0x134e   : > { %2978 = vmatpush.xpose.msk.msrb.mxu0 %vm405_vm0, %v4098_v35  ;;  %3051 = vmatpush.xpose.msk.msrb.mxu2 %vm405_vm0, %v4098_v35 }
0x134f   : > { %3199 = vrot.lane.b32.xlu1 %v4162_v55, %s3639_s26  ;;  %3159 = vrot.lane.b32.xlu0 %v4150_v53, %s3641_s13 }
0x1350   : > { %2023 = vrot.lane.b32.xlu2 %v4054_v30, %s3635_s15  ;;  %v2408_v62 = vpop.permute.xlu1 %2407  ;;  %v1664_v63 = vpop.permute.xlu0 %1663 }
0x1351   : > { %v2032_v1 = vpop.permute.xlu2 %2031  ;;  %2990 = vmatpush.xpose.msk.msrb.mxu3 %vm405_vm0, %v1664_v63 }
0x1352   : > { %2979 = vmatpush.xpose.msk.msrb.mxu0 %vm405_vm0, %v4118_v40  ;;  %3052 = vmatpush.xpose.msk.msrb.mxu2 %vm405_vm0, %v4118_v40 }
0x1355   : > { %2991 = vmatpush.xpose.msk.msrb.mxu3 %vm405_vm0, %v1662_v44 }
0x1356   : > { %2980 = vmatpush.xpose.msk.msrb.mxu0 %vm405_vm0, %v4108_v38  ;;  %3053 = vmatpush.xpose.msk.msrb.mxu2 %vm405_vm0, %v4108_v38  ;;  %v1162_v38 = vlaneseq }
0x1358   : > { %3169 = vrot.lane.b32.xlu2 %v4178_v59, %s3641_s13  ;;  %v2028_v3 = vpop.permute.xlu1 %2027  ;;  %v1652_v4 = vpop.permute.xlu0 %1651  ;;  %v4290_v41 = vshrl.u32 %v1162_v38, 7 }
0x1359   : > { %2981 = vmatmul.msk.f32.vlgmr.msrb.gmra.mxu0 %vm405_vm0, %v3999_v0  ;;  %2984 = vmatmul.msk.f32.vlgmr.msrb.gmra.mxu2 %vm405_vm0, %v4005_v13  ;;  %v2030_v5 = vpop.permute.xlu2 %2029 }
0x135a   : > { %1621 = vmatpush.msra.mxu0 %v1159_v50  ;;  %3024 = vmatpush.xpose.msk.msra.mxu2 %vm405_vm0, %v2408_v62  ;;  %v1169_v54 = vadd.s32 48, %v4290_v41 }
0x135b   : > { %2992 = vmatpush.xpose.msk.msrb.mxu3 %vm405_vm0, %v1660_v51 }
0x135c   : > { %1622 = vmatpush.msra.mxu0 %v1156_v45  ;;  %v1168_v45 = vadd.s32 40, %v4290_v41 }
0x135e   : > { %3025 = vmatpush.xpose.msk.msra.mxu2 %vm405_vm0, %v4136_v47  ;;  %1623 = vmatpush.msra.mxu0 %v4128_v43 }
0x135f   : > { %2993 = vmatpush.xpose.msk.msrb.mxu3 %vm405_vm0, %v4126_v42  ;;  %v1172_v42 = vand.u32 127, %v1162_v38 }
0x1360   : > { %1624 = vmatpush.msra.mxu0 %v4114_v39  ;;  %3184 = vrot.lane.b32.xlu2 %v4140_v48, %s3639_s26  ;;  %v1650_v0 = vpop.permute.xlu0 %1649  ;;  %v2026_v11 = vpop.permute.xlu1 %2025  ;;  %s2809_s26 = sshll.u32 %s2805_s22, 4  ;;  %s2810_s26 = int_to_ptr.hbm [resolvable:$true] %s2809_s26 }
0x1361   : > { %2982 = vmatmul.msk.f32.gmra.mxu0 %vm405_vm0, %v4001_v2  ;;  %2985 = vmatmul.msk.f32.gmra.mxu2 %vm405_vm0, %v4008_v17  ;;  %v2040_v7 = vpop.permute.xlu2 %2039  ;;  %v4293_v47 = vand.u32 7, %v1172_v42  ;;  %s3563_s9 = sshra.s32 %s2810_s26, 4  ;;  %s3564_s9 = int_to_ptr.hbm [resolvable:$true] %s3563_s9 }
0x1362   : > { %3026 = vmatpush.xpose.msk.msra.mxu2 %vm405_vm0, %v2404_v52  ;;  %1625 = vmatpush.msra.mxu0 %v4100_v36  ;;  %s3565_s13 = scalar_lea.hbm %s3564_s9, 8  ;;  %p3570_p11 = scmp.lt.s32.totalorder %s3564_s9, %s5659_s8 }
0x1363   : > { %2994 = vmatpush.xpose.msk.msrb.mxu3 %vm405_vm0, %v1656_v56  ;;  %3007 = vmatpush.xpose.msk.msra.mxu1 %vm405_vm0, %v2040_v7  ;;  %p3566_p1 = scmp.ne.s32.totalorder %s3564_s9, %s3565_s13 }
0x1364   : > { %1626 = vmatpush.msra.mxu0 %v4090_v34 }
0x1365   : > { %p3567_p4 = pnand %p3566_p1, %p3786_p3 }
0x1366   : > { %3027 = vmatpush.xpose.msk.msra.mxu2 %vm405_vm0, %v2402_v57  ;;  %1627 = vmatpush.msra.mxu0 %v4082_v32  ;;  %v1219_v57 = vand.u32 7, %v1169_v54 }
0x1367   : > { %2995 = vmatpush.xpose.msk.msrb.mxu3 %vm405_vm0, %v1654_v60  ;;  %3008 = vmatpush.xpose.msk.msra.mxu1 %vm405_vm0, %v4148_v49  ;;  %v1212_v49 = vand.u32 7, %v1168_v45  ;;  %v1177_v60 = vand.u32 7, %v4290_v41  ;;  %p3568_p8 = pneg %p3567_p4 }
0x1368   : > { %1628 = vmatpush.msra.mxu0 %v4072_v31  ;;  %3194 = vrot.lane.b32.xlu2 %v4150_v53, %s3642_s2  ;;  %v1634_v2 = vpop.permute.xlu0 %1633  ;;  %v1638_v10 = vpop.permute.xlu1 %1637  ;;  %vm4303_vm9 = vcmp.eq.s32.totalorder %v1219_v57, %v4293_v47 }
0x1369   : > { %2983 = vmatmul.msk.f32.gmra.mxu0 %vm405_vm0, %v4003_v6  ;;  %2986 = vmatmul.msk.f32.gmra.mxu2 %vm405_vm0, %v4012_v18  ;;  %v1636_v9 = vpop.permute.xlu2 %1635  ;;  %vm4296_vm8 = vcmp.eq.s32.totalorder %v1212_v49, %v4293_v47  ;;  %vm4308_vm10 = vcmp.eq.s32.totalorder %v1177_v60, %v4293_v47 }
0x136a   : > { %3028 = vmatpush.xpose.msk.msra.mxu2 %vm405_vm0, %v2400_v61 }
0x136b   : > { %2996 = vmatpush.xpose.msk.msrb.mxu3 %vm405_vm0, %v1652_v4  ;;  %3009 = vmatpush.xpose.msk.msra.mxu1 %vm405_vm0, %v4172_v58 }
0x136f   : > { %2997 = vmatpush.xpose.msk.msrb.mxu3 %vm405_vm0, %v1650_v0  ;;  %3010 = vmatpush.xpose.msk.msra.mxu1 %vm405_vm0, %v2034_v8 }
0x1370   : > { %v2398_v12 = vpop.permute.xlu0 %2397  ;;  %v1640_v13 = vpop.permute.xlu1 %1639 }
0x1371   : > { %2987 = vmatmul.msk.f32.gmra.mxu2 %vm405_vm0, %v4016_v19  ;;  %v2394_v6 = vpop.permute.xlu2 %2393 }
0x1372   : > { %2998 = vmatmul.msk.f32.vlgmr.msrb.gmra.mxu3 %vm405_vm0, %v1634_v2  ;;  %3029 = vmatpush.xpose.msk.msra.mxu2 %vm405_vm0, %v2398_v12 }
0x1373   : > { %3011 = vmatpush.xpose.msk.msra.mxu1 %vm405_vm0, %v2032_v1  ;;  %v1170_v1 = vadd.s32 56, %v4290_v41 }
0x1375   : > { %v1226_v4 = vand.u32 7, %v1170_v1 }
0x1377   : > { %3012 = vmatpush.xpose.msk.msra.mxu1 %vm405_vm0, %v2030_v5  ;;  %v1167_v5 = vadd.s32 32, %v4290_v41  ;;  %vm4321_vm12 = vcmp.eq.s32.totalorder %v1226_v4, %v4293_v47 }
0x1378   : > { %v2396_v14 = vpop.permute.xlu0 %2395  ;;  %v1642_v16 = vpop.permute.xlu1 %1641 }
0x1379   : > { %2988 = vmatmul.msk.f32.gmra.mxu2 %vm405_vm0, %v4054_v30  ;;  %v2378_v15 = vpop.permute.xlu2 %2377  ;;  %v1205_v7 = vand.u32 7, %v1167_v5 }
0x137a   : > { %2999 = vmatmul.msk.f32.gmra.mxu3 %vm405_vm0, %v1636_v9  ;;  %3030 = vmatpush.xpose.msk.msra.mxu2 %vm405_vm0, %v2396_v14 }
0x137b   : > { %3013 = vmatpush.xpose.msk.msra.mxu1 %vm405_vm0, %v2028_v3  ;;  %vm4326_vm13 = vcmp.eq.s32.totalorder %v1205_v7, %v4293_v47 }
0x137e   : > { %3031 = vmatpush.xpose.msk.msra.mxu2 %vm405_vm0, %v2394_v6 }
0x137f   : > { %3014 = vmatpush.xpose.msk.msra.mxu1 %vm405_vm0, %v2026_v11 }
0x1380   : > { %v2010_v17 = vpop.permute.xlu0 %2009  ;;  %v1644_v20 = vpop.permute.xlu1 %1643 }
0x1381   : > { %3032 = vmatmul.msk.f32.vlgmr.msra.gmra.mxu2 %vm405_vm0, %v2378_v15  ;;  %v2380_v18 = vpop.permute.xlu2 %2379 }
0x1382   : > { %3000 = vmatmul.msk.f32.gmra.mxu3 %vm405_vm0, %v1638_v10  ;;  %3015 = vmatmul.msk.f32.vlgmr.msra.gmra.mxu1 %vm405_vm0, %v2010_v17 }
0x1388   : > { %v2012_v19 = vpop.permute.xlu0 %2011  ;;  %v1646_v23 = vpop.permute.xlu1 %1645 }
0x1389   : > { %3033 = vmatmul.msk.f32.gmra.mxu2 %vm405_vm0, %v2380_v18  ;;  %v2382_v21 = vpop.permute.xlu2 %2381 }
0x138a   : > { %3001 = vmatmul.msk.f32.gmra.mxu3 %vm405_vm0, %v1640_v13  ;;  %3016 = vmatmul.msk.f32.gmra.mxu1 %vm405_vm0, %v2012_v19  ;;  %v1164_v13 = vadd.s32 8, %v4290_v41  ;;  %v1166_v19 = vadd.s32 24, %v4290_v41 }
0x138c   : > { %v1184_v18 = vand.u32 7, %v1164_v13 }
0x138e   : > { %vm4347_vm14 = vcmp.eq.s32.totalorder %v1184_v18, %v4293_v47 }
0x1390   : > { %v2014_v22 = vpop.permute.xlu0 %2013  ;;  %v2390_v26 = vpop.permute.xlu1 %2389 }
0x1391   : > { %3034 = vmatmul.msk.f32.gmra.mxu2 %vm405_vm0, %v2382_v21  ;;  %v2384_v24 = vpop.permute.xlu2 %2383 }
0x1392   : > { %3002 = vmatmul.msk.f32.gmra.mxu3 %vm405_vm0, %v1642_v16  ;;  %3017 = vmatmul.msk.f32.gmra.mxu1 %vm405_vm0, %v2014_v22 }
0x1398   : > { %v2016_v25 = vpop.permute.xlu0 %2015  ;;  %v1648_v29 = vpop.permute.xlu1 %1647 }
0x1399   : > { %3035 = vmatmul.msk.f32.gmra.mxu2 %vm405_vm0, %v2384_v24 }
0x139a   : > { %3003 = vmatmul.msk.f32.gmra.mxu3 %vm405_vm0, %v1644_v20  ;;  %3018 = vmatmul.msk.f32.gmra.mxu1 %vm405_vm0, %v2016_v25  ;;  %v2386_v27 = vpop.permute.xlu2 %2385  ;;  %v1198_v25 = vand.u32 7, %v1166_v19 }
0x139c   : > { %vm4364_vm15 = vcmp.eq.s32.totalorder %v1198_v25, %v4293_v47 }
0x13a0   : > { %v2018_v28 = vpop.permute.xlu0 %2017  ;;  %v3165_v33 = vpop.permute.xlu1 %3164 }
0x13a1   : > { %3036 = vmatmul.msk.f32.gmra.mxu2 %vm405_vm0, %v2386_v27  ;;  %v3166_v43 = vunpack.i.l.bf16 %v3165_v33  ;;  %v3167_v46 = vunpack.i.h.bf16 %v3165_v33 }
0x13a2   : > { %3004 = vmatmul.msk.f32.gmra.mxu3 %vm405_vm0, %v1646_v23  ;;  %3019 = vmatmul.msk.f32.gmra.mxu1 %vm405_vm0, %v2018_v28  ;;  %v2388_v30 = vpop.permute.xlu2 %2387 }
0x13a8   : > { %v2020_v31 = vpop.permute.xlu0 %2019  ;;  %v4288_v36 = vpop.permute.xlu1 %3174 }
0x13a9   : > { %3037 = vmatmul.msk.f32.gmra.mxu2 %vm405_vm0, %v2388_v30 }
0x13aa   : > { %3005 = vmatmul.msk.f32.gmra.mxu3 %vm405_vm0, %v1648_v29  ;;  %3020 = vmatmul.msk.f32.gmra.mxu1 %vm405_vm0, %v2020_v31  ;;  %v2024_v34 = vpop.permute.xlu2 %2023  ;;  %v1165_v31 = vadd.s32 16, %v4290_v41 }
0x13b1   : > { %v2022_v32 = vpop.permute.xlu0 %2021  ;;  %3038 = vmatmul.msk.f32.gmra.mxu2 %vm405_vm0, %v2390_v26  ;;  %v3180_v51 = vpop.permute.xlu1 %3179 }
0x13b2   : > { %3021 = vmatmul.msk.f32.gmra.mxu1 %vm405_vm0, %v2022_v32  ;;  %v3170_v44 = vpop.permute.xlu2 %3169  ;;  %v3181_v56 = vunpack.i.l.bf16 %v3180_v51  ;;  %v3182_v58 = vunpack.i.h.bf16 %v3180_v51 }
0x13b3   : > { %v3171_v50 = vunpack.i.l.bf16 %v3170_v44  ;;  %v3172_v53 = vunpack.i.h.bf16 %v3170_v44 }
0x13b9   : > { %v2392_v35 = vpop.permute.xlu0 %2391 }
0x13ba   : > { %3022 = vmatmul.msk.f32.gmra.mxu1 %vm405_vm0, %v2024_v34  ;;  %3039 = vmatmul.msk.f32.gmra.mxu2 %vm405_vm0, %v2392_v35  ;;  %v1191_v35 = vand.u32 7, %v1165_v31 }
0x13bc   : > { %vm4382_vm2 = vcmp.eq.s32.totalorder %v1191_v35, %v4293_v47 }
0x13c1   : > { %v3160_v37 = vpop.permute.xlu0 %3159 }
0x13c2   : > { %v3161_v39 = vunpack.i.l.bf16 %v3160_v37  ;;  %v3162_v40 = vunpack.i.h.bf16 %v3160_v37 }
0x13c4   : > { %1997 = vmatpush.msrb.mxu0 %v3161_v39 }
0x13c6   : > { %1998 = vmatpush.msrb.mxu0 %v3162_v40 }
0x13c8   : > { %1999 = vmatpush.msrb.mxu0 %v3166_v43 }
0x13ca   : > { %2000 = vmatpush.msrb.mxu0 %v3167_v46 }
0x13cc   : > { %2001 = vmatpush.msrb.mxu0 %v3171_v50 }
0x13ce   : > { %2002 = vmatpush.msrb.mxu0 %v3172_v53 }
0x13d0   : > { %2003 = vmatpush.msrb.mxu0 %v3181_v56 }
0x13d2   : > { %2004 = vmatpush.msrb.mxu0 %v3182_v58 }
0x13d6   : > { %v1362_v62 = vpop.f32.mrf.mxu0 }
0x13d7   : > { %v4314_v63 = vsel %vm4308_vm10, %v1362_v62, -1e+30 }
0x13d8   : > { %v1395_v3 = vsel %vm1394_vm11, %v4314_v63, -inf }
0x13d9   : > { %1396 = vmax.xlane.f32.xlu1 %v1395_v3 }
0x13dc   : > { %v1371_v11 = vpop.f32.mrf.mxu2 }
0x13dd   : > { %v4371_v34 = vsel %vm4364_vm15, %v1371_v11, -1e+30 }
0x13de   : > { %v1365_v28 = vpop.f32.mrf.mxu0  ;;  %v1404_v39 = vsel %vm1394_vm11, %v4371_v34, -inf }
0x13df   : > { %v4388_v44 = vsel %vm4347_vm14, %v1365_v28, -1e+30 }
0x13e0   : > { %v1398_v50 = vsel %vm1394_vm11, %v4388_v44, -inf }
0x13e4   : > { %v1374_v9 = vpop.f32.mrf.mxu2 }
0x13e5   : > { %v4332_v10 = vsel %vm4326_vm13, %v1374_v9, -1e+30 }
0x13e6   : > { %v1407_v12 = vsel %vm1394_vm11, %v4332_v10, -inf  ;;  %v1368_v42 = vpop.f32.mrf.mxu0 }
0x13e7   : > { %1408 = vmax.xlane.f32.xlu1 %v1407_v12  ;;  %v4392_v45 = vsel %vm4382_vm2, %v1368_v42, -1e+30 }
0x13e8   : > { %v1401_v47 = vsel %vm1394_vm11, %v4392_v45, -inf }
0x13ec   : > { %v1377_v6 = vpop.f32.mrf.mxu2 }
0x13ed   : > { %v4420_v3 = vsel %vm4296_vm8, %v1377_v6, -1e+30 }
0x13ee   : > { %v1410_v9 = vsel %vm1394_vm11, %v4420_v3, -inf }
0x13f4   : > { %v4337_v14 = vpop.f32.mrf.mxu2 }
0x13f5   : > { %v1714_v15 = vpop.f32.mrf.mxu3 }
0x13f6   : > { %v4341_v16 = vsel %vm4308_vm10, %v1714_v15, -1e+30  ;;  %v4439_v15 = vsel %vm4303_vm9, %v4337_v14, -1e+30 }
0x13f7   : > { %v1746_v17 = vsel %vm1394_vm11, %v4341_v16, -inf }
0x13f8   : > { %1747 = vmax.xlane.f32.xlu0 %v1746_v17 }
0x13fc   : > { %v1383_v21 = vpop.f32.mrf.mxu2 }
0x13fd   : > { %v1717_v22 = vpop.f32.mrf.mxu3  ;;  %v4424_v4 = vsel %vm4321_vm12, %v1383_v21, -1e+30  ;;  %v1413_v21 = vsel %vm1394_vm11, %v4439_v15, -inf }
0x13fe   : > { %v4353_v23 = vsel %vm4347_vm14, %v1717_v22, -1e+30  ;;  %v1416_v12 = vsel %vm1394_vm11, %v4424_v4, -inf }
0x13ff   : > { %v1749_v24 = vsel %vm1394_vm11, %v4353_v23, -inf  ;;  %v2090_v26 = vpop.f32.mrf.mxu1 }
0x1400   : > { %1750 = vmax.xlane.f32.xlu1 %v1749_v24  ;;  %v4359_v27 = vsel %vm4308_vm10, %v2090_v26, -1e+30 }
0x1401   : > { %v2122_v29 = vsel %vm1394_vm11, %v4359_v27, -inf }
0x1402   : > { %2123 = vmax.xlane.f32.xlu2 %v2122_v29 }
0x1404   : > { %v2458_v33 = vpop.f32.mrf.mxu2 }
0x1405   : > { %v1720_v32 = vpop.f32.mrf.mxu3  ;;  %v4457_v26 = vsel %vm4308_vm10, %v2458_v33, -1e+30 }
0x1406   : > { %v4406_v54 = vsel %vm4382_vm2, %v1720_v32, -1e+30  ;;  %v2490_v8 = vsel %vm1394_vm11, %v4457_v26, -inf }
0x1407   : > { %v2093_v37 = vpop.f32.mrf.mxu1  ;;  %v1752_v1 = vsel %vm1394_vm11, %v4406_v54, -inf }
0x1408   : > { %v4375_v38 = vsel %vm4347_vm14, %v2093_v37, -1e+30 }
0x1409   : > { %v2125_v40 = vsel %vm1394_vm11, %v4375_v38, -inf }
0x140a   : > { %1405 = vmax.xlane.f32.xlu2 %v1404_v39  ;;  %2126 = vmax.xlane.f32.xlu0 %v2125_v40 }
0x140c   : > { %v4394_v46 = vpop.f32.mrf.mxu2 }
0x140d   : > { %v1723_v43 = vpop.f32.mrf.mxu3 }
0x140e   : > { %v4461_v28 = vsel %vm4364_vm15, %v1723_v43, -1e+30 }
0x140f   : > { %v2096_v49 = vpop.f32.mrf.mxu1  ;;  %v1755_v32 = vsel %vm1394_vm11, %v4461_v28, -inf }
0x1410   : > { %v4402_v51 = vsel %vm4382_vm2, %v2096_v49, -1e+30 }
0x1411   : > { %v2128_v60 = vsel %vm1394_vm11, %v4402_v51, -inf }
0x1412   : > { %1399 = vmax.xlane.f32.xlu2 %v1398_v50  ;;  %1402 = vmax.xlane.f32.xlu0 %v1401_v47  ;;  %v4489_v50 = vpop.permute.xlu1 %3189 }
0x1414   : > { %v2464_v58 = vpop.f32.mrf.mxu2 }
0x1415   : > { %v1726_v53 = vpop.f32.mrf.mxu3 }
0x1416   : > { %v4428_v5 = vsel %vm4326_vm13, %v1726_v53, -1e+30  ;;  %v4496_v53 = vsel %vm4347_vm14, %v4394_v46, -1e+30 }
0x1417   : > { %v2099_v56 = vpop.f32.mrf.mxu1  ;;  %v1758_v6 = vsel %vm1394_vm11, %v4428_v5, -inf }
0x1418   : > { %v4410_v57 = vsel %vm4364_vm15, %v2099_v56, -1e+30  ;;  %v4500_v56 = vsel %vm4382_vm2, %v2464_v58, -1e+30 }
0x1419   : > { %v2131_v62 = vsel %vm1394_vm11, %v4410_v57, -inf }
0x141a   : > { %2129 = vmax.xlane.f32.xlu2 %v2128_v60  ;;  %2132 = vmax.xlane.f32.xlu1 %v2131_v62  ;;  %v4512_v41 = vpop.permute.xlu1 %3199 }
0x141b   : > { %1753 = vmax.xlane.f32.xlu0 %v1752_v1  ;;  %v2493_v1 = vsel %vm1394_vm11, %v4496_v53, -inf  ;;  %5701 = vst [vmem:[#allocation18_spill] sm:$0xff] %v4512_v41 }
0x141c   : > { %v2467_v13 = vpop.f32.mrf.mxu2 }
0x141d   : > { %v1729_v7 = vpop.f32.mrf.mxu3  ;;  %v4504_v60 = vsel %vm4364_vm15, %v2467_v13, -1e+30 }
0x141e   : > { %v4443_v17 = vsel %vm4296_vm8, %v1729_v7, -1e+30  ;;  %v2499_v20 = vsel %vm1394_vm11, %v4504_v60, -inf }
0x141f   : > { %v2102_v11 = vpop.f32.mrf.mxu1  ;;  %v1761_v24 = vsel %vm1394_vm11, %v4443_v17, -inf }
0x1420   : > { %v4475_v37 = vsel %vm4326_vm13, %v2102_v11, -1e+30  ;;  %v2496_v11 = vsel %vm1394_vm11, %v4500_v56, -inf }
0x1421   : > { %v2134_v43 = vsel %vm1394_vm11, %v4475_v37, -inf }
0x1422   : > { %1411 = vmax.xlane.f32.xlu2 %v1410_v9  ;;  %1417 = vmax.xlane.f32.xlu1 %v1416_v12 }
0x1423   : > { %1759 = vmax.xlane.f32.xlu0 %v1758_v6 }
0x1424   : > { %v2470_v25 = vpop.f32.mrf.mxu2 }
0x1425   : > { %v1732_v14 = vpop.f32.mrf.mxu3  ;;  %v4516_v30 = vsel %vm4326_vm13, %v2470_v25, -1e+30 }
0x1426   : > { %v4479_v39 = vsel %vm4303_vm9, %v1732_v14, -1e+30  ;;  %v2502_v9 = vsel %vm1394_vm11, %v4516_v30, -inf }
0x1427   : > { %v2105_v18 = vpop.f32.mrf.mxu1  ;;  %v1764_v49 = vsel %vm1394_vm11, %v4479_v39, -inf }
0x1428   : > { %v4447_v19 = vsel %vm4296_vm8, %v2105_v18, -1e+30 }
0x1429   : > { %v2137_v22 = vsel %vm1394_vm11, %v4447_v19, -inf }
0x142a   : > { %1414 = vmax.xlane.f32.xlu2 %v1413_v21  ;;  %1762 = vmax.xlane.f32.xlu1 %v1761_v24 }
0x142b   : > { %2138 = vmax.xlane.f32.xlu0 %v2137_v22 }
0x142c   : > { %v2473_v42 = vpop.f32.mrf.mxu2 }
0x142d   : > { %v1735_v33 = vpop.f32.mrf.mxu3  ;;  %v4535_v61 = vsel %vm4296_vm8, %v2473_v42, -1e+30 }
0x142e   : > { %v4483_v40 = vsel %vm4321_vm12, %v1735_v33, -1e+30  ;;  %v2505_v14 = vsel %vm1394_vm11, %v4535_v61, -inf }
0x142f   : > { %v2108_v29 = vpop.f32.mrf.mxu1  ;;  %v1767_v47 = vsel %vm1394_vm11, %v4483_v40, -inf }
0x1430   : > { %v4465_v31 = vsel %vm4303_vm9, %v2108_v29, -1e+30 }
0x1431   : > { %v2140_v35 = vsel %vm1394_vm11, %v4465_v31, -inf }
0x1432   : > { %1756 = vmax.xlane.f32.xlu2 %v1755_v32  ;;  %2491 = vmax.xlane.f32.xlu1 %v2490_v8 }
0x1433   : > { %2141 = vmax.xlane.f32.xlu0 %v2140_v35 }
0x1434   : > { %v2476_v62 = vpop.f32.mrf.mxu2 }
0x1435   : > { %v4524_v7 = vsel %vm4303_vm9, %v2476_v62, -1e+30 }
0x1436   : > { %v2508_v2 = vsel %vm1394_vm11, %v4524_v7, -inf }
0x1437   : > { %v2111_v46 = vpop.f32.mrf.mxu1 }
0x1438   : > { %v4520_v58 = vsel %vm4321_vm12, %v2111_v46, -1e+30 }
0x1439   : > { %v2143_v12 = vsel %vm1394_vm11, %v4520_v58, -inf }
0x143a   : > { %2135 = vmax.xlane.f32.xlu2 %v2134_v43  ;;  %1765 = vmax.xlane.f32.xlu1 %v1764_v49 }
0x143b   : > { %1768 = vmax.xlane.f32.xlu0 %v1767_v47 }
0x143d   : > { %v2479_v6 = vpop.f32.mrf.mxu2 }
0x143e   : > { %v4539_v21 = vsel %vm4321_vm12, %v2479_v6, -1e+30 }
0x143f   : > { %v2511_v24 = vsel %vm1394_vm11, %v4539_v21, -inf }
0x1442   : > { %2494 = vmax.xlane.f32.xlu2 %v2493_v1  ;;  %2497 = vmax.xlane.f32.xlu1 %v2496_v11 }
0x1443   : > { %2500 = vmax.xlane.f32.xlu0 %v2499_v20 }
0x144a   : > { %2503 = vmax.xlane.f32.xlu1 %v2502_v9  ;;  %2144 = vmax.xlane.f32.xlu2 %v2143_v12 }
0x144b   : > { %2509 = vmax.xlane.f32.xlu0 %v2508_v2 }
0x144c   : > { %v1397_v13 = vpop.xlane.xlu1 %1396 }
0x144d   : > { %v1419_v18 = vsub.f32 %v4314_v63, %v1397_v13  ;;  %v4549_v63 = vpop.permute.xlu2 %3184 }
0x144f   : > { %v1427_v22 = vmul.f32 1.442695, %v1419_v18 }
0x1451   : > { %3269 = vpow2.f32 %v1427_v22 }
0x1452   : > { %2512 = vmax.xlane.f32.xlu1 %v2511_v24  ;;  %2506 = vmax.xlane.f32.xlu2 %v2505_v14 }
0x1455   : > { %v4551_v0 = vpop.permute.xlu2 %3194 }
0x1456   : > { %5702 = vst [vmem:[#allocation19_spill] sm:$0xff] %v4551_v0 }
0x1457   : > { %v4545_v25 = vpop.eup %3269 }
0x1458   : > { %v1443_v52 = vsel %vm1394_vm11, %v4545_v25, 0.0 }
0x145a   : > { %1444 = vadd.xlane.f32.xlu2 %v1443_v52  ;;  %v1409_v33 = vpop.xlane.xlu1 %1408 }
0x146b   : > { %v1748_v29 = vpop.xlane.xlu0 %1747 }
0x146c   : > { %v1770_v1 = vsub.f32 %v4341_v16, %v1748_v29 }
0x146e   : > { %v1778_v46 = vmul.f32 1.442695, %v1770_v1 }
0x1473   : > { %v1751_v20 = vpop.xlane.xlu1 %1750 }
0x1475   : > { %v2124_v32 = vpop.xlane.xlu2 %2123 }
0x1476   : > { %v2146_v35 = vsub.f32 %v4359_v27, %v2124_v32 }
0x1478   : > { %v2154_v8 = vmul.f32 1.442695, %v2146_v35 }
0x147a   : > { %3271 = vpow2.f32 %v2154_v8 }
0x147d   : > { %v2127_v42 = vpop.xlane.xlu0 %2126  ;;  %v1406_v43 = vpop.xlane.xlu2 %1405 }
0x147e   : > { %v1422_v49 = vsub.f32 %v4371_v34, %v1406_v43  ;;  %v1423_v34 = vsub.f32 %v4332_v10, %v1409_v33  ;;  %v2147_v16 = vsub.f32 %v4375_v38, %v2127_v42  ;;  %v1771_v38 = vsub.f32 %v4353_v23, %v1751_v20 }
0x1480   : > { %v4555_v47 = vpop.eup %3271  ;;  %v1433_v62 = vmul.f32 1.442695, %v1422_v49  ;;  %v1435_v24 = vmul.f32 1.442695, %v1423_v34  ;;  %v2156_v14 = vmul.f32 1.442695, %v2147_v16 }
0x1481   : > { %v2170_v11 = vsel %vm1394_vm11, %v4555_v47, 0.0  ;;  %v1780_v49 = vmul.f32 1.442695, %v1771_v38 }
0x1482   : > { %2171 = vadd.xlane.f32.xlu1 %v2170_v11  ;;  %3273 = vpow2.f32 %v1433_v62 }
0x1483   : > { %3275 = vpow2.f32 %v1778_v46 }
0x1485   : > { %v1403_v27 = vpop.xlane.xlu0 %1402  ;;  %v1400_v9 = vpop.xlane.xlu2 %1399 }
0x1486   : > { %v1421_v12 = vsub.f32 %v4392_v45, %v1403_v27  ;;  %v1420_v2 = vsub.f32 %v4388_v44, %v1400_v9 }
0x1488   : > { %v1431_v6 = vmul.f32 1.442695, %v1421_v12  ;;  %v1429_v13 = vmul.f32 1.442695, %v1420_v2  ;;  %v4563_v18 = vpop.eup %3273 }
0x1489   : > { %v1452_v22 = vsel %vm1394_vm11, %v4563_v18, 0.0  ;;  %v4569_v29 = vpop.eup %3275 }
0x148a   : > { %3277 = vpow2.f32 %v1431_v6  ;;  %1453 = vadd.xlane.f32.xlu2 %v1452_v22 }
0x148b   : > { %3279 = vpow2.f32 %v1429_v13 }
0x148c   : > { %3281 = vpow2.f32 %v1435_v24 }
0x148d   : > { %v2133_v45 = vpop.xlane.xlu1 %2132  ;;  %v2130_v52 = vpop.xlane.xlu2 %2129  ;;  %3283 = vpow2.f32 %v2156_v14 }
0x148e   : > { %v1754_v44 = vpop.xlane.xlu0 %1753  ;;  %v2148_v10 = vsub.f32 %v4402_v51, %v2130_v52  ;;  %v1794_v51 = vsel %vm1394_vm11, %v4569_v29, 0.0  ;;  %v2149_v27 = vsub.f32 %v4410_v57, %v2133_v45 }
0x148f   : > { %v1772_v33 = vsub.f32 %v4406_v54, %v1754_v44 }
0x1490   : > { %v4571_v32 = vpop.eup %3277  ;;  %v2158_v35 = vmul.f32 1.442695, %v2148_v10  ;;  %v2160_v13 = vmul.f32 1.442695, %v2149_v27 }
0x1491   : > { %v4574_v8 = vpop.eup %3279  ;;  %v1449_v42 = vsel %vm1394_vm11, %v4571_v32, 0.0  ;;  %v1782_v23 = vmul.f32 1.442695, %v1772_v33 }
0x1492   : > { %1450 = vadd.xlane.f32.xlu1 %v1449_v42  ;;  %v1446_v43 = vsel %vm1394_vm11, %v4574_v8, 0.0  ;;  %1795 = vadd.xlane.f32.xlu2 %v1794_v51  ;;  %3285 = vpow2.f32 %v2158_v35  ;;  %v4583_v11 = vpop.eup %3281 }
0x1493   : > { %1447 = vadd.xlane.f32.xlu0 %v1446_v43  ;;  %v4586_v46 = vpop.eup %3283  ;;  %3287 = vpow2.f32 %v1780_v49  ;;  %v1455_v6 = vsel %vm1394_vm11, %v4583_v11, 0.0 }
0x1494   : > { %3289 = vpow2.f32 %v1782_v23  ;;  %v2173_v34 = vsel %vm1394_vm11, %v4586_v46, 0.0 }
0x1495   : > { %v1418_v62 = vpop.xlane.xlu1 %1417  ;;  %v1412_v1 = vpop.xlane.xlu2 %1411 }
0x1496   : > { %v1760_v54 = vpop.xlane.xlu0 %1759  ;;  %v1424_v20 = vsub.f32 %v4420_v3, %v1412_v1  ;;  %v1426_v52 = vsub.f32 %v4424_v4, %v1418_v62 }
0x1497   : > { %v1774_v12 = vsub.f32 %v4428_v5, %v1760_v54 }
0x1498   : > { %v1437_v9 = vmul.f32 1.442695, %v1424_v20  ;;  %v4590_v2 = vpop.eup %3285  ;;  %v1441_v42 = vmul.f32 1.442695, %v1426_v52 }
0x1499   : > { %v2176_v3 = vsel %vm1394_vm11, %v4590_v2, 0.0  ;;  %v1786_v57 = vmul.f32 1.442695, %v1774_v12  ;;  %v4598_v5 = vpop.eup %3287 }
0x149a   : > { %2174 = vadd.xlane.f32.xlu2 %v2173_v34  ;;  %3291 = vpow2.f32 %v1437_v9  ;;  %2177 = vadd.xlane.f32.xlu1 %v2176_v3  ;;  %v4601_v45 = vpop.eup %3289  ;;  %v1797_v33 = vsel %vm1394_vm11, %v4598_v5, 0.0 }
0x149b   : > { %1456 = vadd.xlane.f32.xlu0 %v1455_v6  ;;  %3293 = vpow2.f32 %v2160_v13  ;;  %v1800_v35 = vsel %vm1394_vm11, %v4601_v45, 0.0 }
0x149c   : > { %3295 = vpow2.f32 %v1786_v57 }
0x149d   : > { %v1763_v16 = vpop.xlane.xlu1 %1762  ;;  %v1415_v22 = vpop.xlane.xlu2 %1414 }
0x149e   : > { %v2139_v24 = vpop.xlane.xlu0 %2138  ;;  %v1425_v14 = vsub.f32 %v4439_v15, %v1415_v22  ;;  %v1775_v1 = vsub.f32 %v4443_v17, %v1763_v16 }
0x149f   : > { %v2151_v10 = vsub.f32 %v4447_v19, %v2139_v24 }
0x14a0   : > { %v1439_v44 = vmul.f32 1.442695, %v1425_v14  ;;  %v4605_v38 = vpop.eup %3291  ;;  %v1788_v34 = vmul.f32 1.442695, %v1775_v1 }
0x14a1   : > { %v1458_v15 = vsel %vm1394_vm11, %v4605_v38, 0.0  ;;  %v2164_v4 = vmul.f32 1.442695, %v2151_v10  ;;  %v4613_v19 = vpop.eup %3293 }
0x14a2   : > { %1801 = vadd.xlane.f32.xlu2 %v1800_v35  ;;  %3297 = vpow2.f32 %v1439_v44  ;;  %1459 = vadd.xlane.f32.xlu1 %v1458_v15  ;;  %v4616_v62 = vpop.eup %3295  ;;  %v2179_v12 = vsel %vm1394_vm11, %v4613_v19, 0.0 }
0x14a3   : > { %1798 = vadd.xlane.f32.xlu0 %v1797_v33  ;;  %3299 = vpow2.f32 %v1441_v42  ;;  %v1806_v9 = vsel %vm1394_vm11, %v4616_v62, 0.0 }
0x14a4   : > { %3301 = vpow2.f32 %v2164_v4 }
0x14a5   : > { %v2492_v51 = vpop.xlane.xlu1 %2491  ;;  %v1757_v43 = vpop.xlane.xlu2 %1756 }
0x14a6   : > { %v2142_v49 = vpop.xlane.xlu0 %2141  ;;  %v1773_v23 = vsub.f32 %v4461_v28, %v1757_v43  ;;  %v2514_v22 = vsub.f32 %v4457_v26, %v2492_v51 }
0x14a7   : > { %v2152_v20 = vsub.f32 %v4465_v31, %v2142_v49 }
0x14a8   : > { %v1784_v54 = vmul.f32 1.442695, %v1773_v23  ;;  %v4620_v27 = vpop.eup %3297  ;;  %v2522_v35 = vmul.f32 1.442695, %v2514_v22 }
0x14a9   : > { %v1461_v28 = vsel %vm1394_vm11, %v4620_v27, 0.0  ;;  %v2166_v17 = vmul.f32 1.442695, %v2152_v20  ;;  %v4628_v31 = vpop.eup %3299 }
0x14aa   : > { %1807 = vadd.xlane.f32.xlu2 %v1806_v9  ;;  %3303 = vpow2.f32 %v1784_v54  ;;  %1462 = vadd.xlane.f32.xlu1 %v1461_v28  ;;  %v4631_v16 = vpop.eup %3301  ;;  %v1464_v10 = vsel %vm1394_vm11, %v4628_v31, 0.0 }
0x14ab   : > { %2180 = vadd.xlane.f32.xlu0 %v2179_v12  ;;  %3305 = vpow2.f32 %v1788_v34  ;;  %v2185_v44 = vsel %vm1394_vm11, %v4631_v16, 0.0 }
0x14ac   : > { %3307 = vpow2.f32 %v2166_v17 }
0x14ad   : > { %v1766_v6 = vpop.xlane.xlu1 %1765  ;;  %v2136_v3 = vpop.xlane.xlu2 %2135 }
0x14ae   : > { %v1769_v13 = vpop.xlane.xlu0 %1768  ;;  %v2150_v57 = vsub.f32 %v4475_v37, %v2136_v3  ;;  %v1776_v43 = vsub.f32 %v4479_v39, %v1766_v6 }
0x14af   : > { %v1777_v14 = vsub.f32 %v4483_v40, %v1769_v13 }
0x14b0   : > { %v2162_v24 = vmul.f32 1.442695, %v2150_v57  ;;  %v4635_v52 = vpop.eup %3303  ;;  %v1790_v9 = vmul.f32 1.442695, %v1776_v43 }
0x14b1   : > { %v1803_v37 = vsel %vm1394_vm11, %v4635_v52, 0.0  ;;  %v1792_v26 = vmul.f32 1.442695, %v1777_v14  ;;  %v4643_v40 = vpop.eup %3305 }
0x14b2   : > { %2186 = vadd.xlane.f32.xlu2 %v2185_v44  ;;  %3309 = vpow2.f32 %v2162_v24  ;;  %1804 = vadd.xlane.f32.xlu1 %v1803_v37  ;;  %v4646_v51 = vpop.eup %3307  ;;  %v1809_v20 = vsel %vm1394_vm11, %v4643_v40, 0.0 }
0x14b3   : > { %1465 = vadd.xlane.f32.xlu0 %v1464_v10  ;;  %3311 = vpow2.f32 %v2522_v35  ;;  %v2188_v54 = vsel %vm1394_vm11, %v4646_v51, 0.0 }
0x14b4   : > { %3313 = vpow2.f32 %v1792_v26 }
0x14b5   : > { %v2498_v33 = vpop.xlane.xlu1 %2497  ;;  %v2495_v15 = vpop.xlane.xlu2 %2494 }
0x14b6   : > { %v2501_v42 = vpop.xlane.xlu0 %2500  ;;  %v2515_v4 = vsub.f32 %v4496_v53, %v2495_v15  ;;  %v2516_v3 = vsub.f32 %v4500_v56, %v2498_v33 }
0x14b7   : > { %v2517_v23 = vsub.f32 %v4504_v60, %v2501_v42 }
0x14b8   : > { %v2524_v49 = vmul.f32 1.442695, %v2515_v4  ;;  %v4650_v1 = vpop.eup %3309  ;;  %v2526_v14 = vmul.f32 1.442695, %v2516_v3 }
0x14b9   : > { %v2182_v53 = vsel %vm1394_vm11, %v4650_v1, 0.0  ;;  %v2528_v39 = vmul.f32 1.442695, %v2517_v23  ;;  %v4658_v60 = vpop.eup %3311 }
0x14ba   : > { %2189 = vadd.xlane.f32.xlu2 %v2188_v54  ;;  %3315 = vpow2.f32 %v2524_v49  ;;  %2183 = vadd.xlane.f32.xlu1 %v2182_v53  ;;  %v4661_v17 = vpop.eup %3313  ;;  %v2538_v24 = vsel %vm1394_vm11, %v4658_v60, 0.0 }
0x14bb   : > { %1810 = vadd.xlane.f32.xlu0 %v1809_v20  ;;  %3317 = vpow2.f32 %v1790_v9  ;;  %v1815_v22 = vsel %vm1394_vm11, %v4661_v17, 0.0 }
0x14bc   : > { %3319 = vpow2.f32 %v2528_v39 }
0x14bd   : > { %v2504_v12 = vpop.xlane.xlu1 %2503  ;;  %v2145_v28 = vpop.xlane.xlu2 %2144 }
0x14be   : > { %v2153_v34 = vsub.f32 %v4520_v58, %v2145_v28  ;;  %v2518_v57 = vsub.f32 %v4516_v30, %v2504_v12  ;;  %v2510_v56 = vpop.xlane.xlu0 %2509 }
0x14bf   : > { %v2520_v33 = vsub.f32 %v4524_v7, %v2510_v56 }
0x14c0   : > { %v2168_v6 = vmul.f32 1.442695, %v2153_v34  ;;  %v4664_v13 = vpop.eup %3315  ;;  %v2530_v37 = vmul.f32 1.442695, %v2518_v57 }
0x14c1   : > { %v2541_v58 = vsel %vm1394_vm11, %v4664_v13, 0.0  ;;  %v4673_v10 = vpop.eup %3317  ;;  %v2534_v7 = vmul.f32 1.442695, %v2520_v33 }
0x14c2   : > { %1816 = vadd.xlane.f32.xlu2 %v1815_v22  ;;  %3321 = vpow2.f32 %v2168_v6  ;;  %2542 = vadd.xlane.f32.xlu1 %v2541_v58  ;;  %v4676_v26 = vpop.eup %3319  ;;  %v1812_v49 = vsel %vm1394_vm11, %v4673_v10, 0.0 }
0x14c3   : > { %2539 = vadd.xlane.f32.xlu0 %v2538_v24  ;;  %3323 = vpow2.f32 %v2526_v14  ;;  %v2547_v43 = vsel %vm1394_vm11, %v4676_v26, 0.0 }
0x14c4   : > { %3325 = vpow2.f32 %v2530_v37 }
0x14c5   : > { %v2507_v44 = vpop.xlane.xlu2 %2506  ;;  %v2513_v30 = vpop.xlane.xlu1 %2512 }
0x14c6   : > { %v2519_v35 = vsub.f32 %v4535_v61, %v2507_v44  ;;  %v2521_v42 = vsub.f32 %v4539_v21, %v2513_v30 }
0x14c8   : > { %v2532_v15 = vmul.f32 1.442695, %v2519_v35  ;;  %v4680_v4 = vpop.eup %3321  ;;  %v2536_v23 = vmul.f32 1.442695, %v2521_v42 }
0x14c9   : > { %v2191_v61 = vsel %vm1394_vm11, %v4680_v4, 0.0  ;;  %v4688_v54 = vpop.eup %3323 }
0x14ca   : > { %3327 = vpow2.f32 %v2532_v15  ;;  %2548 = vadd.xlane.f32.xlu2 %v2547_v43  ;;  %2192 = vadd.xlane.f32.xlu1 %v2191_v61  ;;  %v4690_v21 = vpop.eup %3325  ;;  %v2544_v53 = vsel %vm1394_vm11, %v4688_v54, 0.0 }
0x14cb   : > { %1813 = vadd.xlane.f32.xlu0 %v1812_v49  ;;  %3329 = vpow2.f32 %v2534_v7  ;;  %v2550_v39 = vsel %vm1394_vm11, %v4690_v21, 0.0 }
0x14cc   : > { %3331 = vpow2.f32 %v2536_v23 }
0x14cd   : > { %v1445_v3 = vpop.xlane.xlu2 %1444 }
0x14ce   : > { %3333 = vrcp.f32 %v1445_v3  ;;  %vm1472_vm1 = vweird.f32 %v1445_v3 }
0x14d0   : > { %v4692_v20 = vpop.eup %3327 }
0x14d1   : > { %5703 = vst [vmem:[#allocation20_spill] sm:$0xff] %v4692_v20  ;;  %v2553_v9 = vsel %vm1394_vm11, %v4692_v20, 0.0  ;;  %v4700_v12 = vpop.eup %3329 }
0x14d2   : > { %2554 = vadd.xlane.f32.xlu2 %v2553_v9  ;;  %2551 = vadd.xlane.f32.xlu1 %v2550_v39  ;;  %5704 = vst [vmem:[#allocation21_spill] sm:$0xff] %v4700_v12  ;;  %v4702_v28 = vpop.eup %3331  ;;  %v2556_v6 = vsel %vm1394_vm11, %v4700_v12, 0.0 }
0x14d3   : > { %2545 = vadd.xlane.f32.xlu0 %v2544_v53  ;;  %5705 = vst [vmem:[#allocation22_spill] sm:$0xff] %v4702_v28  ;;  %v2559_v34 = vsel %vm1394_vm11, %v4702_v28, 0.0 }
0x14d4   : > { %v3334_v57 = vpop.eup %3333 }
0x14d5   : > { %v1468_v24 = vmul.f32 %v3334_v57, %v1445_v3  ;;  %vm1473_vm3 = vweird.f32 %v3334_v57 }
0x14d6   : > { %vm1474_vm4 = vmor %vm1472_vm1, %vm1473_vm3 }
0x14d7   : > { %v1469_v58 = vsub.f32 1.0, %v1468_v24 }
0x14d9   : > { %v1470_v44 = vmul.f32 %v3334_v57, %v1469_v58 }
0x14da   : > { %2557 = vadd.xlane.f32.xlu2 %v2556_v6 }
0x14db   : > { %2560 = vadd.xlane.f32.xlu0 %v2559_v34 }
0x14eb   : > { %3214 = vrot.lane.b32.xlu1 %v4162_v55, %s3642_s2  ;;  %v1471_v55 = vadd.f32 %v3334_v57, %v1470_v44 }
0x14ed   : > { %v1475_v43 = vsel %vm1474_vm4, %v3334_v57, %v1471_v55 }
0x14ef   : > { %3204 = vrot.lane.b32.xlu0 %v4140_v48, %s3642_s2  ;;  %v1478_v48 = vand.u32 2147483648, %v1445_v3 }
0x14f1   : > { %v1479_v7 = vor.u32 1.1754944e-38, %v1478_v48 }
0x14f2   : > { %3209 = vrot.lane.b32.xlu2 %v4178_v59, %s3642_s2  ;;  %v1476_v59 = vand.u32 2147483647, %v1445_v3 }
0x14f4   : > { %vm1477_vm5 = vcmp.eq.f32.partialorder %v1476_v59, 8.507059e+37 }
0x14f5   : > { %v2172_v22 = vpop.xlane.xlu1 %2171  ;;  %v1480_v23 = vsel %vm1477_vm5, %v1479_v7, %v1475_v43 }
0x14f6   : > { %3335 = vrcp.f32 %v2172_v22  ;;  %v2205_v6 = vand.u32 2147483648, %v2172_v22  ;;  %v1481_v58 = vmul.f32 %v4545_v25, %v1480_v23  ;;  %vm2199_vm8 = vweird.f32 %v2172_v22 }
0x14f7   : > { %v2203_v44 = vand.u32 2147483647, %v2172_v22 }
0x14f8   : > { %v2206_v23 = vor.u32 1.1754944e-38, %v2205_v6  ;;  %v4765_v25 = vsel %vm1394_vm11, %v1481_v58, 0.0 }
0x14f9   : > { %vm2204_vm10 = vcmp.eq.f32.partialorder %v2203_v44, 8.507059e+37 }
0x14fc   : > { %v3336_v14 = vpop.eup %3335 }
0x14fd   : > { %v4714_v56 = vpop.xlane.xlu2 %1453  ;;  %v2195_v37 = vmul.f32 %v3336_v14, %v2172_v22  ;;  %vm2200_vm7 = vweird.f32 %v3336_v14 }
0x14fe   : > { %3337 = vrcp.f32 %v4714_v56  ;;  %vm4744_vm9 = vmor %vm2199_vm8, %vm2200_vm7  ;;  %vm1517_vm12 = vweird.f32 %v4714_v56 }
0x14ff   : > { %v2196_v30 = vsub.f32 1.0, %v2195_v37 }
0x1501   : > { %v2197_v49 = vmul.f32 %v3336_v14, %v2196_v30 }
0x1503   : > { %v2198_v9 = vadd.f32 %v3336_v14, %v2197_v49 }
0x1504   : > { %v4717_v35 = vpop.eup %3337 }
0x1505   : > { %v4719_v33 = vpop.xlane.xlu1 %1450  ;;  %v4724_v42 = vpop.xlane.xlu2 %1795  ;;  %v1513_v61 = vmul.f32 %v4717_v35, %v4714_v56  ;;  %v2202_v22 = vsel %vm4744_vm9, %v3336_v14, %v2198_v9  ;;  %v1521_v14 = vand.u32 2147483647, %v4714_v56  ;;  %vm1518_vm13 = vweird.f32 %v4717_v35 }
0x1506   : > { %3339 = vrcp.f32 %v4719_v33  ;;  %v4722_v15 = vpop.xlane.xlu0 %1447  ;;  %v2207_v9 = vsel %vm2204_vm10, %v2206_v23, %v2202_v22  ;;  %v1506_v22 = vand.u32 2147483647, %v4719_v33  ;;  %vm4784_vm15 = vmor %vm1517_vm12, %vm1518_vm13  ;;  %vm1502_vm1 = vweird.f32 %v4719_v33 }
0x1507   : > { %3341 = vrcp.f32 %v4722_v15  ;;  %v1514_v39 = vsub.f32 1.0, %v1513_v61  ;;  %vm4788_vm2 = vcmp.eq.f32.partialorder %v1521_v14, 8.507059e+37  ;;  %vm1487_vm3 = vweird.f32 %v4722_v15 }
0x1508   : > { %3343 = vrcp.f32 %v4724_v42  ;;  %vm4821_vm7 = vcmp.eq.f32.partialorder %v1506_v22, 8.507059e+37  ;;  %vm1823_vm12 = vweird.f32 %v4724_v42 }
0x1509   : > { %v1515_v61 = vmul.f32 %v4717_v35, %v1514_v39  ;;  %v1523_v39 = vand.u32 2147483648, %v4714_v56  ;;  %v1493_v56 = vand.u32 2147483648, %v4722_v15 }
0x150c   : > { %v4730_v53 = vpop.eup %3339 }
0x150d   : > { %v1498_v3 = vmul.f32 %v4730_v53, %v4719_v33  ;;  %v4735_v57 = vpop.eup %3341  ;;  %v4757_v7 = vpop.xlane.xlu1 %2177  ;;  %vm1503_vm4 = vweird.f32 %v4730_v53 }
0x150e   : > { %v4739_v37 = vpop.xlane.xlu0 %1456  ;;  %v1483_v43 = vmul.f32 %v4735_v57, %v4722_v15  ;;  %v4750_v49 = vpop.eup %3343  ;;  %vm1488_vm14 = vweird.f32 %v4735_v57  ;;  %vm4835_vm9 = vmor %vm1502_vm1, %vm1503_vm4  ;;  %vm2229_vm1 = vweird.f32 %v4757_v7 }
0x150f   : > { %3345 = vrcp.f32 %v4739_v37  ;;  %v1499_v55 = vsub.f32 1.0, %v1498_v3  ;;  %v1819_v48 = vmul.f32 %v4750_v49, %v4724_v42  ;;  %v4761_v34 = vpop.xlane.xlu2 %2174  ;;  %v1516_v3 = vadd.f32 %v4717_v35, %v1515_v61  ;;  %vm4803_vm5 = vmor %vm1487_vm3, %vm1488_vm14 }
0x1510   : > { %v1484_v30 = vsub.f32 1.0, %v1483_v43  ;;  %3347 = vrcp.f32 %v4757_v7  ;;  %v1491_v61 = vand.u32 2147483647, %v4722_v15  ;;  %vm1824_vm10 = vweird.f32 %v4750_v49 }
0x1511   : > { %3349 = vrcp.f32 %v4761_v34  ;;  %v1500_v58 = vmul.f32 %v4730_v53, %v1499_v55  ;;  %v1820_v59 = vsub.f32 1.0, %v1819_v48  ;;  %v1520_v48 = vsel %vm4784_vm15, %v4717_v35, %v1516_v3  ;;  %vm4866_vm14 = vmor %vm1823_vm12, %vm1824_vm10 }
0x1512   : > { %v1485_v6 = vmul.f32 %v4735_v57, %v1484_v30  ;;  %v2208_v30 = vmul.f32 %v4555_v47, %v2207_v9  ;;  %v1508_v9 = vand.u32 2147483648, %v4719_v33  ;;  %vm1492_vm8 = vcmp.eq.f32.partialorder %v1491_v61, 8.507059e+37 }
0x1513   : > { %v1821_v3 = vmul.f32 %v4750_v49, %v1820_v59  ;;  %vm1532_vm15 = vweird.f32 %v4739_v37 }
0x1514   : > { %v1486_v44 = vadd.f32 %v4735_v57, %v1485_v6  ;;  %v1524_v6 = vor.u32 1.1754944e-38, %v1523_v39  ;;  %v1501_v39 = vadd.f32 %v4730_v53, %v1500_v58  ;;  %v4819_v12 = vsel %vm1394_vm11, %v2208_v30, 0.0 }
0x1515   : > { %v4778_v43 = vpop.eup %3345  ;;  %v1494_v58 = vor.u32 1.1754944e-38, %v1493_v56  ;;  %v4843_v56 = vpop.xlane.xlu1 %1459  ;;  %v1822_v33 = vadd.f32 %v4750_v49, %v1821_v3  ;;  %v2233_v30 = vand.u32 2147483647, %v4757_v7 }
0x1516   : > { %v1528_v47 = vmul.f32 %v4778_v43, %v4739_v37  ;;  %v4807_v15 = vpop.eup %3347  ;;  %v1490_v35 = vsel %vm4803_vm5, %v4735_v57, %v1486_v44  ;;  %v4814_v24 = vpop.xlane.xlu0 %1798  ;;  %v1525_v14 = vsel %vm4788_vm2, %v1524_v6, %v1520_v48  ;;  %v1827_v57 = vand.u32 2147483647, %v4724_v42 }
0x1517   : > { %v4816_v28 = vpop.eup %3349  ;;  %v1829_v44 = vand.u32 2147483648, %v4724_v42  ;;  %v1495_v22 = vsel %vm1492_vm8, %v1494_v58, %v1490_v35  ;;  %v2225_v61 = vmul.f32 %v4807_v15, %v4757_v7  ;;  %3351 = vrcp.f32 %v4814_v24 }
0x1518   : > { %v1529_v23 = vsub.f32 1.0, %v1528_v47  ;;  %v2210_v59 = vmul.f32 %v4816_v28, %v4761_v34  ;;  %v1505_v55 = vsel %vm4835_vm9, %v4730_v53, %v1501_v39  ;;  %v1526_v48 = vmul.f32 %v4563_v18, %v1525_v14  ;;  %v4860_v39 = vpop.xlane.xlu2 %1801 }
0x1519   : > { %v1509_v35 = vor.u32 1.1754944e-38, %v1508_v9  ;;  %v1536_v58 = vand.u32 2147483647, %v4739_v37  ;;  %v1496_v41 = vmul.f32 %v4574_v8, %v1495_v22  ;;  %vm4854_vm13 = vcmp.eq.f32.partialorder %v1827_v57, 8.507059e+37 }
0x151a   : > { %v1530_v6 = vmul.f32 %v4778_v43, %v1529_v23  ;;  %v2211_v47 = vsub.f32 1.0, %v2210_v59  ;;  %v1538_v53 = vand.u32 2147483648, %v4739_v37  ;;  %3353 = vrcp.f32 %v4843_v56 }
0x151b   : > { %v1510_v18 = vsel %vm4821_vm7, %v1509_v35, %v1505_v55  ;;  %v1830_v8 = vor.u32 1.1754944e-38, %v1829_v44  ;;  %v2226_v9 = vsub.f32 1.0, %v2225_v61  ;;  %v1826_v3 = vsel %vm4866_vm14, %v4750_v49, %v1822_v33 }
0x151c   : > { %v1531_v23 = vadd.f32 %v4778_v43, %v1530_v6  ;;  %vm1533_vm2 = vweird.f32 %v4778_v43  ;;  %v2212_v0 = vmul.f32 %v4816_v28, %v2211_v47  ;;  %v1592_v57 = vsel %vm1394_vm11, %v1526_v48, 0.0 }
0x151d   : > { %v4877_v14 = vpop.eup %3351  ;;  %vm4880_vm3 = vcmp.eq.f32.partialorder %v1536_v58, 8.507059e+37  ;;  %3355 = vrcp.f32 %v4860_v39  ;;  %v1588_v49 = vsel %vm1394_vm11, %v1496_v41, 0.0  ;;  %v1539_v44 = vor.u32 1.1754944e-38, %v1538_v53  ;;  %vm4895_vm4 = vmor %vm1532_vm15, %vm1533_vm2 }
0x151e   : > { %v1834_v22 = vmul.f32 %v4877_v14, %v4814_v24  ;;  %v1511_v61 = vmul.f32 %v4571_v32, %v1510_v18  ;;  %v1831_v55 = vsel %vm4854_vm13, %v1830_v8, %v1826_v3  ;;  %v2227_v6 = vmul.f32 %v4807_v15, %v2226_v9  ;;  %v4901_v47 = vpop.xlane.xlu0 %2180 }
0x151f   : > { %v2235_v41 = vand.u32 2147483648, %v4757_v7  ;;  %v1535_v32 = vsel %vm4895_vm4, %v4778_v43, %v1531_v23  ;;  %v2213_v20 = vadd.f32 %v4816_v28, %v2212_v0  ;;  %vm2215_vm5 = vweird.f32 %v4816_v28 }
0x1520   : > { %v4903_v48 = vpop.eup %3353  ;;  %v1835_v37 = vsub.f32 1.0, %v1834_v22  ;;  %v1589_v35 = vadd.f32 %v1588_v49, %v4765_v25  ;;  %v2218_v58 = vand.u32 2147483647, %v4761_v34  ;;  %v2220_v53 = vand.u32 2147483648, %v4761_v34 }
0x1521   : > { %v1543_v18 = vmul.f32 %v4903_v48, %v4843_v56  ;;  %v1832_v42 = vmul.f32 %v4569_v29, %v1831_v55  ;;  %vm4916_vm7 = vcmp.eq.f32.partialorder %v2233_v30, 8.507059e+37  ;;  %vm2214_vm8 = vweird.f32 %v4761_v34  ;;  %v4935_v34 = vpop.xlane.xlu1 %1462 }
0x1522   : > { %3357 = vrcp.f32 %v4901_v47  ;;  %v1590_v25 = vsel %vm1394_vm11, %v1511_v61, 0.0  ;;  %v1540_v9 = vsel %vm4880_vm3, %v1539_v44, %v1535_v32  ;;  %v2228_v3 = vadd.f32 %v4807_v15, %v2227_v6  ;;  %vm4931_vm10 = vmor %vm2214_vm8, %vm2215_vm5 }
0x1523   : > { %v4922_v43 = vpop.eup %3355  ;;  %vm2230_vm9 = vweird.f32 %v4807_v15  ;;  %v2217_v23 = vsel %vm4931_vm10, %v4816_v28, %v2213_v20  ;;  %v1836_v0 = vmul.f32 %v4877_v14, %v1835_v37  ;;  %v1544_v59 = vsub.f32 1.0, %v1543_v18  ;;  %v4955_v28 = vpop.xlane.xlu2 %1807 }
0x1524   : > { %v1849_v49 = vmul.f32 %v4922_v43, %v4860_v39  ;;  %v1591_v44 = vadd.f32 %v1590_v25, %v1589_v35  ;;  %v2236_v30 = vor.u32 1.1754944e-38, %v2235_v41  ;;  %vm2219_vm12 = vcmp.eq.f32.partialorder %v2218_v58, 8.507059e+37  ;;  %vm4949_vm13 = vmor %vm2229_vm1, %vm2230_vm9 }
0x1525   : > { %v2221_v22 = vor.u32 1.1754944e-38, %v2220_v53  ;;  %v4944_v61 = vsel %vm1394_vm11, %v1832_v42, 0.0  ;;  %v1541_v55 = vmul.f32 %v4583_v11, %v1540_v9  ;;  %vm1838_vm14 = vweird.f32 %v4814_v24 }
0x1526   : > { %3359 = vrcp.f32 %v4935_v34  ;;  %v2232_v6 = vsel %vm4949_vm13, %v4807_v15, %v2228_v3  ;;  %v1842_v32 = vand.u32 2147483647, %v4814_v24  ;;  %v1844_v11 = vand.u32 2147483648, %v4814_v24 }
0x1527   : > { %v2222_v41 = vsel %vm2219_vm12, %v2221_v22, %v2217_v23  ;;  %v1837_v20 = vadd.f32 %v4877_v14, %v1836_v0  ;;  %vm1839_vm15 = vweird.f32 %v4877_v14  ;;  %v1545_v37 = vmul.f32 %v4903_v48, %v1544_v59  ;;  %v4995_v59 = vpop.xlane.xlu0 %1465 }
0x1528   : > { %v4962_v7 = vpop.eup %3357  ;;  %v1850_v35 = vsub.f32 1.0, %v1849_v49  ;;  %v1593_v58 = vadd.f32 %v1592_v57, %v1591_v44  ;;  %vm1547_vm2 = vweird.f32 %v4843_v56  ;;  %3361 = vrcp.f32 %v4955_v28  ;;  %vm4978_vm3 = vmor %vm1838_vm14, %vm1839_vm15 }
0x1529   : > { %v2240_v15 = vmul.f32 %v4962_v7, %v4901_v47  ;;  %v1594_v53 = vsel %vm1394_vm11, %v1541_v55, 0.0  ;;  %v2237_v18 = vsel %vm4916_vm7, %v2236_v30, %v2232_v6  ;;  %v2223_v42 = vmul.f32 %v4586_v46, %v2222_v41 }
0x152a   : > { %v1551_v25 = vand.u32 2147483647, %v4843_v56  ;;  %vm4982_vm1 = vcmp.eq.f32.partialorder %v1842_v32, 8.507059e+37  ;;  %v1845_v3 = vor.u32 1.1754944e-38, %v1844_v11  ;;  %vm1548_vm4 = vweird.f32 %v4903_v48  ;;  %v5024_v11 = vpop.xlane.xlu1 %1804 }
0x152b   : > { %v1553_v8 = vand.u32 2147483648, %v4843_v56  ;;  %v1841_v46 = vsel %vm4978_vm3, %v4877_v14, %v1837_v20  ;;  %v1546_v24 = vadd.f32 %v4903_v48, %v1545_v37  ;;  %v1851_v23 = vmul.f32 %v4922_v43, %v1850_v35  ;;  %vm5018_vm8 = vmor %vm1547_vm2, %vm1548_vm4  ;;  %v5042_v57 = vpop.xlane.xlu2 %2186 }
0x152c   : > { %v4988_v29 = vpop.eup %3359  ;;  %v2241_v0 = vsub.f32 1.0, %v2240_v15  ;;  %v4997_v49 = vadd.f32 %v1594_v53, %v1593_v58  ;;  %v2238_v44 = vmul.f32 %v4590_v2, %v2237_v18  ;;  %vm1853_vm5 = vweird.f32 %v4860_v39 }
0x152d   : > { %v1558_v30 = vmul.f32 %v4988_v29, %v4935_v34  ;;  %v2315_v22 = vsel %vm1394_vm11, %v2223_v42, 0.0  ;;  %vm5004_vm7 = vcmp.eq.f32.partialorder %v1551_v25, 8.507059e+37  ;;  %v1857_v55 = vand.u32 2147483647, %v4860_v39 }
0x152e   : > { %v1859_v33 = vand.u32 2147483648, %v4860_v39  ;;  %v5010_v6 = vpop.eup %3361  ;;  %v1846_v2 = vsel %vm4982_vm1, %v1845_v3, %v1841_v46  ;;  %vm1854_vm9 = vweird.f32 %v4922_v43  ;;  %3363 = vrcp.f32 %v4995_v59 }
0x152f   : > { %v1559_v32 = vsub.f32 1.0, %v1558_v30  ;;  %v1550_v20 = vsel %vm5018_vm8, %v4903_v48, %v1546_v24  ;;  %v1852_v37 = vadd.f32 %v4922_v43, %v1851_v23  ;;  %v2242_v35 = vmul.f32 %v4962_v7, %v2241_v0  ;;  %vm5050_vm12 = vmor %vm1853_vm5, %vm1854_vm9 }
0x1530   : > { %v1879_v56 = vmul.f32 %v5010_v6, %v4955_v28  ;;  %v2317_v58 = vsel %vm1394_vm11, %v2238_v44, 0.0  ;;  %v2316_v15 = vadd.f32 %v2315_v22, %v4819_v12  ;;  %v1554_v53 = vor.u32 1.1754944e-38, %v1553_v8 }
0x1531   : > { %v1560_v18 = vmul.f32 %v4988_v29, %v1559_v32  ;;  %v1847_v42 = vmul.f32 %v4598_v5, %v1846_v2  ;;  %vm5037_vm10 = vcmp.eq.f32.partialorder %v1857_v55, 8.507059e+37  ;;  %v1860_v48 = vor.u32 1.1754944e-38, %v1859_v33 }
0x1532   : > { %3365 = vrcp.f32 %v5024_v11  ;;  %v1555_v9 = vsel %vm5004_vm7, %v1554_v53, %v1550_v20  ;;  %v2248_v5 = vand.u32 2147483647, %v4901_v47  ;;  %v2250_v3 = vand.u32 2147483648, %v4901_v47  ;;  %v5112_v25 = vpop.xlane.xlu1 %2183 }
0x1533   : > { %v1566_v8 = vand.u32 2147483647, %v4935_v34  ;;  %v1856_v46 = vsel %vm5050_vm12, %v4922_v43, %v1852_v37  ;;  %v2243_v24 = vadd.f32 %v4962_v7, %v2242_v35  ;;  %vm2245_vm13 = vweird.f32 %v4962_v7  ;;  %v5151_v33 = vpop.xlane.xlu2 %2189 }
0x1534   : > { %v1880_v23 = vsub.f32 1.0, %v1879_v56  ;;  %v5062_v39 = vpop.eup %3363  ;;  %v1561_v0 = vadd.f32 %v4988_v29, %v1560_v18  ;;  %vm1563_vm14 = vweird.f32 %v4988_v29  ;;  %v1568_v44 = vand.u32 2147483648, %v4935_v34 }
0x1535   : > { %3367 = vrcp.f32 %v5042_v57  ;;  %v1939_v30 = vsel %vm1394_vm11, %v1847_v42, 0.0  ;;  %v1556_v22 = vmul.f32 %v4605_v38, %v1555_v9  ;;  %vm2244_vm15 = vweird.f32 %v4901_v47 }
0x1536   : > { %v5071_v43 = vadd.f32 %v2317_v58, %v2316_v15  ;;  %v1861_v14 = vsel %vm5037_vm10, %v1860_v48, %v1856_v46  ;;  %vm5075_vm2 = vmor %vm2244_vm15, %vm2245_vm13  ;;  %vm5079_vm3 = vcmp.eq.f32.partialorder %v2248_v5, 8.507059e+37  ;;  %v2251_v2 = vor.u32 1.1754944e-38, %v2250_v3 }
0x1537   : > { %vm1562_vm1 = vweird.f32 %v4935_v34  ;;  %v2247_v38 = vsel %vm5075_vm2, %v4962_v7, %v2243_v24  ;;  %vm5093_vm5 = vcmp.eq.f32.partialorder %v1566_v8, 8.507059e+37  ;;  %v1881_v20 = vmul.f32 %v5010_v6, %v1880_v23  ;;  %v5100_v34 = vpop.xlane.xlu0 %1810 }
0x1538   : > { %v5084_v41 = vpop.eup %3365  ;;  %vm5089_vm4 = vmor %vm1562_vm1, %vm1563_vm14  ;;  %v1573_v37 = vmul.f32 %v5062_v39, %v4995_v59  ;;  %v1940_v35 = vadd.f32 %v1939_v30, %v4944_v61  ;;  %v1569_v56 = vor.u32 1.1754944e-38, %v1568_v44  ;;  %v1596_v15 = vsel %vm1394_vm11, %v1556_v22, 0.0 }
0x1539   : > { %v1565_v7 = vsel %vm5089_vm4, %v4988_v29, %v1561_v0  ;;  %v1864_v58 = vmul.f32 %v5084_v41, %v5024_v11  ;;  %v1862_v53 = vmul.f32 %v4601_v45, %v1861_v14  ;;  %v1887_v18 = vand.u32 2147483647, %v4955_v28 }
0x153a   : > { %v1889_v42 = vand.u32 2147483648, %v4955_v28  ;;  %v2252_v61 = vsel %vm5079_vm3, %v2251_v2, %v2247_v38  ;;  %vm1884_vm7 = vweird.f32 %v5010_v6  ;;  %3369 = vrcp.f32 %v5100_v34 }
0x153b   : > { %v5114_v48 = vpop.eup %3367  ;;  %v1865_v29 = vsub.f32 1.0, %v1864_v58  ;;  %v1570_v9 = vsel %vm5093_vm5, %v1569_v56, %v1565_v7  ;;  %v1882_v45 = vadd.f32 %v5010_v6, %v1881_v20  ;;  %v1574_v12 = vsub.f32 1.0, %v1573_v37 }
0x153c   : > { %v2270_v5 = vmul.f32 %v5114_v48, %v5042_v57  ;;  %vm1883_vm8 = vweird.f32 %v4955_v28  ;;  %v1583_v3 = vand.u32 2147483648, %v4995_v59  ;;  %3371 = vrcp.f32 %v5112_v25 }
0x153d   : > { %v1866_v8 = vmul.f32 %v5084_v41, %v1865_v29  ;;  %v1597_v46 = vadd.f32 %v1596_v15, %v4997_v49  ;;  %v2253_v24 = vmul.f32 %v4613_v19, %v2252_v61  ;;  %vm5131_vm9 = vcmp.eq.f32.partialorder %v1887_v18, 8.507059e+37  ;;  %vm5140_vm10 = vmor %vm1883_vm8, %vm1884_vm7 }
0x153e   : > { %v1581_v0 = vand.u32 2147483647, %v4995_v59  ;;  %v1941_v44 = vsel %vm1394_vm11, %v1862_v53, 0.0  ;;  %v1571_v28 = vmul.f32 %v4620_v27, %v1570_v9  ;;  %v1890_v22 = vor.u32 1.1754944e-38, %v1889_v42 }
0x153f   : > { %vm1577_vm12 = vweird.f32 %v4995_v59  ;;  %v5145_v19 = vadd.f32 %v1941_v44, %v1940_v35  ;;  %v1886_v49 = vsel %vm5140_vm10, %v5010_v6, %v1882_v45  ;;  %v1575_v14 = vmul.f32 %v5062_v39, %v1574_v12  ;;  %v5167_v35 = vpop.xlane.xlu0 %2539 }
0x1540   : > { %v2271_v55 = vsub.f32 1.0, %v2270_v5  ;;  %v5153_v27 = vpop.eup %3369  ;;  %v1584_v2 = vor.u32 1.1754944e-38, %v1583_v3  ;;  %v1867_v38 = vadd.f32 %v5084_v41, %v1866_v8  ;;  %vm1868_vm13 = vweird.f32 %v5024_v11 }
0x1541   : > { %vm1869_vm14 = vweird.f32 %v5084_v41  ;;  %v2319_v47 = vsel %vm1394_vm11, %v2253_v24, 0.0  ;;  %vm5159_vm15 = vcmp.eq.f32.partialorder %v1581_v0, 8.507059e+37  ;;  %v1872_v6 = vand.u32 2147483647, %v5024_v11  ;;  %v5206_v24 = vpop.xlane.xlu1 %2542 }
0x1542   : > { %v1874_v20 = vand.u32 2147483648, %v5024_v11  ;;  %v1894_v37 = vmul.f32 %v5153_v27, %v5100_v34  ;;  %v5169_v7 = vpop.eup %3371  ;;  %v1598_v56 = vsel %vm1394_vm11, %v1571_v28, 0.0  ;;  %v1891_v58 = vsel %vm5131_vm9, %v1890_v22, %v1886_v49  ;;  %vm5177_vm3 = vmor %vm1868_vm13, %vm1869_vm14 }
0x1543   : > { %vm1578_vm2 = vweird.f32 %v5062_v39  ;;  %3373 = vrcp.f32 %v5151_v33  ;;  %v1576_v15 = vadd.f32 %v5062_v39, %v1575_v14  ;;  %v2272_v53 = vmul.f32 %v5114_v48, %v2271_v55 }
0x1544   : > { %v1895_v18 = vsub.f32 1.0, %v1894_v37  ;;  %v2255_v42 = vmul.f32 %v5169_v7, %v5112_v25  ;;  %v1871_v61 = vsel %vm5177_vm3, %v5084_v41, %v1867_v38  ;;  %v2278_v29 = vand.u32 2147483647, %v5042_v57  ;;  %vm5201_vm4 = vmor %vm1577_vm12, %vm1578_vm2 }
0x1545   : > { %v2280_v9 = vand.u32 2147483648, %v5042_v57  ;;  %3375 = vrcp.f32 %v5167_v35  ;;  %v1892_v45 = vmul.f32 %v4616_v62, %v1891_v58  ;;  %v1875_v12 = vor.u32 1.1754944e-38, %v1874_v20 }
0x1546   : > { %vm2274_vm1 = vweird.f32 %v5042_v57  ;;  %v2256_v5 = vsub.f32 1.0, %v2255_v42  ;;  %v5193_v3 = vadd.f32 %v2319_v47, %v5071_v43  ;;  %v5195_v8 = vadd.f32 %v1598_v56, %v1597_v46 }
0x1547   : > { %vm1873_vm5 = vcmp.eq.f32.partialorder %v1872_v6, 8.507059e+37  ;;  %v1896_v62 = vmul.f32 %v5153_v27, %v1895_v18  ;;  %v1580_v43 = vsel %vm5201_vm4, %v5062_v39, %v1576_v15  ;;  %v2273_v46 = vadd.f32 %v5114_v48, %v2272_v53  ;;  %v5238_v6 = vpop.xlane.xlu2 %1816  ;;  %v5255_v56 = vpop.xlane.xlu0 %1813 }
0x1548   : > { %v1876_v23 = vsel %vm1873_vm5, %v1875_v12, %v1871_v61  ;;  %vm2275_vm7 = vweird.f32 %v5114_v48  ;;  %vm5215_vm8 = vcmp.eq.f32.partialorder %v2278_v29, 8.507059e+37  ;;  %v2281_v44 = vor.u32 1.1754944e-38, %v2280_v9 }
0x1549   : > { %v5213_v0 = vpop.eup %3373  ;;  %v1902_v28 = vand.u32 2147483647, %v5100_v34  ;;  %v2257_v30 = vmul.f32 %v5169_v7, %v2256_v5  ;;  %v1945_v22 = vsel %vm1394_vm11, %v1892_v45, 0.0  ;;  %vm1898_vm9 = vweird.f32 %v5100_v34  ;;  %vm5232_vm10 = vmor %vm2274_vm1, %vm2275_vm7  ;;  %v5291_v5 = vpop.xlane.xlu1 %2192 }
0x154a   : > { %v1904_v39 = vand.u32 2147483648, %v5100_v34  ;;  %3377 = vrcp.f32 %v5206_v24  ;;  %v1585_v14 = vsel %vm5159_vm15, %v1584_v2, %v1580_v43  ;;  %v1877_v55 = vmul.f32 %v4635_v52, %v1876_v23 }
0x154b   : > { %v5225_v49 = vpop.eup %3375  ;;  %v1897_v47 = vadd.f32 %v5153_v27, %v1896_v62  ;;  %vm1899_vm12 = vweird.f32 %v5153_v27  ;;  %v2277_v20 = vsel %vm5232_vm10, %v5114_v48, %v2273_v46  ;;  %v2263_v2 = vand.u32 2147483647, %v5112_v25 }
0x154c   : > { %v2285_v52 = vmul.f32 %v5213_v0, %v5151_v33  ;;  %v2563_v57 = vmul.f32 %v5225_v49, %v5167_v35  ;;  %vm5248_vm13 = vcmp.eq.f32.partialorder %v1902_v28, 8.507059e+37  ;;  %v2258_v37 = vadd.f32 %v5169_v7, %v2257_v30  ;;  %vm5260_vm2 = vmor %vm1898_vm9, %vm1899_vm12 }
0x154d   : > { %vm2259_vm14 = vweird.f32 %v5112_v25  ;;  %vm2260_vm15 = vweird.f32 %v5169_v7  ;;  %v1586_v48 = vmul.f32 %v4628_v31, %v1585_v14  ;;  %v1905_v15 = vor.u32 1.1754944e-38, %v1904_v39 }
0x154e   : > { %v2265_v11 = vand.u32 2147483648, %v5112_v25  ;;  %3379 = vrcp.f32 %v5238_v6  ;;  %v1943_v53 = vsel %vm1394_vm11, %v1877_v55, 0.0  ;;  %v2282_v18 = vsel %vm5215_vm8, %v2281_v44, %v2277_v20  ;;  %vm5275_vm3 = vmor %vm2259_vm14, %vm2260_vm15 }
0x154f   : > { %v1901_v31 = vsel %vm5260_vm2, %v5153_v27, %v1897_v47  ;;  %v2295_v34 = vand.u32 2147483648, %v5151_v33  ;;  %vm5279_vm1 = vcmp.eq.f32.partialorder %v2263_v2, 8.507059e+37  ;;  %v2286_v29 = vsub.f32 1.0, %v2285_v52 }
0x1550   : > { %v5273_v42 = vpop.eup %3377  ;;  %v2564_v9 = vsub.f32 1.0, %v2563_v57  ;;  %3381 = vrcp.f32 %v5255_v56  ;;  %v2262_v27 = vsel %vm5275_vm3, %v5169_v7, %v2258_v37  ;;  %vm2289_vm4 = vweird.f32 %v5151_v33 }
0x1551   : > { %v2293_v45 = vand.u32 2147483647, %v5151_v33  ;;  %v2578_v12 = vmul.f32 %v5273_v42, %v5206_v24  ;;  %v1944_v41 = vadd.f32 %v1943_v53, %v5145_v19  ;;  %v2283_v62 = vmul.f32 %v4631_v16, %v2282_v18 }
0x1552   : > { %v1906_v43 = vsel %vm5248_vm13, %v1905_v15, %v1901_v31  ;;  %v2266_v23 = vor.u32 1.1754944e-38, %v2265_v11  ;;  %v5298_v46 = vsel %vm1394_vm11, %v1586_v48, 0.0  ;;  %v2296_v7 = vor.u32 1.1754944e-38, %v2295_v34  ;;  %v5329_v48 = vpop.xlane.xlu2 %2548 }
0x1553   : > { %v2571_v59 = vand.u32 2147483647, %v5167_v35  ;;  %v2579_v44 = vsub.f32 1.0, %v2578_v12  ;;  %v2287_v19 = vmul.f32 %v5213_v0, %v2286_v29  ;;  %v2565_v16 = vmul.f32 %v5225_v49, %v2564_v9 }
0x1554   : > { %v5301_v28 = vpop.eup %3379  ;;  %v2267_v30 = vsel %vm5279_vm1, %v2266_v23, %v2262_v27  ;;  %3383 = vrcp.f32 %v5291_v5  ;;  %v1907_v39 = vmul.f32 %v4643_v40, %v1906_v43  ;;  %vm2567_vm5 = vweird.f32 %v5167_v35 }
0x1555   : > { %v2573_v14 = vand.u32 2147483648, %v5167_v35  ;;  %v1924_v55 = vmul.f32 %v5301_v28, %v5238_v6  ;;  %v5316_v47 = vsel %vm1394_vm11, %v2283_v62, 0.0  ;;  %v1946_v20 = vadd.f32 %v1945_v22, %v1944_v41 }
0x1556   : > { %v5313_v38 = vpop.eup %3381  ;;  %vm2290_vm7 = vweird.f32 %v5213_v0  ;;  %vm5319_vm8 = vcmp.eq.f32.partialorder %v2293_v45, 8.507059e+37  ;;  %v2580_v40 = vmul.f32 %v5273_v42, %v2579_v44  ;;  %v2268_v52 = vmul.f32 %v4650_v1, %v2267_v30 }
0x1557   : > { %v2586_v57 = vand.u32 2147483647, %v5206_v24  ;;  %v2588_v32 = vand.u32 2147483648, %v5206_v24  ;;  %v1909_v37 = vmul.f32 %v5313_v38, %v5255_v56  ;;  %v2288_v22 = vadd.f32 %v5213_v0, %v2287_v19  ;;  %vm5345_vm12 = vmor %vm2289_vm4, %vm2290_vm7 }
0x1558   : > { %v2566_v58 = vadd.f32 %v5225_v49, %v2565_v16  ;;  %vm2568_vm9 = vweird.f32 %v5225_v49  ;;  %vm5334_vm10 = vcmp.eq.f32.partialorder %v2571_v59, 8.507059e+37  ;;  %v1947_v1 = vsel %vm1394_vm11, %v1907_v39, 0.0 }
0x1559   : > { %v2574_v11 = vor.u32 1.1754944e-38, %v2573_v14  ;;  %v1925_v53 = vsub.f32 1.0, %v1924_v55  ;;  %v1910_v18 = vsub.f32 1.0, %v1909_v37  ;;  %v2581_v61 = vadd.f32 %v5273_v42, %v2580_v40  ;;  %vm5356_vm15 = vmor %vm2567_vm5, %vm2568_vm9  ;;  %v5403_v14 = vpop.xlane.xlu1 %2551 }
0x155a   : > { %v5339_v31 = vpop.eup %3383  ;;  %vm2582_vm13 = vweird.f32 %v5206_v24  ;;  %vm2583_vm14 = vweird.f32 %v5273_v42  ;;  %3385 = vrcp.f32 %v5329_v48  ;;  %v2321_v25 = vsel %vm1394_vm11, %v2268_v52, 0.0 }
0x155b   : > { %vm5360_vm2 = vcmp.eq.f32.partialorder %v2586_v57, 8.507059e+37  ;;  %v2589_v9 = vor.u32 1.1754944e-38, %v2588_v32  ;;  %v1911_v27 = vmul.f32 %v5313_v38, %v1910_v18  ;;  %v5365_v24 = vadd.f32 %v1947_v1, %v1946_v20  ;;  %vm5375_vm3 = vmor %vm2582_vm13, %vm2583_vm14  ;;  %v5423_v32 = vpop.xlane.xlu2 %2554 }
0x155c   : > { %v2292_v45 = vsel %vm5345_vm12, %v5213_v0, %v2288_v22  ;;  %v2570_v35 = vsel %vm5356_vm15, %v5225_v49, %v2566_v58  ;;  %v2300_v12 = vmul.f32 %v5339_v31, %v5291_v5  ;;  %v1926_v62 = vmul.f32 %v5301_v28, %v1925_v53  ;;  %v5383_v0 = vpop.xlane.xlu0 %2545 }
0x155d   : > { %vm1928_vm1 = vweird.f32 %v5238_v6  ;;  %v1932_v43 = vand.u32 2147483647, %v5238_v6  ;;  %v1934_v23 = vand.u32 2147483648, %v5238_v6  ;;  %v2322_v59 = vadd.f32 %v2321_v25, %v5193_v3 }
0x155e   : > { %v2585_v49 = vsel %vm5375_vm3, %v5273_v42, %v2581_v61  ;;  %v1912_v44 = vadd.f32 %v5313_v38, %v1911_v27  ;;  %vm1914_vm4 = vweird.f32 %v5313_v38  ;;  %v5393_v30 = vsel %vm5319_vm8, %v2296_v7, %v2292_v45 }
0x155f   : > { %v2575_v19 = vsel %vm5334_vm10, %v2574_v11, %v2570_v35  ;;  %vm1913_vm5 = vweird.f32 %v5255_v56  ;;  %v1919_v16 = vand.u32 2147483648, %v5255_v56  ;;  %v1917_v39 = vand.u32 2147483647, %v5255_v56 }
0x1560   : > { %v5399_v3 = vpop.eup %3385  ;;  %v2301_v42 = vsub.f32 1.0, %v2300_v12  ;;  %3387 = vrcp.f32 %v5383_v0  ;;  %v2590_v7 = vsel %vm5360_vm2, %v2589_v9, %v2585_v49  ;;  %v1927_v55 = vadd.f32 %v5301_v28, %v1926_v62  ;;  %vm5409_vm8 = vmor %vm1913_vm5, %vm1914_vm4 }
0x1561   : > { %vm1929_vm7 = vweird.f32 %v5301_v28  ;;  %v2608_v2 = vmul.f32 %v5399_v3, %v5329_v48  ;;  %v2576_v56 = vmul.f32 %v4658_v60, %v2575_v19  ;;  %vm5416_vm9 = vcmp.eq.f32.partialorder %v1932_v43, 8.507059e+37  ;;  %v2765_v19 = vld [vmem:[#allocation12 + $0x18] sm:$0xff] }
0x1562   : > { %v1916_v52 = vsel %vm5409_vm8, %v5313_v38, %v1912_v44  ;;  %v3643_v57 = vmov 8.0   ;;  %v1920_v37 = vor.u32 1.1754944e-38, %v1919_v16  ;;  %v2308_v22 = vand.u32 2147483647, %v5291_v5  ;;  %vm5431_vm10 = vmor %vm1928_vm1, %vm1929_vm7 }
0x1563   : > { %3389 = vrcp.f32 %v3643_v57  ;;  %v2310_v58 = vand.u32 2147483648, %v5291_v5  ;;  %v2591_v60 = vmul.f32 %v4664_v13, %v2590_v7  ;;  %v1935_v38 = vor.u32 1.1754944e-38, %v1934_v23  ;;  %v5489_v7 = vpop.xlane.xlu2 %2557 }
0x1564   : > { %3391 = vrcp.f32 %v5403_v14  ;;  %vm1918_vm12 = vcmp.eq.f32.partialorder %v1917_v39, 8.507059e+37  ;;  %v2302_v1 = vmul.f32 %v5339_v31, %v2301_v42  ;;  %v5437_v11 = vadd.f32 %v5316_v47, %v2322_v59  ;;  %v5461_v12 = vpop.xlane.xlu0 %2560 }
0x1565   : > { %v1931_v53 = vsel %vm5431_vm10, %v5301_v28, %v1927_v55  ;;  %v1921_v18 = vsel %vm1918_vm12, %v1920_v37, %v1916_v52  ;;  %v2609_v34 = vsub.f32 1.0, %v2608_v2  ;;  %v5443_v6 = vsel %vm1394_vm11, %v2576_v56, 0.0 }
0x1566   : > { %v3388_v13 = vpop.eup %3387  ;;  %vm2304_vm13 = vweird.f32 %v5291_v5  ;;  %vm2305_vm14 = vweird.f32 %v5339_v31  ;;  %3393 = vrcp.f32 %v5423_v32  ;;  %vm5448_vm15 = vcmp.eq.f32.partialorder %v2308_v22, 8.507059e+37 }
0x1567   : > { %v2311_v47 = vor.u32 1.1754944e-38, %v2310_v58  ;;  %vm2612_vm2 = vweird.f32 %v5329_v48  ;;  %v2616_v28 = vand.u32 2147483647, %v5329_v48  ;;  %v2618_v25 = vand.u32 2147483648, %v5329_v48  ;;  %vm5477_vm1 = vmor %vm2304_vm13, %vm2305_vm14 }
0x1568   : > { %v2593_v29 = vmul.f32 %v3388_v13, %v5383_v0  ;;  %v2683_v9 = vsel %vm1394_vm11, %v2591_v60, 0.0  ;;  %v1936_v27 = vsel %vm5416_vm9, %v1935_v38, %v1931_v53  ;;  %v1922_v45 = vmul.f32 %v4673_v10, %v1921_v18 }
0x1569   : > { %v3390_v33 = vpop.eup %3389  ;;  %v2303_v35 = vadd.f32 %v5339_v31, %v2302_v1  ;;  %v2610_v62 = vmul.f32 %v5399_v3, %v2609_v34  ;;  %v1601_v43 = vadd.f32 %v5298_v46, %v5195_v8  ;;  %vm2597_vm3 = vweird.f32 %v5383_v0 }
0x156a   : > { %v5463_v41 = vpop.eup %3391  ;;  %v1603_v23 = vmul.f32 8.0, %v3390_v33  ;;  %v2594_v59 = vsub.f32 1.0, %v2593_v29  ;;  %v2601_v49 = vand.u32 2147483647, %v5383_v0  ;;  %v2603_v44 = vand.u32 2147483648, %v5383_v0 }
0x156b   : > { %v2623_v10 = vmul.f32 %v5463_v41, %v5403_v14  ;;  %vm2598_vm4 = vweird.f32 %v3388_v13  ;;  %3395 = vrcp.f32 %v5461_v12  ;;  %v1949_v39 = vsel %vm1394_vm11, %v1922_v45, 0.0 }
0x156c   : > { %v1604_v8 = vsub.f32 1.0, %v1603_v23  ;;  %v2595_v46 = vmul.f32 %v3388_v13, %v2594_v59  ;;  %v5482_v16 = vpop.eup %3393  ;;  %v2307_v42 = vsel %vm5477_vm1, %v5339_v31, %v2303_v35  ;;  %vm2613_vm5 = vweird.f32 %v5399_v3  ;;  %vm2599_vm8 = vmor %vm2597_vm3, %vm2598_vm4 }
0x156d   : > { %v2624_v5 = vsub.f32 1.0, %v2623_v10  ;;  %v2611_v55 = vadd.f32 %v5399_v3, %v2610_v62  ;;  %v2638_v56 = vmul.f32 %v5482_v16, %v5423_v32  ;;  %vm1607_vm7 = vweird.f32 %v3390_v33  ;;  %vm5506_vm10 = vmor %vm2612_vm2, %vm2613_vm5 }
0x156e   : > { %v1605_v20 = vmul.f32 %v3390_v33, %v1604_v8  ;;  %v2596_v2 = vadd.f32 %v3388_v13, %v2595_v46  ;;  %vm2602_vm9 = vcmp.eq.f32.partialorder %v2601_v49, 8.507059e+37  ;;  %v2604_v40 = vor.u32 1.1754944e-38, %v2603_v44 }
0x156f   : > { %v2625_v31 = vmul.f32 %v5463_v41, %v2624_v5  ;;  %v2639_v37 = vsub.f32 1.0, %v2638_v56  ;;  %3397 = vrcp.f32 %v5489_v7  ;;  %v1937_v22 = vmul.f32 %v4661_v17, %v1936_v27 }
0x1570   : > { %v1606_v52 = vadd.f32 %v3390_v33, %v1605_v20  ;;  %v2600_v57 = vsel %vm2599_vm8, %v3388_v13, %v2596_v2  ;;  %v1950_v58 = vadd.f32 %v1949_v39, %v5365_v24  ;;  %v2312_v60 = vsel %vm5448_vm15, %v2311_v47, %v2307_v42 }
0x1571   : > { %v2605_v15 = vsel %vm2602_vm9, %v2604_v40, %v2600_v57  ;;  %v5510_v38 = vpop.eup %3395  ;;  %v2615_v17 = vsel %vm5506_vm10, %v5399_v3, %v2611_v55  ;;  %v2626_v1 = vadd.f32 %v5463_v41, %v2625_v31  ;;  %vm2628_vm12 = vweird.f32 %v5463_v41 }
0x1572   : > { %v5516_v24 = vsel %vm1607_vm7, %v3390_v33, %v1606_v52  ;;  %v2606_v53 = vmul.f32 %v4688_v54, %v2605_v15  ;;  %v2640_v18 = vmul.f32 %v5482_v16, %v2639_v37  ;;  %v2668_v34 = vmul.f32 %v5510_v38, %v5461_v12 }
0x1573   : > { %v1609_v48 = vmul.f32 %v5516_v24, %v1601_v43  ;;  %v2298_v13 = vmul.f32 %v4646_v51, %v5393_v30  ;;  %v2684_v3 = vadd.f32 %v2683_v9, %v5443_v6  ;;  %v2619_v61 = vor.u32 1.1754944e-38, %v2618_v25 }
0x1574   : > { %v2633_v47 = vand.u32 2147483648, %v5403_v14  ;;  %v1951_v29 = vsel %vm1394_vm11, %v1937_v22, 0.0  ;;  %vm2617_vm13 = vcmp.eq.f32.partialorder %v2616_v28, 8.507059e+37  ;;  %vm2627_vm14 = vweird.f32 %v5403_v14 }
0x1575   : > { %2989 = vmatmul.msk.f32.vlgmr.msra.gmra.mxu0 %vm1394_vm11, %v1609_v48  ;;  %v2631_v54 = vand.u32 2147483647, %v5403_v14  ;;  %v3398_v33 = vpop.eup %3397  ;;  %v2313_v27 = vmul.f32 %v4680_v4, %v2312_v60  ;;  %v2620_v45 = vsel %vm2617_vm13, %v2619_v61, %v2615_v17  ;;  %v5798_v51 = vunpack.i.l.bf16 %v4288_v36  ;;  %vm5538_vm15 = vmor %vm2627_vm14, %vm2628_vm12  ;;  %v5812_v61 = vld [vmem:[#allocation21_spill] sm:$0xff] }
0x1576   : > { %vm2643_vm2 = vweird.f32 %v5482_v16  ;;  %v1952_v6 = vadd.f32 %v1951_v29, %v1950_v58  ;;  %v2685_v28 = vsel %vm1394_vm11, %v2606_v53, 0.0  ;;  %v2630_v14 = vsel %vm5538_vm15, %v5463_v41, %v2626_v1  ;;  %v5809_v1 = vld [vmem:[#allocation18_spill] sm:$0xff] }
0x1577   : > { %2365 = vmatpush.msra.mxu0 %v5798_v51  ;;  %v2641_v4 = vadd.f32 %v5482_v16, %v2640_v18  ;;  %v2669_v25 = vsub.f32 1.0, %v2668_v34  ;;  %v5801_v9 = vunpack.i.h.bf16 %v4288_v36  ;;  %v2634_v35 = vor.u32 1.1754944e-38, %v2633_v47  ;;  %v5811_v34 = vld [vmem:[#allocation19_spill] sm:$0xff] }
0x1578   : > { %vm2642_vm3 = vweird.f32 %v5423_v32  ;;  %v2648_v62 = vand.u32 2147483648, %v5423_v32  ;;  %v2653_v43 = vmul.f32 %v3398_v33, %v5489_v7  ;;  %v2621_v23 = vmul.f32 %v4676_v26, %v2620_v45 }
0x1579   : > { %2366 = vmatpush.msra.mxu0 %v5801_v9  ;;  %vm2632_vm1 = vcmp.eq.f32.partialorder %v2631_v54, 8.507059e+37  ;;  %v2646_v59 = vand.u32 2147483647, %v5423_v32  ;;  %v1953_v41 = vmul.f32 %v1952_v6, %v5516_v24  ;;  %v2325_v49 = vsel %vm1394_vm11, %v2298_v13, 0.0  ;;  %vm5561_vm4 = vmor %vm2642_vm3, %vm2643_vm2  ;;  %v5813_v6 = vld [vmem:[#allocation22_spill] sm:$0xff]  ;;  %v3215_v9 = vpop.permute.xlu1 %3214 }
0x157a   : > { %v5802_v44 = vunpack.i.l.bf16 %v4549_v63  ;;  %v2686_v36 = vadd.f32 %v2685_v28, %v2684_v3  ;;  %v2635_v10 = vsel %vm2632_vm1, %v2634_v35, %v2630_v14  ;;  %v2654_v8 = vsub.f32 1.0, %v2653_v43 }
0x157b   : > { %v2326_v26 = vadd.f32 %v2325_v49, %v5437_v11  ;;  %v2645_v32 = vsel %vm5561_vm4, %v5482_v16, %v2641_v4  ;;  %v2670_v46 = vmul.f32 %v5510_v38, %v2669_v25  ;;  %v2663_v39 = vand.u32 2147483648, %v5489_v7 }
0x157c   : > { %2367 = vmatpush.msra.mxu0 %v5802_v44  ;;  %v5805_v42 = vunpack.i.h.bf16 %v4549_v63  ;;  %v2649_v5 = vor.u32 1.1754944e-38, %v2648_v62  ;;  %v2655_v55 = vmul.f32 %v3398_v33, %v2654_v8  ;;  %vm2658_vm5 = vweird.f32 %v3398_v33  ;;  %v2764_v8 = vld [vmem:[#allocation12 + $0x10] sm:$0xff] }
0x157d   : > { %v2661_v20 = vand.u32 2147483647, %v5489_v7  ;;  %v2327_v2 = vsel %vm1394_vm11, %v2313_v27, 0.0  ;;  %v2687_v11 = vsel %vm1394_vm11, %v2621_v23, 0.0  ;;  %v2636_v56 = vmul.f32 %v4690_v21, %v2635_v10  ;;  %3006 = vmatmul.msk.f32.vlgmr.msrb.gmra.mxu0 %vm1394_vm11, %v1953_v41 }
0x157e   : > { %2368 = vmatpush.msra.mxu0 %v5805_v42  ;;  %vm2647_vm7 = vcmp.eq.f32.partialorder %v2646_v59, 8.507059e+37  ;;  %v2688_v16 = vadd.f32 %v2687_v11, %v2686_v36  ;;  %v5806_v31 = vunpack.i.l.bf16 %v4489_v50  ;;  %v2656_v63 = vadd.f32 %v3398_v33, %v2655_v55 }
0x157f   : > { %v2650_v40 = vsel %vm2647_vm7, %v2649_v5, %v2645_v32  ;;  %vm2657_vm8 = vweird.f32 %v5489_v7  ;;  %v2671_v52 = vadd.f32 %v5510_v38, %v2670_v46  ;;  %vm2672_vm9 = vweird.f32 %v5461_v12  ;;  %v5808_v7 = vld [vmem:[#allocation20_spill] sm:$0xff] }
0x1580   : > { %2369 = vmatpush.msra.mxu0 %v5806_v31  ;;  %vm2673_vm10 = vweird.f32 %v5510_v38  ;;  %vm2659_vm12 = vmor %vm2657_vm8, %vm2658_vm5  ;;  %v2664_v21 = vor.u32 1.1754944e-38, %v2663_v39  ;;  %v5807_v57 = vunpack.i.h.bf16 %v4489_v50  ;;  %v2678_v37 = vand.u32 2147483648, %v5461_v12  ;;  %v3205_v50 = vpop.permute.xlu0 %3204 }
0x1581   : > { %v2660_v22 = vsel %vm2659_vm12, %v3398_v33, %v2656_v63  ;;  %vm2662_vm13 = vcmp.eq.f32.partialorder %v2661_v20, 8.507059e+37  ;;  %v2328_v58 = vadd.f32 %v2327_v2, %v2326_v26  ;;  %v2689_v60 = vsel %vm1394_vm11, %v2636_v56, 0.0  ;;  %vm2674_vm14 = vmor %vm2672_vm9, %vm2673_vm10  ;;  %v2763_v26 = vld [vmem:[#allocation12 + $0x8] sm:$0xff]  ;;  %v3220_v20 = vld [vmem:[%s5658_s7] ss:$0 sm:$0xff] }
0x1582   : > { %2370 = vmatpush.msra.mxu0 %v5807_v57  ;;  %v2651_v0 = vmul.f32 %v5808_v7, %v2650_v40  ;;  %v2676_v15 = vand.u32 2147483647, %v5461_v12  ;;  %v2665_v17 = vsel %vm2662_vm13, %v2664_v21, %v2660_v22  ;;  %v3202_v48 = vunpack.i.h.bf16 %v5809_v1 }
0x1583   : > { %v2690_v53 = vadd.f32 %v2689_v60, %v2688_v16  ;;  %v5810_v18 = vunpack.i.l.bf16 %v5809_v1  ;;  %v3196_v13 = vunpack.i.l.bf16 %v5811_v34  ;;  %v2675_v3 = vsel %vm2674_vm14, %v5510_v38, %v2671_v52  ;;  %v3210_v38 = vpop.permute.xlu2 %3209 }
0x1584   : > { %v2666_v47 = vmul.f32 %v5812_v61, %v2665_v17  ;;  %v2679_v29 = vor.u32 1.1754944e-38, %v2678_v37  ;;  %v2329_v54 = vmul.f32 %v2328_v58, %v5516_v24  ;;  %v3197_v33 = vunpack.i.h.bf16 %v5811_v34 }
0x1585   : > { %2371 = vmatpush.msra.mxu0 %v5810_v18  ;;  %v2691_v27 = vsel %vm1394_vm11, %v2651_v0, 0.0  ;;  %vm2677_vm15 = vcmp.eq.f32.partialorder %v2676_v15, 8.507059e+37  ;;  %v3206_v45 = vunpack.i.l.bf16 %v3205_v50  ;;  %v3207_v14 = vunpack.i.h.bf16 %v3205_v50 }
0x1586   : > { %v2692_v12 = vadd.f32 %v2691_v27, %v2690_v53  ;;  %v2680_v51 = vsel %vm2677_vm15, %v2679_v29, %v2675_v3  ;;  %v2693_v30 = vsel %vm1394_vm11, %v2666_v47, 0.0  ;;  %v3211_v25 = vunpack.i.l.bf16 %v3210_v38 }
0x1587   : > { %2372 = vmatpush.msra.mxu0 %v3202_v48  ;;  %v2681_v28 = vmul.f32 %v5813_v6, %v2680_v51  ;;  %v3212_v62 = vunpack.i.h.bf16 %v3210_v38  ;;  %v3216_v23 = vunpack.i.l.bf16 %v3215_v9  ;;  %v3217_v59 = vunpack.i.h.bf16 %v3215_v9 }
0x1588   : > { %3023 = vmatmul.msk.f32.vlgmr.msra.gmra.mxu0 %vm1394_vm11, %v2329_v54  ;;  %v2694_v4 = vadd.f32 %v2693_v30, %v2692_v12  ;;  %vm2760_vm2 = vcmask 195584  }
0x1589   : > { %2733 = vmatpush.msrb.mxu0 %v3196_v13  ;;  %v2695_v35 = vsel %vm1394_vm11, %v2681_v28, 0.0 }
0x158a   : > { %v2696_v43 = vadd.f32 %v2695_v35, %v2694_v4 }
0x158b   : > { %2734 = vmatpush.msrb.mxu0 %v3197_v33 }
0x158c   : > { %v2697_v41 = vmul.f32 %v2696_v43, %v5516_v24  ;;  %v2762_v24 = vld [vmem:[#allocation12] sm:$0xff] }
0x158d   : > { %2735 = vmatpush.msrb.mxu0 %v3206_v45 }
0x158f   : > { %2736 = vmatpush.msrb.mxu0 %v3207_v14 }
0x1591   : > { %2737 = vmatpush.msrb.mxu0 %v3211_v25 }
0x1593   : > { %2738 = vmatpush.msrb.mxu0 %v3212_v62 }
0x1595   : > { %2739 = vmatpush.msrb.mxu0 %v3216_v23 }
0x1597   : > { %2740 = vmatpush.msrb.mxu0 %v3217_v59 }
0x1598   : > { %3040 = vmatmul.msk.f32.vlgmr.msrb.gmra.mxu0 %vm1394_vm11, %v2697_v41  ;;  %vm2757_vm11 = vcmask 64512  }
0x1599   : > { %2785 = vmatpush.msra.mxu0 %v2765_v19 }
0x159b   : > { %2786 = vmatpush.msra.mxu0 %v2764_v8 }
0x159d   : > { %2787 = vmatpush.msra.mxu0 %v2763_v26 }
0x159f   : > { %2788 = vmatpush.msra.mxu0 %v2762_v24 }
0x15f2   : > { %v1630_v49 = vpop.f32.mrf.mxu0 }
0x15fa   : > { %v2006_v44 = vpop.f32.mrf.mxu0 }
0x15fb   : > { %2746 = vrot.lane.b32.xlu2 %v2006_v44, %s3644_s5 }
0x1605   : > { %v2374_v36 = vpop.f32.mrf.mxu0 }
0x1606   : > { %2750 = vrot.lane.b32.xlu1 %v2374_v36, %s3638_s25  ;;  %s2807_s25 = sshll.u32 %s390_s10, 4  ;;  %s2808_s25 = int_to_ptr.vmem [resolvable:$true] %s2807_s25 }
0x1615   : > { %v2742_v10 = vpop.f32.mrf.mxu0 }
0x1616   : > { %2754 = vrot.lane.b32.xlu2 %v2742_v10, %s3645_s21  ;;  %s3569_s21 = scalar_lea.hbm %s5659_s8, 16 }
0x1617   : > { %p3571_p2 = scmp.lt.s32.totalorder %s3569_s21, %s3565_s13 }
0x1619   : > { %p3572_p9 = por %p3571_p2, %p3570_p11 }
0x161b   : > { %p3573_p10 = pnand %p3572_p9, %p3568_p8 }
0x1655   : > { %v2747_v32 = vpop.permute.xlu2 %2746 }
0x1656   : > { %v2758_v46 = vsel %vm2757_vm11, %v1630_v49, %v2747_v32 }
0x1670   : > { %v2755_v42 = vpop.permute.xlu2 %2754 }
0x1678   : > { %v2751_v39 = vpop.permute.xlu1 %2750 }
0x1679   : > { %v2759_v5 = vsel %vm405_vm0, %v2758_v46, %v2751_v39 }
0x167a   : > { %v2761_v55 = vsel %vm2760_vm2, %v2759_v5, %v2755_v42 }
0x167b   : > { %3041 = vmatmul.msk.f32.vlgmr.msra.gmra.mxu0 %vm489_vm6, %v2761_v55 }
0x16f8   : > { %v2790_v2 = vpop.f32.mrf.mxu0 }
0x16f9   : > { %v2791_v11 = vadd.f32 %v3220_v20, %v2790_v2 }
0x16fb   : > { %2793 = vst.msk [vmem:[%s390_s10] sm:$0xff] %vm489_vm6, %v2791_v11 }
0x16fc   : > { %3576 = shalt.err (!%p3573_p10)
}
0x16fd   : > { %3072 = dma.vmem_to_hbm [thread:$0]  (%p3786_p3), %s2808_s25, 128, %s2810_s26, %s2795_s19  }
0x16fe PF: > { %s2821_s23 = sand.u32 1, %s3611_s27   ;;  %p5814_p12 = scmp.ge.s32.totalorder %s3623_s30, 2 }
0x16ff   : > { %s2822_s16 = scalar_lea.sflag [#allocation6], %s2821_s23 }
0x1700   : > { %p3092_p13 = pnand %p5814_p12, %p3726_p6 }
0x1702   : > { %p3093_p0 = pneg %p3092_p13 }
0x1704   : > { %3606 = dma.done.wait (%p3093_p0), %s2822_s16, 128  }
0x1705   : > { %3608 = vsyncadd (%p3093_p0), %s2822_s16, 4294967168  ;;  %p23_p5 = scmp.ge.s32.totalorder %s3776_s14, 4   ;;  %s5815_s27 = smov %s3615_s28 }
0x1706   : > { %s5816_s28 = smov %s3619_s29  ;;  %s5817_s29 = smov %s3792_s18 }
0x1707   : > { %s5818_s30 = smov %s3776_s14  ;;  %25 = sbr.rel (!%p23_p5) target bundleno = 11 (0xb), region = 127 }
0x170c   :  { %2828 = vsyncpa [#allocation5], 1 }
0x170d   :  { %2830 = vsyncpa [#allocation5 + $0x1], 1 }
0x170e   :  { %2831 = vsyncpa [#allocation8], 1 }
0x170f   :  { %2832 = vsyncpa [#allocation11], 1 }
0x1710   :  { %2833 = vsyncpa [#allocation6], 1 }
0x1711   :  { %2835 = vsyncpa [#allocation6 + $0x1], 1 }

</bundles_post_ra>
